<compile_context>
chip_gen: v6e
topology: v6e:2x2x1
jax: 0.10.0
libtpu: 0.0.40
codegen_flags: <defaults>
</compile_context>

<pallas_src>
import functools
import math

import jax
import jax.numpy as jnp
from jax import lax
from jax.experimental import pallas as pl
from jax.experimental.pallas import tpu as pltpu

KH = 3  # conv kernel height
KW = 3  # conv kernel width


# ----------------------------------------------------------------------------
# Wrapper-side weight packing for the banded-matmul formulation of the conv.
# ----------------------------------------------------------------------------
def _pack_conv_weights(w, Wo):
    """w: (3, 3, Cin, F) f32  ->  (3, W*Cin, Wo*F) bf16 block-banded weights."""
    _, _, Cin, F = w.shape
    W_ = Wo + KW - 1
    bands = []
    for kh in range(KH):
        band = jnp.zeros((W_ * Cin, Wo * F), jnp.float32)
        for kw in range(KW):
            # place w[kh, kw] on the block diagonal shifted down by kw blocks
            band = band + jnp.kron(
                jnp.eye(W_, Wo, k=-kw, dtype=jnp.float32), w[kh, kw])
        bands.append(band)
    return jnp.stack(bands).astype(jnp.bfloat16)


def _choose_block_b(n, h0, target_rows=256):
    """Largest divisor of n with b*h0 <= target_rows (feeds the 256-row MXU on
    v6e/v7x; 2 passes on v5e is still fine).  Keep >=2 grid steps when possible
    so both v7x TensorCores get work."""
    target = max(1, target_rows // h0)
    divs = [d for d in range(1, n + 1) if n % d == 0]
    b = max([d for d in divs if d <= target] or [1])
    if n // b < 2 and n >= 2:
        b = max([d for d in divs if d <= max(1, n // 2)] or [1])
    return b


# ----------------------------------------------------------------------------
# Fully fused kernel: all convs + pool + fc1(+ReLU, energy) + fc2.
# Arg order (all VMEM refs):
#   x, [wb_l, bias_l] * num_conv, [mask_l] * (num_conv-1),
#   pool, sel, w1, b1, w2, b2,   ->   logits, energy
# ----------------------------------------------------------------------------
def _fused_kernel(*args, num_conv, scale):
    idx = 0
    x_ref = args[idx]; idx += 1
    conv_args = args[idx: idx + 2 * num_conv]; idx += 2 * num_conv
    mask_args = args[idx: idx + num_conv - 1]; idx += num_conv - 1
    (pool_ref, sel_ref, w1_ref, b1_ref, w2_ref, b2_ref) = args[idx: idx + 6]
    idx += 6
    o_ref, e_ref = args[idx], args[idx + 1]

    cur = x_ref[...].astype(jnp.bfloat16)          # (B*H0, W0*C0), hoisted cast
    energy = jnp.zeros((1, 1), jnp.float32)

    for l in range(num_conv):
        wb_ref = conv_args[2 * l]
        b_ref = conv_args[2 * l + 1]
        r_out = cur.shape[0] - (KH - 1)
        # 3-tap banded matmul; keep the accumulator chain tight (MRB on v7x).
        acc = jnp.dot(cur[0:r_out, :], wb_ref[0],
                      preferred_element_type=jnp.float32)
        for kh in range(1, KH):
            acc = acc + jnp.dot(cur[kh:kh + r_out, :], wb_ref[kh],
                                preferred_element_type=jnp.float32)
        if l < num_conv - 1:
            act = jnp.maximum(acc + b_ref[...], 0.0)          # (r_out, Wo*F)
            rs = jnp.sum(act, axis=1, keepdims=True)          # (r_out, 1)
            energy = energy + jnp.sum(mask_args[l][...] * rs, keepdims=True)
            cur = act.astype(jnp.bfloat16)                    # stays in VMEM
        else:
            # last conv: pool valid rows per image, then the two fc layers.
            ps = jnp.dot(pool_ref[...], acc,
                         preferred_element_type=jnp.float32)  # (B, Wo*F)
            pooled = jnp.dot(ps, sel_ref[...],
                             preferred_element_type=jnp.float32) * scale + b_ref[...]
            h = jnp.maximum(
                jnp.dot(pooled.astype(jnp.bfloat16), w1_ref[...],
                        preferred_element_type=jnp.float32) + b1_ref[...], 0.0)
            energy = energy + jnp.sum(h, keepdims=True)
            o_ref[...] = jnp.dot(h.astype(jnp.bfloat16), w2_ref[...],
                                 preferred_element_type=jnp.float32) + b2_ref[...]
    e_ref[...] = energy


# ----------------------------------------------------------------------------
# Parameter construction (matches DPN_CIFAR10FC.__init__ shapes; HWIO weights).
# ----------------------------------------------------------------------------
def init_params(key, layers=4, classnum=10, num_filter=32, filter_scale=1):
    num_filter = num_filter * filter_scale
    params = {"convs": [], "fcs": []}
    in_ch = 3
    for _ in range(layers):
        key, kw_, kb_ = jax.random.split(key, 3)
        fan_in = in_ch * KH * KW
        wgt = (jax.random.normal(kw_, (KH, KW, in_ch, num_filter), jnp.float32)
               / math.sqrt(fan_in))
        bia = jax.random.normal(kb_, (num_filter,), jnp.float32) * 0.01
        params["convs"].append((wgt, bia))
        in_ch = num_filter
    key, k1, k2, k3, k4 = jax.random.split(key, 5)
    w1 = (jax.random.normal(k1, (num_filter, num_filter), jnp.float32)
          / math.sqrt(num_filter))
    b1 = jax.random.normal(k2, (num_filter,), jnp.float32) * 0.01
    w2 = (jax.random.normal(k3, (num_filter, classnum), jnp.float32)
          / math.sqrt(num_filter))
    b2 = jax.random.normal(k4, (classnum,), jnp.float32) * 0.01
    params["fcs"] = [(w1, b1), (w2, b2)]
    return params


# ----------------------------------------------------------------------------
# Forward pass (wrapper accepts NCHW like the PyTorch module).
# Returns (logits (N, classnum, 1, 1), energy scalar) like forward().
# ----------------------------------------------------------------------------
def dpn_forward(params, x_nchw):
    convs, fcs = params["convs"], params["fcs"]
    num_conv = len(convs)
    N, C, H0, W0 = x_nchw.shape
    F_ = convs[0][0].shape[-1]
    classnum = fcs[1][0].shape[-1]

    B = _choose_block_b(N, H0)
    nblocks = N // B
    R0 = B * H0

    # Pack input: NCHW -> (nblocks, B*H0, W0*C); channels fastest in lane dim.
    xp = (jnp.transpose(x_nchw.astype(jnp.float32), (0, 2, 3, 1))
          .reshape(nblocks, R0, W0 * C))

    in_specs = [pl.BlockSpec((None, R0, W0 * C), lambda n: (n, 0, 0))]
    conv_inputs, mask_inputs = [], []

    w_in, c_in = W0, C
    flops = 0
    for l, (w, b) in enumerate(convs):
        wo = w_in - (KW - 1)
        f_l = w.shape[-1]
        wb = _pack_conv_weights(w, wo)                          # (3, W*Cin, Wo*F)
        if l < num_conv - 1:
            bp = jnp.tile(b.astype(jnp.float32), wo).reshape(1, wo * f_l)
        else:
            bp = b.astype(jnp.float32).reshape(1, f_l)          # added post-pool
        conv_inputs += [wb, bp]
        r_out = R0 - 2 * (l + 1)
        flops += 2 * nblocks * KH * r_out * (w_in * c_in) * (wo * f_l)
        w_in, c_in = wo, f_l

    ho_last, wo_last = H0 - 2 * num_conv, w_in
    r_last = R0 - 2 * num_conv

    # Energy masks: valid rows of each intermediate layer inside the row-slab.
    for l in range(num_conv - 1):
        r_out = R0 - 2 * (l + 1)
        ho_l = H0 - 2 * (l + 1)
        rows = jnp.arange(r_out)
        mask_inputs.append(
            ((rows % H0) < ho_l).astype(jnp.float32).reshape(r_out, 1))

    # Pooling selectors: per-image valid-row selector and wo-block summer.
    rows = jnp.arange(r_last)
    pool = (((rows[None, :] // H0) == jnp.arange(B)[:, None])
            & ((rows[None, :] % H0) < ho_last)).astype(jnp.float32)  # (B, r_last)
    sel = jnp.tile(jnp.eye(F_, dtype=jnp.float32), (wo_last, 1))     # (Wo*F, F)

    (w1, b1), (w2, b2) = fcs
    fc_inputs = [pool, sel,
                 w1.astype(jnp.bfloat16),
                 b1.reshape(1, F_).astype(jnp.float32),
                 w2.astype(jnp.bfloat16),
                 b2.reshape(1, classnum).astype(jnp.float32)]

    for arr in conv_inputs:
        if arr.ndim == 3:
            in_specs.append(pl.BlockSpec(arr.shape, lambda n: (0, 0, 0)))
        else:
            in_specs.append(pl.BlockSpec(arr.shape, lambda n: (0, 0)))
    for arr in mask_inputs + fc_inputs:
        in_specs.append(pl.BlockSpec(arr.shape, lambda n: (0, 0)))

    out_specs = (pl.BlockSpec((None, B, classnum), lambda n: (n, 0, 0)),
                 pl.BlockSpec((None, 1, 1), lambda n: (n, 0, 0)))
    out_shape = (jax.ShapeDtypeStruct((nblocks, B, classnum), jnp.float32),
                 jax.ShapeDtypeStruct((nblocks, 1, 1), jnp.float32))

    weight_bytes = sum(int(a.size) * a.dtype.itemsize
                       for a in conv_inputs + mask_inputs + fc_inputs)
    kern = functools.partial(_fused_kernel, num_conv=num_conv,
                             scale=1.0 / (ho_last * wo_last))

    logits3, e = pl.pallas_call(
        kern,
        out_shape=out_shape,
        grid_spec=pltpu.PrefetchScalarGridSpec(
            num_scalar_prefetch=0,
            grid=(nblocks,),
            in_specs=in_specs,
            out_specs=out_specs),
        compiler_params=pltpu.CompilerParams(
            dimension_semantics=("parallel",),
            vmem_limit_bytes=32 * 1024 * 1024),
        cost_estimate=pl.CostEstimate(
            flops=int(flops),
            transcendentals=0,
            bytes_accessed=int(xp.size * 4 + weight_bytes
                               + N * (classnum + 1) * 4)),
    )(xp, *conv_inputs, *mask_inputs, *fc_inputs)

    logits = logits3.reshape(N, classnum)
    energy = jnp.sum(e)
    return logits[:, :, None, None], energy


# ----------------------------------------------------------------------------
# Pure-JAX reference (same Sampler assumption) for correctness checking.
# ----------------------------------------------------------------------------
def reference_forward(params, x_nchw):
    x = jnp.transpose(x_nchw, (0, 2, 3, 1)).astype(jnp.float32)  # NHWC
    convs, fcs = params["convs"], params["fcs"]

    def conv(x_, w_):
        return lax.conv_general_dilated(
            x_.astype(jnp.bfloat16), w_.astype(jnp.bfloat16),
            window_strides=(1, 1), padding="VALID",
            dimension_numbers=("NHWC", "HWIO", "NHWC"),
            preferred_element_type=jnp.float32)

    energy = jnp.zeros((), jnp.float32)
    for (w, b) in convs[:-1]:
        x = jnp.maximum(conv(x, w) + b, 0.0)
        energy = energy + jnp.sum(x)

    (wc, bc) = convs[-1]
    y = conv(x, wc) + bc
    pooled = jnp.mean(y, axis=(1, 2))                            # (N, F)
    (w1, b1), (w2, b2) = fcs
    h = jnp.maximum(
        jnp.dot(pooled.astype(jnp.bfloat16), w1.astype(jnp.bfloat16),
                preferred_element_type=jnp.float32) + b1, 0.0)
    energy = energy + jnp.sum(h)
    logits = jnp.dot(h.astype(jnp.bfloat16), w2.astype(jnp.bfloat16),
                     preferred_element_type=jnp.float32) + b2
    return logits[:, :, None, None], energy


if __name__ == "__main__":
    key = jax.random.PRNGKey(0)
    pkey, xkey = jax.random.split(key)

    LAYERS, CLASSNUM, NUM_FILTER = 4, 10, 32
    params = init_params(pkey, layers=LAYERS, classnum=CLASSNUM,
                         num_filter=NUM_FILTER, filter_scale=1)

    # PyTorch-style NCHW input with 3 channels (CIFAR-like, small spatial).
    x = jax.random.normal(xkey, (2, 3, 16, 16), jnp.float32)

    logits, energy = jax.jit(dpn_forward)(params, x)
    logits, energy = jax.block_until_ready((logits, energy))

    assert logits.shape == (2, CLASSNUM, 1, 1)
    assert energy.shape == ()
    assert bool(jnp.all(jnp.isfinite(logits)))
    assert bool(jnp.isfinite(energy))

    ref_logits, ref_energy = reference_forward(params, x)
    max_err = float(jnp.max(jnp.abs(logits - ref_logits)))
    assert bool(jnp.allclose(logits, ref_logits, rtol=1e-2, atol=1e-2)), max_err
    assert bool(jnp.allclose(energy, ref_energy, rtol=1e-2, atol=1e-2)), (
        float(energy), float(ref_energy))

    print("KERNEL_OK")
</pallas_src>

<mosaic_0001>
module attributes {stable_mosaic.version = 11 : i64} {
  func.func @_fused_kernel(%arg0: i32, %arg1: memref<1x16x48xf32, #tpu.memory_space<vmem>>, %arg2: memref<3x48x448xbf16, #tpu.memory_space<vmem>>, %arg3: memref<1x448xf32, #tpu.memory_space<vmem>>, %arg4: memref<3x448x384xbf16, #tpu.memory_space<vmem>>, %arg5: memref<1x384xf32, #tpu.memory_space<vmem>>, %arg6: memref<3x384x320xbf16, #tpu.memory_space<vmem>>, %arg7: memref<1x320xf32, #tpu.memory_space<vmem>>, %arg8: memref<3x320x256xbf16, #tpu.memory_space<vmem>>, %arg9: memref<1x32xf32, #tpu.memory_space<vmem>>, %arg10: memref<14x1xf32, #tpu.memory_space<vmem>>, %arg11: memref<12x1xf32, #tpu.memory_space<vmem>>, %arg12: memref<10x1xf32, #tpu.memory_space<vmem>>, %arg13: memref<1x8xf32, #tpu.memory_space<vmem>>, %arg14: memref<256x32xf32, #tpu.memory_space<vmem>>, %arg15: memref<32x32xbf16, #tpu.memory_space<vmem>>, %arg16: memref<1x32xf32, #tpu.memory_space<vmem>>, %arg17: memref<32x10xbf16, #tpu.memory_space<vmem>>, %arg18: memref<1x10xf32, #tpu.memory_space<vmem>>, %arg19: memref<1x1x10xf32, #tpu.memory_space<vmem>>, %arg20: memref<1x1x1xf32, #tpu.memory_space<vmem>>) attributes {dimension_semantics = [#tpu.dimension_semantics<parallel>], iteration_bounds = array<i64: 2>, scalar_prefetch = 0 : i64, scratch_operands = 0 : i64, tpu.core_type = #tpu.core_type<tc>, window_params = [{transform_indices = @transform_0, window_bounds = array<i64: 1, 16, 48>}, {pipeline_mode = #tpu.pipeline_mode<synchronous>, transform_indices = @transform_1, window_bounds = array<i64: 3, 48, 448>}, {pipeline_mode = #tpu.pipeline_mode<synchronous>, transform_indices = @transform_2, window_bounds = array<i64: 1, 448>}, {pipeline_mode = #tpu.pipeline_mode<synchronous>, transform_indices = @transform_3, window_bounds = array<i64: 3, 448, 384>}, {pipeline_mode = #tpu.pipeline_mode<synchronous>, transform_indices = @transform_4, window_bounds = array<i64: 1, 384>}, {pipeline_mode = #tpu.pipeline_mode<synchronous>, transform_indices = @transform_5, window_bounds = array<i64: 3, 384, 320>}, {pipeline_mode = #tpu.pipeline_mode<synchronous>, transform_indices = @transform_6, window_bounds = array<i64: 1, 320>}, {pipeline_mode = #tpu.pipeline_mode<synchronous>, transform_indices = @transform_7, window_bounds = array<i64: 3, 320, 256>}, {pipeline_mode = #tpu.pipeline_mode<synchronous>, transform_indices = @transform_8, window_bounds = array<i64: 1, 32>}, {pipeline_mode = #tpu.pipeline_mode<synchronous>, transform_indices = @transform_9, window_bounds = array<i64: 14, 1>}, {pipeline_mode = #tpu.pipeline_mode<synchronous>, transform_indices = @transform_10, window_bounds = array<i64: 12, 1>}, {pipeline_mode = #tpu.pipeline_mode<synchronous>, transform_indices = @transform_11, window_bounds = array<i64: 10, 1>}, {pipeline_mode = #tpu.pipeline_mode<synchronous>, transform_indices = @transform_12, window_bounds = array<i64: 1, 8>}, {pipeline_mode = #tpu.pipeline_mode<synchronous>, transform_indices = @transform_13, window_bounds = array<i64: 256, 32>}, {pipeline_mode = #tpu.pipeline_mode<synchronous>, transform_indices = @transform_14, window_bounds = array<i64: 32, 32>}, {pipeline_mode = #tpu.pipeline_mode<synchronous>, transform_indices = @transform_15, window_bounds = array<i64: 1, 32>}, {pipeline_mode = #tpu.pipeline_mode<synchronous>, transform_indices = @transform_16, window_bounds = array<i64: 32, 10>}, {pipeline_mode = #tpu.pipeline_mode<synchronous>, transform_indices = @transform_17, window_bounds = array<i64: 1, 10>}, {transform_indices = @transform_18, window_bounds = array<i64: 1, 1, 10>}, {transform_indices = @transform_19, window_bounds = array<i64: 1, 1, 1>}]} {
    %c0 = arith.constant 0 : index
    %c0_0 = arith.constant 0 : index
    %c0_1 = arith.constant 0 : index
    %0 = vector.load %arg1[%c0, %c0_0, %c0_1] : memref<1x16x48xf32, #tpu.memory_space<vmem>>, vector<1x16x48xf32>
    %1 = vector.shape_cast %0 : vector<1x16x48xf32> to vector<16x48xf32>
    %2 = arith.truncf %1 : vector<16x48xf32> to vector<16x48xbf16>
    %cst = arith.constant 0.000000e+00 : f32
    %3 = vector.broadcast %cst : f32 to vector<1x1xf32>
    %4 = vector.extract_strided_slice %2 {offsets = [0, 0], sizes = [14, 48], strides = [1, 1]} : vector<16x48xbf16> to vector<14x48xbf16>
    %c0_2 = arith.constant 0 : index
    %c0_3 = arith.constant 0 : index
    %c0_4 = arith.constant 0 : index
    %5 = vector.load %arg2[%c0_2, %c0_3, %c0_4] : memref<3x48x448xbf16, #tpu.memory_space<vmem>>, vector<1x48x448xbf16>
    %6 = vector.shape_cast %5 : vector<1x48x448xbf16> to vector<48x448xbf16>
    %cst_5 = arith.constant dense<0.000000e+00> : vector<14x448xf32>
    %7 = tpu.matmul %4, %6, %cst_5 {dimension_numbers = #tpu.dot_dimension_numbers<[1], [0], [0], [1], [0, 0, 1, 1], [], []>} : vector<14x48xbf16>, vector<48x448xbf16>, vector<14x448xf32> -> vector<14x448xf32>
    %8 = vector.extract_strided_slice %2 {offsets = [1, 0], sizes = [14, 48], strides = [1, 1]} : vector<16x48xbf16> to vector<14x48xbf16>
    %c1 = arith.constant 1 : index
    %c0_6 = arith.constant 0 : index
    %c0_7 = arith.constant 0 : index
    %9 = vector.load %arg2[%c1, %c0_6, %c0_7] : memref<3x48x448xbf16, #tpu.memory_space<vmem>>, vector<1x48x448xbf16>
    %10 = vector.shape_cast %9 : vector<1x48x448xbf16> to vector<48x448xbf16>
    %cst_8 = arith.constant dense<0.000000e+00> : vector<14x448xf32>
    %11 = tpu.matmul %8, %10, %cst_8 {dimension_numbers = #tpu.dot_dimension_numbers<[1], [0], [0], [1], [0, 0, 1, 1], [], []>} : vector<14x48xbf16>, vector<48x448xbf16>, vector<14x448xf32> -> vector<14x448xf32>
    %12 = arith.addf %7, %11 : vector<14x448xf32>
    %13 = vector.extract_strided_slice %2 {offsets = [2, 0], sizes = [14, 48], strides = [1, 1]} : vector<16x48xbf16> to vector<14x48xbf16>
    %c2 = arith.constant 2 : index
    %c0_9 = arith.constant 0 : index
    %c0_10 = arith.constant 0 : index
    %14 = vector.load %arg2[%c2, %c0_9, %c0_10] : memref<3x48x448xbf16, #tpu.memory_space<vmem>>, vector<1x48x448xbf16>
    %15 = vector.shape_cast %14 : vector<1x48x448xbf16> to vector<48x448xbf16>
    %cst_11 = arith.constant dense<0.000000e+00> : vector<14x448xf32>
    %16 = tpu.matmul %13, %15, %cst_11 {dimension_numbers = #tpu.dot_dimension_numbers<[1], [0], [0], [1], [0, 0, 1, 1], [], []>} : vector<14x48xbf16>, vector<48x448xbf16>, vector<14x448xf32> -> vector<14x448xf32>
    %17 = arith.addf %12, %16 : vector<14x448xf32>
    %c0_12 = arith.constant 0 : index
    %c0_13 = arith.constant 0 : index
    %18 = vector.load %arg3[%c0_12, %c0_13] : memref<1x448xf32, #tpu.memory_space<vmem>>, vector<1x448xf32>
    %19 = vector.broadcast %18 : vector<1x448xf32> to vector<14x448xf32>
    %20 = arith.addf %17, %19 : vector<14x448xf32>
    %cst_14 = arith.constant 0.000000e+00 : f32
    %21 = vector.broadcast %cst_14 : f32 to vector<14x448xf32>
    %22 = arith.maximumf %20, %21 : vector<14x448xf32>
    %cst_15 = arith.constant dense<0.000000e+00> : vector<14xf32>
    %23 = vector.multi_reduction <add>, %22, %cst_15 [1] : vector<14x448xf32> to vector<14xf32>
    %24 = vector.shape_cast %23 : vector<14xf32> to vector<14x1xf32>
    %c0_16 = arith.constant 0 : index
    %c0_17 = arith.constant 0 : index
    %25 = vector.load %arg10[%c0_16, %c0_17] : memref<14x1xf32, #tpu.memory_space<vmem>>, vector<14x1xf32>
    %26 = arith.mulf %25, %24 : vector<14x1xf32>
    %27 = vector.shape_cast %26 : vector<14x1xf32> to vector<1x14x1xf32>
    %cst_18 = arith.constant dense<0.000000e+00> : vector<1xf32>
    %28 = vector.multi_reduction <add>, %27, %cst_18 [1, 2] : vector<1x14x1xf32> to vector<1xf32>
    %29 = vector.shape_cast %28 : vector<1xf32> to vector<1x1x1xf32>
    %30 = vector.extract %29[0, 0, 0] : f32 from vector<1x1x1xf32>
    %31 = vector.broadcast %30 : f32 to vector<1x1xf32>
    %32 = arith.addf %3, %31 : vector<1x1xf32>
    %33 = arith.truncf %22 : vector<14x448xf32> to vector<14x448xbf16>
    %34 = vector.extract_strided_slice %33 {offsets = [0, 0], sizes = [12, 448], strides = [1, 1]} : vector<14x448xbf16> to vector<12x448xbf16>
    %c0_19 = arith.constant 0 : index
    %c0_20 = arith.constant 0 : index
    %c0_21 = arith.constant 0 : index
    %35 = vector.load %arg4[%c0_19, %c0_20, %c0_21] : memref<3x448x384xbf16, #tpu.memory_space<vmem>>, vector<1x448x384xbf16>
    %36 = vector.shape_cast %35 : vector<1x448x384xbf16> to vector<448x384xbf16>
    %cst_22 = arith.constant dense<0.000000e+00> : vector<12x384xf32>
    %37 = tpu.matmul %34, %36, %cst_22 {dimension_numbers = #tpu.dot_dimension_numbers<[1], [0], [0], [1], [0, 0, 1, 1], [], []>} : vector<12x448xbf16>, vector<448x384xbf16>, vector<12x384xf32> -> vector<12x384xf32>
    %38 = vector.extract_strided_slice %33 {offsets = [1, 0], sizes = [12, 448], strides = [1, 1]} : vector<14x448xbf16> to vector<12x448xbf16>
    %c1_23 = arith.constant 1 : index
    %c0_24 = arith.constant 0 : index
    %c0_25 = arith.constant 0 : index
    %39 = vector.load %arg4[%c1_23, %c0_24, %c0_25] : memref<3x448x384xbf16, #tpu.memory_space<vmem>>, vector<1x448x384xbf16>
    %40 = vector.shape_cast %39 : vector<1x448x384xbf16> to vector<448x384xbf16>
    %cst_26 = arith.constant dense<0.000000e+00> : vector<12x384xf32>
    %41 = tpu.matmul %38, %40, %cst_26 {dimension_numbers = #tpu.dot_dimension_numbers<[1], [0], [0], [1], [0, 0, 1, 1], [], []>} : vector<12x448xbf16>, vector<448x384xbf16>, vector<12x384xf32> -> vector<12x384xf32>
    %42 = arith.addf %37, %41 : vector<12x384xf32>
    %43 = vector.extract_strided_slice %33 {offsets = [2, 0], sizes = [12, 448], strides = [1, 1]} : vector<14x448xbf16> to vector<12x448xbf16>
    %c2_27 = arith.constant 2 : index
    %c0_28 = arith.constant 0 : index
    %c0_29 = arith.constant 0 : index
    %44 = vector.load %arg4[%c2_27, %c0_28, %c0_29] : memref<3x448x384xbf16, #tpu.memory_space<vmem>>, vector<1x448x384xbf16>
    %45 = vector.shape_cast %44 : vector<1x448x384xbf16> to vector<448x384xbf16>
    %cst_30 = arith.constant dense<0.000000e+00> : vector<12x384xf32>
    %46 = tpu.matmul %43, %45, %cst_30 {dimension_numbers = #tpu.dot_dimension_numbers<[1], [0], [0], [1], [0, 0, 1, 1], [], []>} : vector<12x448xbf16>, vector<448x384xbf16>, vector<12x384xf32> -> vector<12x384xf32>
    %47 = arith.addf %42, %46 : vector<12x384xf32>
    %c0_31 = arith.constant 0 : index
    %c0_32 = arith.constant 0 : index
    %48 = vector.load %arg5[%c0_31, %c0_32] : memref<1x384xf32, #tpu.memory_space<vmem>>, vector<1x384xf32>
    %49 = vector.broadcast %48 : vector<1x384xf32> to vector<12x384xf32>
    %50 = arith.addf %47, %49 : vector<12x384xf32>
    %cst_33 = arith.constant 0.000000e+00 : f32
    %51 = vector.broadcast %cst_33 : f32 to vector<12x384xf32>
    %52 = arith.maximumf %50, %51 : vector<12x384xf32>
    %cst_34 = arith.constant dense<0.000000e+00> : vector<12xf32>
    %53 = vector.multi_reduction <add>, %52, %cst_34 [1] : vector<12x384xf32> to vector<12xf32>
    %54 = vector.shape_cast %53 : vector<12xf32> to vector<12x1xf32>
    %c0_35 = arith.constant 0 : index
    %c0_36 = arith.constant 0 : index
    %55 = vector.load %arg11[%c0_35, %c0_36] : memref<12x1xf32, #tpu.memory_space<vmem>>, vector<12x1xf32>
    %56 = arith.mulf %55, %54 : vector<12x1xf32>
    %57 = vector.shape_cast %56 : vector<12x1xf32> to vector<1x12x1xf32>
    %cst_37 = arith.constant dense<0.000000e+00> : vector<1xf32>
    %58 = vector.multi_reduction <add>, %57, %cst_37 [1, 2] : vector<1x12x1xf32> to vector<1xf32>
    %59 = vector.shape_cast %58 : vector<1xf32> to vector<1x1x1xf32>
    %60 = vector.extract %59[0, 0, 0] : f32 from vector<1x1x1xf32>
    %61 = vector.broadcast %60 : f32 to vector<1x1xf32>
    %62 = arith.addf %32, %61 : vector<1x1xf32>
    %63 = arith.truncf %52 : vector<12x384xf32> to vector<12x384xbf16>
    %64 = vector.extract_strided_slice %63 {offsets = [0, 0], sizes = [10, 384], strides = [1, 1]} : vector<12x384xbf16> to vector<10x384xbf16>
    %c0_38 = arith.constant 0 : index
    %c0_39 = arith.constant 0 : index
    %c0_40 = arith.constant 0 : index
    %65 = vector.load %arg6[%c0_38, %c0_39, %c0_40] : memref<3x384x320xbf16, #tpu.memory_space<vmem>>, vector<1x384x320xbf16>
    %66 = vector.shape_cast %65 : vector<1x384x320xbf16> to vector<384x320xbf16>
    %cst_41 = arith.constant dense<0.000000e+00> : vector<10x320xf32>
    %67 = tpu.matmul %64, %66, %cst_41 {dimension_numbers = #tpu.dot_dimension_numbers<[1], [0], [0], [1], [0, 0, 1, 1], [], []>} : vector<10x384xbf16>, vector<384x320xbf16>, vector<10x320xf32> -> vector<10x320xf32>
    %68 = vector.extract_strided_slice %63 {offsets = [1, 0], sizes = [10, 384], strides = [1, 1]} : vector<12x384xbf16> to vector<10x384xbf16>
    %c1_42 = arith.constant 1 : index
    %c0_43 = arith.constant 0 : index
    %c0_44 = arith.constant 0 : index
    %69 = vector.load %arg6[%c1_42, %c0_43, %c0_44] : memref<3x384x320xbf16, #tpu.memory_space<vmem>>, vector<1x384x320xbf16>
    %70 = vector.shape_cast %69 : vector<1x384x320xbf16> to vector<384x320xbf16>
    %cst_45 = arith.constant dense<0.000000e+00> : vector<10x320xf32>
    %71 = tpu.matmul %68, %70, %cst_45 {dimension_numbers = #tpu.dot_dimension_numbers<[1], [0], [0], [1], [0, 0, 1, 1], [], []>} : vector<10x384xbf16>, vector<384x320xbf16>, vector<10x320xf32> -> vector<10x320xf32>
    %72 = arith.addf %67, %71 : vector<10x320xf32>
    %73 = vector.extract_strided_slice %63 {offsets = [2, 0], sizes = [10, 384], strides = [1, 1]} : vector<12x384xbf16> to vector<10x384xbf16>
    %c2_46 = arith.constant 2 : index
    %c0_47 = arith.constant 0 : index
    %c0_48 = arith.constant 0 : index
    %74 = vector.load %arg6[%c2_46, %c0_47, %c0_48] : memref<3x384x320xbf16, #tpu.memory_space<vmem>>, vector<1x384x320xbf16>
    %75 = vector.shape_cast %74 : vector<1x384x320xbf16> to vector<384x320xbf16>
    %cst_49 = arith.constant dense<0.000000e+00> : vector<10x320xf32>
    %76 = tpu.matmul %73, %75, %cst_49 {dimension_numbers = #tpu.dot_dimension_numbers<[1], [0], [0], [1], [0, 0, 1, 1], [], []>} : vector<10x384xbf16>, vector<384x320xbf16>, vector<10x320xf32> -> vector<10x320xf32>
    %77 = arith.addf %72, %76 : vector<10x320xf32>
    %c0_50 = arith.constant 0 : index
    %c0_51 = arith.constant 0 : index
    %78 = vector.load %arg7[%c0_50, %c0_51] : memref<1x320xf32, #tpu.memory_space<vmem>>, vector<1x320xf32>
    %79 = vector.broadcast %78 : vector<1x320xf32> to vector<10x320xf32>
    %80 = arith.addf %77, %79 : vector<10x320xf32>
    %cst_52 = arith.constant 0.000000e+00 : f32
    %81 = vector.broadcast %cst_52 : f32 to vector<10x320xf32>
    %82 = arith.maximumf %80, %81 : vector<10x320xf32>
    %cst_53 = arith.constant dense<0.000000e+00> : vector<10xf32>
    %83 = vector.multi_reduction <add>, %82, %cst_53 [1] : vector<10x320xf32> to vector<10xf32>
    %84 = vector.shape_cast %83 : vector<10xf32> to vector<10x1xf32>
    %c0_54 = arith.constant 0 : index
    %c0_55 = arith.constant 0 : index
    %85 = vector.load %arg12[%c0_54, %c0_55] : memref<10x1xf32, #tpu.memory_space<vmem>>, vector<10x1xf32>
    %86 = arith.mulf %85, %84 : vector<10x1xf32>
    %87 = vector.shape_cast %86 : vector<10x1xf32> to vector<1x10x1xf32>
    %cst_56 = arith.constant dense<0.000000e+00> : vector<1xf32>
    %88 = vector.multi_reduction <add>, %87, %cst_56 [1, 2] : vector<1x10x1xf32> to vector<1xf32>
    %89 = vector.shape_cast %88 : vector<1xf32> to vector<1x1x1xf32>
    %90 = vector.extract %89[0, 0, 0] : f32 from vector<1x1x1xf32>
    %91 = vector.broadcast %90 : f32 to vector<1x1xf32>
    %92 = arith.addf %62, %91 : vector<1x1xf32>
    %93 = arith.truncf %82 : vector<10x320xf32> to vector<10x320xbf16>
    %94 = vector.extract_strided_slice %93 {offsets = [0, 0], sizes = [8, 320], strides = [1, 1]} : vector<10x320xbf16> to vector<8x320xbf16>
    %c0_57 = arith.constant 0 : index
    %c0_58 = arith.constant 0 : index
    %c0_59 = arith.constant 0 : index
    %95 = vector.load %arg8[%c0_57, %c0_58, %c0_59] : memref<3x320x256xbf16, #tpu.memory_space<vmem>>, vector<1x320x256xbf16>
    %96 = vector.shape_cast %95 : vector<1x320x256xbf16> to vector<320x256xbf16>
    %cst_60 = arith.constant dense<0.000000e+00> : vector<8x256xf32>
    %97 = tpu.matmul %94, %96, %cst_60 {dimension_numbers = #tpu.dot_dimension_numbers<[1], [0], [0], [1], [0, 0, 1, 1], [], []>} : vector<8x320xbf16>, vector<320x256xbf16>, vector<8x256xf32> -> vector<8x256xf32>
    %98 = vector.extract_strided_slice %93 {offsets = [1, 0], sizes = [8, 320], strides = [1, 1]} : vector<10x320xbf16> to vector<8x320xbf16>
    %c1_61 = arith.constant 1 : index
    %c0_62 = arith.constant 0 : index
    %c0_63 = arith.constant 0 : index
    %99 = vector.load %arg8[%c1_61, %c0_62, %c0_63] : memref<3x320x256xbf16, #tpu.memory_space<vmem>>, vector<1x320x256xbf16>
    %100 = vector.shape_cast %99 : vector<1x320x256xbf16> to vector<320x256xbf16>
    %cst_64 = arith.constant dense<0.000000e+00> : vector<8x256xf32>
    %101 = tpu.matmul %98, %100, %cst_64 {dimension_numbers = #tpu.dot_dimension_numbers<[1], [0], [0], [1], [0, 0, 1, 1], [], []>} : vector<8x320xbf16>, vector<320x256xbf16>, vector<8x256xf32> -> vector<8x256xf32>
    %102 = arith.addf %97, %101 : vector<8x256xf32>
    %103 = vector.extract_strided_slice %93 {offsets = [2, 0], sizes = [8, 320], strides = [1, 1]} : vector<10x320xbf16> to vector<8x320xbf16>
    %c2_65 = arith.constant 2 : index
    %c0_66 = arith.constant 0 : index
    %c0_67 = arith.constant 0 : index
    %104 = vector.load %arg8[%c2_65, %c0_66, %c0_67] : memref<3x320x256xbf16, #tpu.memory_space<vmem>>, vector<1x320x256xbf16>
    %105 = vector.shape_cast %104 : vector<1x320x256xbf16> to vector<320x256xbf16>
    %cst_68 = arith.constant dense<0.000000e+00> : vector<8x256xf32>
    %106 = tpu.matmul %103, %105, %cst_68 {dimension_numbers = #tpu.dot_dimension_numbers<[1], [0], [0], [1], [0, 0, 1, 1], [], []>} : vector<8x320xbf16>, vector<320x256xbf16>, vector<8x256xf32> -> vector<8x256xf32>
    %107 = arith.addf %102, %106 : vector<8x256xf32>
    %c0_69 = arith.constant 0 : index
    %c0_70 = arith.constant 0 : index
    %108 = vector.load %arg13[%c0_69, %c0_70] : memref<1x8xf32, #tpu.memory_space<vmem>>, vector<1x8xf32>
    %cst_71 = arith.constant dense<0.000000e+00> : vector<1x256xf32>
    %109 = tpu.matmul %108, %107, %cst_71 {dimension_numbers = #tpu.dot_dimension_numbers<[1], [0], [0], [1], [0, 0, 1, 1], [], []>} : vector<1x8xf32>, vector<8x256xf32>, vector<1x256xf32> -> vector<1x256xf32>
    %c0_72 = arith.constant 0 : index
    %c0_73 = arith.constant 0 : index
    %110 = vector.load %arg14[%c0_72, %c0_73] : memref<256x32xf32, #tpu.memory_space<vmem>>, vector<256x32xf32>
    %cst_74 = arith.constant dense<0.000000e+00> : vector<1x32xf32>
    %111 = tpu.matmul %109, %110, %cst_74 {dimension_numbers = #tpu.dot_dimension_numbers<[1], [0], [0], [1], [0, 0, 1, 1], [], []>} : vector<1x256xf32>, vector<256x32xf32>, vector<1x32xf32> -> vector<1x32xf32>
    %cst_75 = arith.constant 1.562500e-02 : f32
    %112 = vector.broadcast %cst_75 : f32 to vector<1x32xf32>
    %113 = arith.mulf %111, %112 : vector<1x32xf32>
    %c0_76 = arith.constant 0 : index
    %c0_77 = arith.constant 0 : index
    %114 = vector.load %arg9[%c0_76, %c0_77] : memref<1x32xf32, #tpu.memory_space<vmem>>, vector<1x32xf32>
    %115 = arith.addf %113, %114 : vector<1x32xf32>
    %116 = arith.truncf %115 : vector<1x32xf32> to vector<1x32xbf16>
    %c0_78 = arith.constant 0 : index
    %c0_79 = arith.constant 0 : index
    %117 = vector.load %arg15[%c0_78, %c0_79] : memref<32x32xbf16, #tpu.memory_space<vmem>>, vector<32x32xbf16>
    %cst_80 = arith.constant dense<0.000000e+00> : vector<1x32xf32>
    %118 = tpu.matmul %116, %117, %cst_80 {dimension_numbers = #tpu.dot_dimension_numbers<[1], [0], [0], [1], [0, 0, 1, 1], [], []>} : vector<1x32xbf16>, vector<32x32xbf16>, vector<1x32xf32> -> vector<1x32xf32>
    %c0_81 = arith.constant 0 : index
    %c0_82 = arith.constant 0 : index
    %119 = vector.load %arg16[%c0_81, %c0_82] : memref<1x32xf32, #tpu.memory_space<vmem>>, vector<1x32xf32>
    %120 = arith.addf %118, %119 : vector<1x32xf32>
    %cst_83 = arith.constant 0.000000e+00 : f32
    %121 = vector.broadcast %cst_83 : f32 to vector<1x32xf32>
    %122 = arith.maximumf %120, %121 : vector<1x32xf32>
    %123 = vector.shape_cast %122 : vector<1x32xf32> to vector<1x1x32xf32>
    %cst_84 = arith.constant dense<0.000000e+00> : vector<1xf32>
    %124 = vector.multi_reduction <add>, %123, %cst_84 [1, 2] : vector<1x1x32xf32> to vector<1xf32>
    %125 = vector.shape_cast %124 : vector<1xf32> to vector<1x1x1xf32>
    %126 = vector.extract %125[0, 0, 0] : f32 from vector<1x1x1xf32>
    %127 = vector.broadcast %126 : f32 to vector<1x1xf32>
    %128 = arith.addf %92, %127 : vector<1x1xf32>
    %129 = arith.truncf %122 : vector<1x32xf32> to vector<1x32xbf16>
    %c0_85 = arith.constant 0 : index
    %c0_86 = arith.constant 0 : index
    %130 = vector.load %arg17[%c0_85, %c0_86] : memref<32x10xbf16, #tpu.memory_space<vmem>>, vector<32x10xbf16>
    %cst_87 = arith.constant dense<0.000000e+00> : vector<1x10xf32>
    %131 = tpu.matmul %129, %130, %cst_87 {dimension_numbers = #tpu.dot_dimension_numbers<[1], [0], [0], [1], [0, 0, 1, 1], [], []>} : vector<1x32xbf16>, vector<32x10xbf16>, vector<1x10xf32> -> vector<1x10xf32>
    %c0_88 = arith.constant 0 : index
    %c0_89 = arith.constant 0 : index
    %132 = vector.load %arg18[%c0_88, %c0_89] : memref<1x10xf32, #tpu.memory_space<vmem>>, vector<1x10xf32>
    %133 = arith.addf %131, %132 : vector<1x10xf32>
    %c0_90 = arith.constant 0 : index
    %c0_91 = arith.constant 0 : index
    %c0_92 = arith.constant 0 : index
    %134 = vector.load %arg19[%c0_90, %c0_91, %c0_92] : memref<1x1x10xf32, #tpu.memory_space<vmem>>, vector<1x1x10xf32>
    %135 = vector.shape_cast %134 : vector<1x1x10xf32> to vector<1x10xf32>
    %136 = vector.shape_cast %133 : vector<1x10xf32> to vector<1x1x10xf32>
    tpu.vector_store %arg19[%c0_90, %c0_91, %c0_92], %136 {strides = array<i32>} : memref<1x1x10xf32, #tpu.memory_space<vmem>>, vector<1x1x10xf32>,
    %c0_93 = arith.constant 0 : index
    %c0_94 = arith.constant 0 : index
    %c0_95 = arith.constant 0 : index
    %137 = vector.load %arg20[%c0_93, %c0_94, %c0_95] : memref<1x1x1xf32, #tpu.memory_space<vmem>>, vector<1x1x1xf32>
    %138 = vector.shape_cast %137 : vector<1x1x1xf32> to vector<1x1xf32>
    %139 = vector.shape_cast %128 : vector<1x1xf32> to vector<1x1x1xf32>
    tpu.vector_store %arg20[%c0_93, %c0_94, %c0_95], %139 {strides = array<i32>} : memref<1x1x1xf32, #tpu.memory_space<vmem>>, vector<1x1x1xf32>,
    return
  }
  func.func @transform_0(%arg0: i32) -> (i32, i32, i32) {
    %c0_i32 = arith.constant 0 : i32
    %c0_i32_0 = arith.constant 0 : i32
    %c0_i32_1 = arith.constant 0 : i32
    return %arg0, %c0_i32, %c0_i32_0 : i32, i32, i32
  }
  func.func @transform_1(%arg0: i32) -> (i32, i32, i32) {
    %c0_i32 = arith.constant 0 : i32
    %c0_i32_0 = arith.constant 0 : i32
    %c0_i32_1 = arith.constant 0 : i32
    %c0_i32_2 = arith.constant 0 : i32
    return %c0_i32, %c0_i32_0, %c0_i32_1 : i32, i32, i32
  }
  func.func @transform_2(%arg0: i32) -> (i32, i32) {
    %c0_i32 = arith.constant 0 : i32
    %c0_i32_0 = arith.constant 0 : i32
    %c0_i32_1 = arith.constant 0 : i32
    return %c0_i32, %c0_i32_0 : i32, i32
  }
  func.func @transform_3(%arg0: i32) -> (i32, i32, i32) {
    %c0_i32 = arith.constant 0 : i32
    %c0_i32_0 = arith.constant 0 : i32
    %c0_i32_1 = arith.constant 0 : i32
    %c0_i32_2 = arith.constant 0 : i32
    return %c0_i32, %c0_i32_0, %c0_i32_1 : i32, i32, i32
  }
  func.func @transform_4(%arg0: i32) -> (i32, i32) {
    %c0_i32 = arith.constant 0 : i32
    %c0_i32_0 = arith.constant 0 : i32
    %c0_i32_1 = arith.constant 0 : i32
    return %c0_i32, %c0_i32_0 : i32, i32
  }
  func.func @transform_5(%arg0: i32) -> (i32, i32, i32) {
    %c0_i32 = arith.constant 0 : i32
    %c0_i32_0 = arith.constant 0 : i32
    %c0_i32_1 = arith.constant 0 : i32
    %c0_i32_2 = arith.constant 0 : i32
    return %c0_i32, %c0_i32_0, %c0_i32_1 : i32, i32, i32
  }
  func.func @transform_6(%arg0: i32) -> (i32, i32) {
    %c0_i32 = arith.constant 0 : i32
    %c0_i32_0 = arith.constant 0 : i32
    %c0_i32_1 = arith.constant 0 : i32
    return %c0_i32, %c0_i32_0 : i32, i32
  }
  func.func @transform_7(%arg0: i32) -> (i32, i32, i32) {
    %c0_i32 = arith.constant 0 : i32
    %c0_i32_0 = arith.constant 0 : i32
    %c0_i32_1 = arith.constant 0 : i32
    %c0_i32_2 = arith.constant 0 : i32
    return %c0_i32, %c0_i32_0, %c0_i32_1 : i32, i32, i32
  }
  func.func @transform_8(%arg0: i32) -> (i32, i32) {
    %c0_i32 = arith.constant 0 : i32
    %c0_i32_0 = arith.constant 0 : i32
    %c0_i32_1 = arith.constant 0 : i32
    return %c0_i32, %c0_i32_0 : i32, i32
  }
  func.func @transform_9(%arg0: i32) -> (i32, i32) {
    %c0_i32 = arith.constant 0 : i32
    %c0_i32_0 = arith.constant 0 : i32
    %c0_i32_1 = arith.constant 0 : i32
    return %c0_i32, %c0_i32_0 : i32, i32
  }
  func.func @transform_10(%arg0: i32) -> (i32, i32) {
    %c0_i32 = arith.constant 0 : i32
    %c0_i32_0 = arith.constant 0 : i32
    %c0_i32_1 = arith.constant 0 : i32
    return %c0_i32, %c0_i32_0 : i32, i32
  }
  func.func @transform_11(%arg0: i32) -> (i32, i32) {
    %c0_i32 = arith.constant 0 : i32
    %c0_i32_0 = arith.constant 0 : i32
    %c0_i32_1 = arith.constant 0 : i32
    return %c0_i32, %c0_i32_0 : i32, i32
  }
  func.func @transform_12(%arg0: i32) -> (i32, i32) {
    %c0_i32 = arith.constant 0 : i32
    %c0_i32_0 = arith.constant 0 : i32
    %c0_i32_1 = arith.constant 0 : i32
    return %c0_i32, %c0_i32_0 : i32, i32
  }
  func.func @transform_13(%arg0: i32) -> (i32, i32) {
    %c0_i32 = arith.constant 0 : i32
    %c0_i32_0 = arith.constant 0 : i32
    %c0_i32_1 = arith.constant 0 : i32
    return %c0_i32, %c0_i32_0 : i32, i32
  }
  func.func @transform_14(%arg0: i32) -> (i32, i32) {
    %c0_i32 = arith.constant 0 : i32
    %c0_i32_0 = arith.constant 0 : i32
    %c0_i32_1 = arith.constant 0 : i32
    return %c0_i32, %c0_i32_0 : i32, i32
  }
  func.func @transform_15(%arg0: i32) -> (i32, i32) {
    %c0_i32 = arith.constant 0 : i32
    %c0_i32_0 = arith.constant 0 : i32
    %c0_i32_1 = arith.constant 0 : i32
    return %c0_i32, %c0_i32_0 : i32, i32
  }
  func.func @transform_16(%arg0: i32) -> (i32, i32) {
    %c0_i32 = arith.constant 0 : i32
    %c0_i32_0 = arith.constant 0 : i32
    %c0_i32_1 = arith.constant 0 : i32
    return %c0_i32, %c0_i32_0 : i32, i32
  }
  func.func @transform_17(%arg0: i32) -> (i32, i32) {
    %c0_i32 = arith.constant 0 : i32
    %c0_i32_0 = arith.constant 0 : i32
    %c0_i32_1 = arith.constant 0 : i32
    return %c0_i32, %c0_i32_0 : i32, i32
  }
  func.func @transform_18(%arg0: i32) -> (i32, i32, i32) {
    %c0_i32 = arith.constant 0 : i32
    %c0_i32_0 = arith.constant 0 : i32
    %c0_i32_1 = arith.constant 0 : i32
    return %arg0, %c0_i32, %c0_i32_0 : i32, i32, i32
  }
  func.func @transform_19(%arg0: i32) -> (i32, i32, i32) {
    %c0_i32 = arith.constant 0 : i32
    %c0_i32_0 = arith.constant 0 : i32
    %c0_i32_1 = arith.constant 0 : i32
    return %arg0, %c0_i32, %c0_i32_0 : i32, i32, i32
  }
}

</mosaic_0001>

<bundles_post_ra>
// kernel: tile.23
= control target key start
LH: loop header
LB: loop body
LE: loop exit
PB: predicated region body
PF: predicated region fallthrough
CT: control target
= control target key end

     0   :  { %s28_s0 = inlined_call_operand.vmem [shape: f32[32], index: 0, kind: input, shape index: {}]   ;;  %s29_s1 = inlined_call_operand.vmem [shape: f32[14,32], index: 1, kind: output, shape index: {}]  }
   0x1   :  { %v4_v0 = vld [vmem:[%s28_s0] ss:$0 sm:$0xff] }
   0x2   :  { %5 = vst [vmem:[%s29_s1] sm:$0xff] %v4_v0  ;;  %8 = vst [vmem:[%s29_s1 + $0x8] sm:$0xff] %v4_v0 }

// kernel: tile.24
= control target key start
LH: loop header
LB: loop body
LE: loop exit
PB: predicated region body
PF: predicated region fallthrough
CT: control target
= control target key end

     0   :  { %s62_s8 = smov 96   ;;  %vm3_vm0 = vcmask 261120   ;;  %s64_s15 = smov 64   ;;  %vm9_vm1 = vcmask 1048320   ;;  %vm15_vm2 = vcmask 785920   ;;  %vm21_vm3 = vcmask 523520   ;;  %s99_s0 = inlined_call_operand.vmem [shape: f32[14,32], index: 0, kind: input, shape index: {}]   ;;  %s100_s1 = inlined_call_operand.vmem [shape: f32[1,448], index: 1, kind: output, shape index: {}]  }
   0x1   :  { %v53_v0 = vld [vmem:[%s99_s0 + $0x3] ss:$4 sm:$0x7]   ;;  %v54_v1 = vld [vmem:[%s99_s0 + $0x2] ss:$4 sm:$0x7]  }
   0x2   :  { %7 = vrot.lane.b32.xlu0 %v53_v0, %s62_s8  ;;  %v55_v2 = vld [vmem:[%s99_s0 + $0x1] ss:$4 sm:$0xf]   ;;  %v2_v3 = vld [vmem:[%s99_s0] ss:$4 sm:$0xf]  }
   0x3   :  { %s63_s0 = smov 32   ;;  %4 = vst.msk [vmem:[#allocation0] ss:$8 sm:$0xf] %vm3_vm0, %v2_v3  }
   0x4   :  { %19 = vrot.lane.b32.xlu1 %v55_v2, %s63_s0 }
   0x6   :  { %13 = vrot.lane.b32.xlu0 %v54_v1, %s64_s15 }
  0x74   :  { %v8_v4 = vpop.permute.xlu0 %7  }
  0x75   :  { %10 = vst.msk [vmem:[#allocation0] ss:$8 sm:$0x7] %vm9_vm1, %v8_v4  }
  0x76   :  { %v20_v5 = vpop.permute.xlu1 %19  }
  0x78   :  { %v14_v6 = vpop.permute.xlu0 %13  }
  0x79   :  { %16 = vst.msk [vmem:[#allocation0] ss:$8 sm:$0x7] %vm15_vm2, %v14_v6  }
  0x7a   :  { %22 = vst.msk [vmem:[#allocation0] ss:$8 sm:$0xf] %vm21_vm3, %v20_v5  }
  0x81   :  { %v27_v7 = vld [vmem:[#allocation0] sm:$0x1]  ;;  %v32_v8 = vld [vmem:[#allocation0 + $0x8] sm:$0x1]  ;;  %v38_v9 = vld [vmem:[#allocation0 + $0x10] sm:$0x1] }
  0x82   :  { %30 = vst [vmem:[%s100_s1] sm:$0x1] %v27_v7  ;;  %56 = vst [vmem:[%s100_s1 + $0x1] sm:$0x1] %v32_v8  ;;  %v45_v10 = vld [vmem:[#allocation0 + $0x18] sm:$0x1] }
  0x83   :  { %57 = vst [vmem:[%s100_s1 + $0x2] sm:$0x1] %v38_v9  ;;  %58 = vst [vmem:[%s100_s1 + $0x3] sm:$0x1] %v45_v10 }

// kernel: tile.28
= control target key start
LH: loop header
LB: loop body
LE: loop exit
PB: predicated region body
PF: predicated region fallthrough
CT: control target
= control target key end

     0   :  { %s28_s0 = inlined_call_operand.vmem [shape: f32[32], index: 0, kind: input, shape index: {}]   ;;  %s29_s1 = inlined_call_operand.vmem [shape: f32[12,32], index: 1, kind: output, shape index: {}]  }
   0x1   :  { %v4_v0 = vld [vmem:[%s28_s0] ss:$0 sm:$0xff] }
   0x2   :  { %5 = vst [vmem:[%s29_s1] sm:$0xff] %v4_v0  ;;  %8 = vst [vmem:[%s29_s1 + $0x8] sm:$0xff] %v4_v0 }

// kernel: tile.29
= control target key start
LH: loop header
LB: loop body
LE: loop exit
PB: predicated region body
PF: predicated region fallthrough
CT: control target
= control target key end

     0   :  { %s53_s8 = smov 96   ;;  %vm3_vm0 = vcmask 261120   ;;  %s55_s15 = smov 64   ;;  %vm9_vm1 = vcmask 1048320   ;;  %vm15_vm2 = vcmask 785920   ;;  %vm21_vm3 = vcmask 523520   ;;  %s87_s0 = inlined_call_operand.vmem [shape: f32[12,32], index: 0, kind: input, shape index: {}]   ;;  %s88_s1 = inlined_call_operand.vmem [shape: f32[1,384], index: 1, kind: output, shape index: {}]  }
   0x1   :  { %v45_v0 = vld [vmem:[%s87_s0 + $0x3] ss:$4 sm:$0x7]   ;;  %v46_v1 = vld [vmem:[%s87_s0 + $0x2] ss:$4 sm:$0x7]  }
   0x2   :  { %7 = vrot.lane.b32.xlu0 %v45_v0, %s53_s8  ;;  %v47_v2 = vld [vmem:[%s87_s0 + $0x1] ss:$4 sm:$0x7]   ;;  %v2_v3 = vld [vmem:[%s87_s0] ss:$4 sm:$0x7]  }
   0x3   :  { %s54_s0 = smov 32   ;;  %4 = vst.msk [vmem:[#allocation0] ss:$8 sm:$0x7] %vm3_vm0, %v2_v3  }
   0x4   :  { %19 = vrot.lane.b32.xlu1 %v47_v2, %s54_s0 }
   0x6   :  { %13 = vrot.lane.b32.xlu0 %v46_v1, %s55_s15 }
  0x74   :  { %v8_v4 = vpop.permute.xlu0 %7  }
  0x75   :  { %10 = vst.msk [vmem:[#allocation0] ss:$8 sm:$0x7] %vm9_vm1, %v8_v4  }
  0x76   :  { %v20_v5 = vpop.permute.xlu1 %19  }
  0x78   :  { %v14_v6 = vpop.permute.xlu0 %13  }
  0x79   :  { %16 = vst.msk [vmem:[#allocation0] ss:$8 sm:$0x7] %vm15_vm2, %v14_v6  }
  0x7a   :  { %22 = vst.msk [vmem:[#allocation0] ss:$8 sm:$0x7] %vm21_vm3, %v20_v5  }
  0x81   :  { %v27_v7 = vld [vmem:[#allocation0] sm:$0x1]  ;;  %v32_v8 = vld [vmem:[#allocation0 + $0x8] sm:$0x1]  ;;  %v38_v9 = vld [vmem:[#allocation0 + $0x10] sm:$0x1] }
  0x82   :  { %30 = vst [vmem:[%s88_s1] sm:$0x1] %v27_v7  ;;  %48 = vst [vmem:[%s88_s1 + $0x1] sm:$0x1] %v32_v8 }
  0x83   :  { %49 = vst [vmem:[%s88_s1 + $0x2] sm:$0x1] %v38_v9 }

// kernel: tile.33
= control target key start
LH: loop header
LB: loop body
LE: loop exit
PB: predicated region body
PF: predicated region fallthrough
CT: control target
= control target key end

     0   :  { %s28_s0 = inlined_call_operand.vmem [shape: f32[32], index: 0, kind: input, shape index: {}]   ;;  %s29_s1 = inlined_call_operand.vmem [shape: f32[10,32], index: 1, kind: output, shape index: {}]  }
   0x1   :  { %v4_v0 = vld [vmem:[%s28_s0] ss:$0 sm:$0xff] }
   0x2   :  { %5 = vst [vmem:[%s29_s1] sm:$0xff] %v4_v0  ;;  %8 = vst [vmem:[%s29_s1 + $0x8] sm:$0xff] %v4_v0 }

// kernel: tile.34
= control target key start
LH: loop header
LB: loop body
LE: loop exit
PB: predicated region body
PF: predicated region fallthrough
CT: control target
= control target key end

     0   :  { %s6_s6 = smov 3  ;;  %s13_s11 = smov 3  ;;  %vm3_vm0 = vcmask 261120   ;;  %vm10_vm1 = vcmask 1048320   ;;  %vm17_vm2 = vcmask 785920   ;;  %vm23_vm3 = vcmask 523520   ;;  %s89_s0 = inlined_call_operand.vmem [shape: f32[10,32], index: 0, kind: input, shape index: {}]   ;;  %s90_s1 = inlined_call_operand.vmem [shape: f32[1,320], index: 1, kind: output, shape index: {}]  }
   0x1   :  { %v49_v0 = vld [vmem:[%s89_s0 + $0x1] ss:$4 sm:$0x7]   ;;  %v47_v1 = vld [vmem:[%s89_s0 + $0x3] ss:$4 sm:%s6_s6]   ;;  %s55_s12 = smov 96  }
   0x2   :  { %8 = vrot.lane.b32.xlu0 %v47_v1, %s55_s12  ;;  %v2_v2 = vld [vmem:[%s89_s0] ss:$4 sm:$0x7]   ;;  %v48_v3 = vld [vmem:[%s89_s0 + $0x2] ss:$4 sm:%s13_s11]   ;;  %s56_s0 = smov 32  }
   0x3   :  { %21 = vrot.lane.b32.xlu1 %v49_v0, %s56_s0  ;;  %4 = vst.msk [vmem:[#allocation0] ss:$8 sm:$0x7] %vm3_vm0, %v2_v2   ;;  %s57_s17 = smov 64  }
   0x6   :  { %15 = vrot.lane.b32.xlu0 %v48_v3, %s57_s17 }
  0x74   :  { %v9_v4 = vpop.permute.xlu0 %8  }
  0x75   :  { %11 = vst.msk [vmem:[#allocation0] ss:$8 sm:$0x3] %vm10_vm1, %v9_v4   ;;  %v22_v5 = vpop.permute.xlu1 %21  }
  0x78   :  { %v16_v6 = vpop.permute.xlu0 %15  }
  0x79   :  { %18 = vst.msk [vmem:[#allocation0] ss:$8 sm:$0x3] %vm17_vm2, %v16_v6  }
  0x7a   :  { %24 = vst.msk [vmem:[#allocation0] ss:$8 sm:$0x7] %vm23_vm3, %v22_v5  }
  0x81   :  { %v29_v7 = vld [vmem:[#allocation0] sm:$0x1]  ;;  %v34_v8 = vld [vmem:[#allocation0 + $0x8] sm:$0x1]  ;;  %v40_v9 = vld [vmem:[#allocation0 + $0x10] sm:$0x1] }
  0x82   :  { %32 = vst [vmem:[%s90_s1] sm:$0x1] %v29_v7  ;;  %50 = vst [vmem:[%s90_s1 + $0x1] sm:$0x1] %v34_v8 }
  0x83   :  { %51 = vst [vmem:[%s90_s1 + $0x2] sm:$0x1] %v40_v9 }

// kernel: dpn_forward.1
= control target key start
LH: loop header
LB: loop body
LE: loop exit
PB: predicated region body
PF: predicated region fallthrough
CT: control target
= control target key end

     0   :  { %s11962_s0 = inlined_call_operand.vmem [shape: f32[2,16,48], index: 0, kind: input, shape index: {}]   ;;  %s11963_s1 = inlined_call_operand.vmem [shape: bf16[3,48,448], index: 1, kind: input, shape index: {}]   ;;  %s11964_s2 = inlined_call_operand.vmem [shape: f32[1,448], index: 2, kind: input, shape index: {}]   ;;  %s11965_s3 = inlined_call_operand.vmem [shape: bf16[3,448,384], index: 3, kind: input, shape index: {}]   ;;  %s11966_s4 = inlined_call_operand.vmem [shape: f32[1,384], index: 4, kind: input, shape index: {}]   ;;  %s11967_s5 = inlined_call_operand.vmem [shape: bf16[3,384,320], index: 5, kind: input, shape index: {}]   ;;  %s11968_s6 = inlined_call_operand.vmem [shape: f32[1,320], index: 6, kind: input, shape index: {}]   ;;  %s11969_s7 = inlined_call_operand.vmem [shape: bf16[3,320,256], index: 7, kind: input, shape index: {}]   ;;  %s11970_s8 = inlined_call_operand.vmem [shape: f32[1,32], index: 8, kind: input, shape index: {}]   ;;  %s11971_s9 = inlined_call_operand.vmem [shape: f32[14,1], index: 9, kind: input, shape index: {}]   ;;  %s11972_s10 = inlined_call_operand.vmem [shape: f32[12,1], index: 10, kind: input, shape index: {}]   ;;  %s11973_s11 = inlined_call_operand.vmem [shape: f32[10,1], index: 11, kind: input, shape index: {}]   ;;  %s11974_s12 = inlined_call_operand.vmem [shape: f32[1,8], index: 12, kind: input, shape index: {}]   ;;  %s11975_s13 = inlined_call_operand.vmem [shape: f32[256,32], index: 13, kind: input, shape index: {}]   ;;  %s11976_s14 = inlined_call_operand.vmem [shape: bf16[32,32], index: 14, kind: input, shape index: {}]   ;;  %s11977_s15 = inlined_call_operand.vmem [shape: f32[1,32], index: 15, kind: input, shape index: {}]   ;;  %s11978_s16 = inlined_call_operand.vmem [shape: bf16[32,10], index: 16, kind: input, shape index: {}]   ;;  %s11979_s17 = inlined_call_operand.vmem [shape: f32[1,10], index: 17, kind: input, shape index: {}]   ;;  %s11980_s18 = inlined_call_operand.hbm [shape: f32[2,1,10], index: 18, kind: output, shape index: {0}]   ;;  %s11981_s19 = inlined_call_operand.vmem [shape: f32[2,1,1], index: 19, kind: output, shape index: {1}]  }
   0x1   :  { %11994 = sst [smem:[#allocation13_spill]] %s11962_s0 }
   0x2   :  { %11995 = sst [smem:[#allocation14_spill]] %s11963_s1 }
   0x3   :  { %11996 = sst [smem:[#allocation15_spill]] %s11964_s2 }
   0x4   :  { %11997 = sst [smem:[#allocation16_spill]] %s11965_s3 }
   0x5   :  { %11998 = sst [smem:[#allocation17_spill]] %s11966_s4 }
   0x6   :  { %11999 = sst [smem:[#allocation18_spill]] %s11980_s18 }
   0x7   :  { %12000 = sst [smem:[#allocation19_spill]] %s11981_s19 }
   0x8   :  { %25 = vsyncpa [#allocation3], 0 }
   0x9   :  { %27 = vsyncpa [#allocation3 + $0x1], 0  ;;  %s9504_s0 = smov 0   ;;  %s9506_s30 = smov 0  }
   0xa   :  { %s9508_s20 = smov 0   ;;  %s9510_s21 = smov 0  }
   0xb LB: > { %12001 = sst [smem:[#allocation5_spill]] %s9386_s0  ;;  %s9525_s1 = sadd.s32 4294967295, %s9398_s21   ;;  %s9398_s21 = sphi %s9510_s21, %s12023_s21   ;;  %s9394_s20 = sphi %s9508_s20, %s12025_s20   ;;  %s9390_s30 = sphi %s9506_s30, %s12027_s30   ;;  %s9386_s0 = sphi %s9504_s0, %s12026_s0  }
   0xc   : > { %12002 = sst [smem:[#allocation6_spill]] %s9394_s20  ;;  %s6974_s22 = sadd.s32 4294967294, %s9398_s21  }
   0xd   : > { %12003 = sst [smem:[#allocation7_spill]] %s9398_s21  ;;  %s9529_s2 = sadd.s32 1, %s9398_s21  }
   0xe   : > { %12004 = sst [smem:[#allocation8_spill]] %s9529_s2  ;;  %s423_s23 = sadd.s32 1, %s9394_s20 }
   0xf   : > { %s420_s24 = ssub.s32 %s9398_s21, %s9529_s2  ;;  %p433_p0 = scmp.ne.s32.totalorder %s9394_s20, %s9390_s30 }
  0x10   : > { %p421_p1 = scmp.eq.s32.totalorder %s420_s24, 0  ;;  %p434_p2 = scmp.eq.s32.totalorder %s9525_s1, 1 }
  0x11   : > { %p439_p3 = scmp.ne.s32.totalorder %s9390_s30, %s9386_s0  ;;  %p440_p4 = scmp.eq.s32.totalorder %s6974_s22, 1 }
  0x12   : > { %s9540_s25 = scalar_select %p421_p1, %s9394_s20, %s423_s23  }
  0x13   : > { %p9542_p5 = por %p434_p2, %p433_p0  ;;  %p9546_p6 = por %p440_p4, %p439_p3 }
  0x14   : > { %12005 = sst [smem:[#allocation9_spill]] %s9540_s25  ;;  %p6977_p7 = scmp.ge.s32.totalorder %s9398_s21, 1 }
  0x15   : > { %s12006_s3 = scalar_select %p9542_p5, 1, 0 }
  0x16   : > { %s12008_s26 = scalar_select %p9546_p6, 1, 0 }
  0x17   : > { %12007 = sst [smem:[#allocation10_spill]] %s12006_s3  ;;  %p543_p8 = scmp.lt.s32.totalorder %s9398_s21, 3 }
  0x18   : > { %12009 = sst [smem:[#allocation11_spill]] %s12008_s26 }
  0x19   : > { %p544_p9 = pnand %p6977_p7, %p543_p8 }
  0x1b   : > { %547 = sbr.rel (%p544_p9) target bundleno = 2249 (0x8c9), region = 92 }
  0x20   : > { %s12010_s29 = sld [smem:[#allocation14_spill]]  ;;  %p601_p10 = scmp.lt.s32.totalorder %s9525_s1, 1  ;;  %v9400_v2 = vmov 0   ;;  %vm705_vm0 = vcmask 392192   ;;  %vm1155_vm1 = vcmask 523264   ;;  %vm1160_vm2 = vcmask 1045504  }
  0x21   : > { %741 = vmatprep.mubr.bf16.mxu0 %v9400_v2  ;;  %784 = vmatprep.mubr.bf16.mxu1 %v9400_v2  ;;  %s12012_s22 = sld [smem:[#allocation13_spill]]  ;;  %vm1166_vm3 = vcmask 521216   ;;  %vm3470_vm4 = vcmask 1043456   ;;  %vm9402_vm5 = vmmov 0   ;;  %vm5519_vm6 = vcmask 1041408   ;;  %s8146_s25 = sshll.u32 %s9525_s1, 4 }
  0x22   : > { %s9568_s28 = scalar_select %p601_p10, %s9525_s1, 1  ;;  %vm1177_vm7 = vcmask 5120   ;;  %vm5523_vm8 = vcmask 517120   ;;  %vm1175_vm9 = vcmask 7168   ;;  %vm3483_vm10 = vcmask 3072  }
  0x23   : > { %s12015_s4 = sld [smem:[#allocation17_spill]]  ;;  %vm5533_vm11 = vcmask 1024   ;;  %vm6560_vm12 = vcmask 64512   ;;  %vm6758_vm13 = vcmask 261120   ;;  %vm6803_vm14 = vcmask 253952  }
  0x24   : > { %12011 = sst [smem:[#allocation12_spill]] %s9568_s28  ;;  %s8149_s20 = sshll.u32 %s9568_s28, 4  ;;  %vm6877_vm15 = vcmask 73728  }
  0x25   : > { %s12017_s28 = sld [smem:[#allocation18_spill]] }
  0x26   : > { %v8476_v0 = vld [vmem:[%s12010_s29 + $0xa4] ss:$16 sps:$4 sm:$0xff]   ;;  %v8478_v1 = vld [vmem:[%s12010_s29 + $0xac] ss:$16 sps:$4 sm:$0xff]   ;;  %v8480_v3 = vld [vmem:[%s12010_s29 + $0xa0] ss:$16 sps:$4 sm:$0xff]  }
  0x27   : > { %719 = vmatprep.subr.bf16.mxu0 %v8476_v0  ;;  %v8481_v4 = vld [vmem:[%s12010_s29 + $0xa8] ss:$16 sps:$4 sm:$0xff]   ;;  %762 = vmatprep.subr.bf16.mxu1 %v8478_v1  ;;  %v8482_v5 = vld [vmem:[%s12010_s29 + $0x84] ss:$16 sps:$4 sm:$0xff]   ;;  %v8484_v6 = vld [vmem:[%s12010_s29 + $0x8c] ss:$16 sps:$4 sm:$0xff]   ;;  %s605_s23 = scalar_lea.vmem %s12012_s22, %s8149_s20 }
  0x28   : > { %720 = vmatpush1.bf16.msra.mxu0 %v8480_v3  ;;  %763 = vmatpush1.bf16.msra.mxu1 %v8481_v4  ;;  %v8486_v7 = vld [vmem:[%s12010_s29 + $0x80] ss:$16 sps:$4 sm:$0xff]   ;;  %v8487_v8 = vld [vmem:[%s12010_s29 + $0x88] ss:$16 sps:$4 sm:$0xff]   ;;  %v8488_v9 = vld [vmem:[%s12010_s29 + $0x64] ss:$16 sps:$4 sm:$0xff]  }
  0x29   : > { %721 = vmatprep.subr.bf16.mxu0 %v8482_v5  ;;  %764 = vmatprep.subr.bf16.mxu1 %v8484_v6  ;;  %v8490_v10 = vld [vmem:[%s12010_s29 + $0x6c] ss:$16 sps:$4 sm:$0xff]   ;;  %v8492_v11 = vld [vmem:[%s12010_s29 + $0x60] ss:$16 sps:$4 sm:$0xff]   ;;  %v8493_v12 = vld [vmem:[%s12010_s29 + $0x68] ss:$16 sps:$4 sm:$0xff]  }
  0x2a   : > { %v610_v13 = vld [vmem:[%s605_s23] sm:$0xff]  ;;  %v611_v14 = vld [vmem:[%s605_s23 + $0x8] sm:$0xff]  ;;  %s12013_s23 = sld [smem:[#allocation16_spill]] }
  0x2b   : > { %v9598_v15 = vpack.c.bf16 %v611_v14, %v610_v13  ;;  %v8496_v16 = vld [vmem:[%s12010_s29 + $0x44] ss:$16 sps:$4 sm:$0xff]   ;;  %v8499_v19 = vld [vmem:[%s12010_s29 + $0x4c] ss:$16 sps:$4 sm:$0xff]   ;;  %v8494_v21 = vld [vmem:[%s12010_s29 + $0x40] ss:$16 sps:$4 sm:$0xff]  }
  0x2c   : > { %722 = vmatpush1.bf16.msra.mxu0 %v8486_v7  ;;  %765 = vmatpush1.bf16.msra.mxu1 %v8487_v8  ;;  %v8497_v22 = vld [vmem:[%s12010_s29 + $0x48] ss:$16 sps:$4 sm:$0xff]   ;;  %v8502_v23 = vld [vmem:[%s12010_s29 + $0x24] ss:$16 sps:$4 sm:$0xff]   ;;  %v8505_v25 = vld [vmem:[%s12010_s29 + $0x2c] ss:$16 sps:$4 sm:$0xff]  }
  0x2d   : > { %723 = vmatprep.subr.bf16.mxu0 %v8488_v9  ;;  %766 = vmatprep.subr.bf16.mxu1 %v8490_v10  ;;  %v639_v17 = vshrl.u32 %v9598_v15, 16  ;;  %v641_v18 = vshll.u32 %v9598_v15, 16  ;;  %v8500_v26 = vld [vmem:[%s12010_s29 + $0x20] ss:$16 sps:$4 sm:$0xff]   ;;  %v8503_v27 = vld [vmem:[%s12010_s29 + $0x28] ss:$16 sps:$4 sm:$0xff]  }
  0x2e   : > { %v8508_v28 = vld [vmem:[%s12010_s29 + $0x4] ss:$16 sps:$4 sm:$0xff]   ;;  %v8511_v29 = vld [vmem:[%s12010_s29 + $0xc] ss:$16 sps:$4 sm:$0xff]   ;;  %v8506_v30 = vld [vmem:[%s12010_s29] ss:$16 sps:$4 sm:$0xff]  }
  0x2f   : > { %v643_v20 = vrot.slane %v641_v18, 1  ;;  %v8509_v31 = vld [vmem:[%s12010_s29 + $0x8] ss:$16 sps:$4 sm:$0xff]   ;;  %v8514_v32 = vld [vmem:[%s12010_s29 + $0x104] ss:$16 sps:$4 sm:$0xff]   ;;  %v957_v48 = vrot.slane %v9598_v15, 1 }
  0x30   : > { %724 = vmatpush1.bf16.msra.mxu0 %v8492_v11  ;;  %767 = vmatpush1.bf16.msra.mxu1 %v8493_v12  ;;  %v8517_v33 = vld [vmem:[%s12010_s29 + $0x10c] ss:$16 sps:$4 sm:$0xff]   ;;  %v8512_v34 = vld [vmem:[%s12010_s29 + $0x100] ss:$16 sps:$4 sm:$0xff]   ;;  %v8515_v35 = vld [vmem:[%s12010_s29 + $0x108] ss:$16 sps:$4 sm:$0xff]  }
  0x31   : > { %867 = vmatprep.subr.bf16.mxu0 %v8496_v16  ;;  %910 = vmatprep.subr.bf16.mxu1 %v8499_v19  ;;  %v644_v24 = vor.u32 %v643_v20, %v639_v17  ;;  %v8520_v36 = vld [vmem:[%s12010_s29 + $0xe4] ss:$16 sps:$4 sm:$0xff]   ;;  %v8523_v37 = vld [vmem:[%s12010_s29 + $0xec] ss:$16 sps:$4 sm:$0xff]   ;;  %v8518_v38 = vld [vmem:[%s12010_s29 + $0xe0] ss:$16 sps:$4 sm:$0xff]  }
  0x32   : > { %v8521_v39 = vld [vmem:[%s12010_s29 + $0xe8] ss:$16 sps:$4 sm:$0xff]   ;;  %v8526_v40 = vld [vmem:[%s12010_s29 + $0xc4] ss:$16 sps:$4 sm:$0xff]   ;;  %v8529_v41 = vld [vmem:[%s12010_s29 + $0xcc] ss:$16 sps:$4 sm:$0xff]  }
  0x33   : > { %7004 = vmatmul.mubr.msk.bf16.vlgmr.msra.gmra.mxu0 %vm705_vm0, %v644_v24  ;;  %7005 = vmatmul.mubr.msk.bf16.vlgmr.msra.gmra.mxu1 %vm705_vm0, %v644_v24  ;;  %v8524_v42 = vld [vmem:[%s12010_s29 + $0xc0] ss:$16 sps:$4 sm:$0xff]   ;;  %v8527_v43 = vld [vmem:[%s12010_s29 + $0xc8] ss:$16 sps:$4 sm:$0xff]   ;;  %s12014_s20 = sld [smem:[#allocation15_spill]] }
  0x34   : > { %868 = vmatpush1.bf16.msra.mxu0 %v8494_v21  ;;  %911 = vmatpush1.bf16.msra.mxu1 %v8497_v22  ;;  %v8532_v44 = vld [vmem:[%s12013_s23 + $0x34c] ss:$12 sps:$4 sm:$0xff]   ;;  %v8530_v46 = vld [vmem:[%s12013_s23 + $0x348] ss:$12 sps:$4 sm:$0xff]   ;;  %v8533_v50 = vld [vmem:[%s12013_s23 + $0x330] ss:$12 sps:$4 sm:$0xff]  }
  0x35   : > { %869 = vmatprep.subr.bf16.mxu0 %v8502_v23  ;;  %912 = vmatprep.subr.bf16.mxu1 %v8505_v25  ;;  %v8547_v45 = vld [vmem:[%s12013_s23 + $0x4cc] ss:$12 sps:$4 sm:$0xff]   ;;  %v8545_v47 = vld [vmem:[%s12013_s23 + $0x4c8] ss:$12 sps:$4 sm:$0xff]   ;;  %v8541_v53 = vld [vmem:[%s12013_s23 + $0x304] ss:$12 sps:$4 sm:$0xff]  }
  0x36   : > { %889 = vmatprep.mubr.bf16.mxu0 %v9400_v2  ;;  %932 = vmatprep.mubr.bf16.mxu1 %v9400_v2  ;;  %v8535_v49 = vld [vmem:[%s12013_s23 + $0x334] ss:$12 sps:$4 sm:$0xff]   ;;  %v8538_v51 = vld [vmem:[%s12013_s23 + $0x31c] ss:$12 sps:$4 sm:$0xff]   ;;  %v8536_v52 = vld [vmem:[%s12013_s23 + $0x318] ss:$12 sps:$4 sm:$0xff]  }
  0x37   : > { %v8539_v54 = vld [vmem:[%s12013_s23 + $0x300] ss:$12 sps:$4 sm:$0xff]   ;;  %v8542_v56 = vld [vmem:[%s12013_s23 + $0x2e8] ss:$12 sps:$4 sm:$0xff]   ;;  %v8548_v59 = vld [vmem:[%s12013_s23 + $0x2d0] ss:$12 sps:$4 sm:$0xff]  }
  0x38   : > { %870 = vmatpush1.bf16.msra.mxu0 %v8500_v26  ;;  %913 = vmatpush1.bf16.msra.mxu1 %v8503_v27  ;;  %v8544_v55 = vld [vmem:[%s12013_s23 + $0x2ec] ss:$12 sps:$4 sm:$0xff]   ;;  %v8550_v57 = vld [vmem:[%s12013_s23 + $0x2d4] ss:$12 sps:$4 sm:$0xff]   ;;  %v8551_v60 = vld [vmem:[%s12013_s23 + $0x4b0] ss:$12 sps:$4 sm:$0xff]  }
  0x39   : > { %871 = vmatprep.subr.bf16.mxu0 %v8508_v28  ;;  %914 = vmatprep.subr.bf16.mxu1 %v8511_v29  ;;  %v8553_v58 = vld [vmem:[%s12013_s23 + $0x4b4] ss:$12 sps:$4 sm:$0xff]   ;;  %v8556_v61 = vld [vmem:[%s12013_s23 + $0x2bc] ss:$12 sps:$4 sm:$0xff]   ;;  %v8554_v63 = vld [vmem:[%s12013_s23 + $0x2b8] ss:$12 sps:$4 sm:$0xff]  }
  0x3a   : > { %v8559_v62 = vld [vmem:[%s12013_s23 + $0x49c] ss:$12 sps:$4 sm:$0xff]   ;;  %v8557_v0 = vld [vmem:[%s12013_s23 + $0x498] ss:$12 sps:$4 sm:$0xff]   ;;  %v8560_v1 = vld [vmem:[%s12013_s23 + $0x2a0] ss:$12 sps:$4 sm:$0xff]  }
  0x3b   : > { %v8562_v3 = vld [vmem:[%s12013_s23 + $0x2a4] ss:$12 sps:$4 sm:$0xff]   ;;  %v8563_v4 = vld [vmem:[%s12013_s23 + $0x480] ss:$12 sps:$4 sm:$0xff]   ;;  %v8566_v8 = vld [vmem:[%s12013_s23 + $0x408] ss:$12 sps:$4 sm:$0xff]  }
  0x3c   : > { %872 = vmatpush1.bf16.msra.mxu0 %v8506_v30  ;;  %915 = vmatpush1.bf16.msra.mxu1 %v8509_v31  ;;  %v8565_v5 = vld [vmem:[%s12013_s23 + $0x484] ss:$12 sps:$4 sm:$0xff]   ;;  %v8568_v6 = vld [vmem:[%s12013_s23 + $0x40c] ss:$12 sps:$4 sm:$0xff]   ;;  %v8569_v9 = vld [vmem:[%s12013_s23 + $0x468] ss:$12 sps:$4 sm:$0xff]  }
  0x3d   : > { %1031 = vmatprep.subr.bf16.mxu0 %v8514_v32  ;;  %1074 = vmatprep.subr.bf16.mxu1 %v8517_v33  ;;  %v8571_v7 = vld [vmem:[%s12013_s23 + $0x46c] ss:$12 sps:$4 sm:$0xff]   ;;  %v8574_v10 = vld [vmem:[%s12013_s23 + $0x3f4] ss:$12 sps:$4 sm:$0xff]   ;;  %v8572_v12 = vld [vmem:[%s12013_s23 + $0x3f0] ss:$12 sps:$4 sm:$0xff]  }
  0x3e   : > { %v8577_v11 = vld [vmem:[%s12013_s23 + $0x454] ss:$12 sps:$4 sm:$0xff]   ;;  %v8575_v13 = vld [vmem:[%s12013_s23 + $0x450] ss:$12 sps:$4 sm:$0xff]   ;;  %v8578_v14 = vld [vmem:[%s12013_s23 + $0x3d8] ss:$12 sps:$4 sm:$0xff]  }
  0x3f   : > { %7018 = vmatmul.mubr.msk.bf16.vlgmr.msra.gmra.mxu0 %vm705_vm0, %v9598_v15  ;;  %7019 = vmatmul.mubr.msk.bf16.vlgmr.msra.gmra.mxu1 %vm705_vm0, %v9598_v15  ;;  %v8580_v15 = vld [vmem:[%s12013_s23 + $0x3dc] ss:$12 sps:$4 sm:$0xff]   ;;  %v8581_v16 = vld [vmem:[%s12013_s23 + $0x438] ss:$12 sps:$4 sm:$0xff]   ;;  %v8584_v20 = vld [vmem:[%s12013_s23 + $0x3c0] ss:$12 sps:$4 sm:$0xff]  }
  0x40   : > { %1032 = vmatpush1.bf16.msra.mxu0 %v8512_v34  ;;  %1075 = vmatpush1.bf16.msra.mxu1 %v8515_v35  ;;  %v8583_v17 = vld [vmem:[%s12013_s23 + $0x43c] ss:$12 sps:$4 sm:$0xff]   ;;  %v8586_v18 = vld [vmem:[%s12013_s23 + $0x3c4] ss:$12 sps:$4 sm:$0xff]   ;;  %v8587_v21 = vld [vmem:[%s12013_s23 + $0x420] ss:$12 sps:$4 sm:$0xff]  }
  0x41   : > { %1033 = vmatprep.subr.bf16.mxu0 %v8520_v36  ;;  %1076 = vmatprep.subr.bf16.mxu1 %v8523_v37  ;;  %v8589_v19 = vld [vmem:[%s12013_s23 + $0x424] ss:$12 sps:$4 sm:$0xff]   ;;  %v8592_v22 = vld [vmem:[%s12013_s23 + $0x3ac] ss:$12 sps:$4 sm:$0xff]   ;;  %v8590_v24 = vld [vmem:[%s12013_s23 + $0x3a8] ss:$12 sps:$4 sm:$0xff]  }
  0x42   : > { %1053 = vmatprep.mubr.bf16.mxu0 %v9400_v2  ;;  %1096 = vmatprep.mubr.bf16.mxu1 %v9400_v2  ;;  %v8595_v23 = vld [vmem:[%s12013_s23 + $0x52c] ss:$12 sps:$4 sm:$0xff]   ;;  %v8593_v25 = vld [vmem:[%s12013_s23 + $0x528] ss:$12 sps:$4 sm:$0xff]   ;;  %v8596_v28 = vld [vmem:[%s12013_s23 + $0x390] ss:$12 sps:$4 sm:$0xff]  }
  0x43   : > { %v8598_v26 = vld [vmem:[%s12013_s23 + $0x394] ss:$12 sps:$4 sm:$0xff]   ;;  %v8599_v29 = vld [vmem:[%s12013_s23 + $0x510] ss:$12 sps:$4 sm:$0xff]   ;;  %v8602_v32 = vld [vmem:[%s12013_s23 + $0x378] ss:$12 sps:$4 sm:$0xff]  }
  0x44   : > { %1034 = vmatpush1.bf16.msra.mxu0 %v8518_v38  ;;  %1077 = vmatpush1.bf16.msra.mxu1 %v8521_v39  ;;  %v8601_v27 = vld [vmem:[%s12013_s23 + $0x514] ss:$12 sps:$4 sm:$0xff]   ;;  %v8604_v30 = vld [vmem:[%s12013_s23 + $0x37c] ss:$12 sps:$4 sm:$0xff]   ;;  %v8605_v33 = vld [vmem:[%s12013_s23 + $0x4f8] ss:$12 sps:$4 sm:$0xff]  }
  0x45   : > { %1035 = vmatprep.subr.bf16.mxu0 %v8526_v40  ;;  %1078 = vmatprep.subr.bf16.mxu1 %v8529_v41  ;;  %v8607_v31 = vld [vmem:[%s12013_s23 + $0x4fc] ss:$12 sps:$4 sm:$0xff]   ;;  %v8608_v34 = vld [vmem:[%s12013_s23 + $0x360] ss:$12 sps:$4 sm:$0xff]   ;;  %v8610_v35 = vld [vmem:[%s12013_s23 + $0x364] ss:$12 sps:$4 sm:$0xff]  }
  0x46   : > { %v8611_v36 = vld [vmem:[%s12013_s23 + $0x4e0] ss:$12 sps:$4 sm:$0xff]   ;;  %v8613_v37 = vld [vmem:[%s12013_s23 + $0x4e4] ss:$12 sps:$4 sm:$0xff]  }
  0x47   : > { %v8614_v38 = vld [vmem:[%s12013_s23 + $0x410] ss:$12 sps:$4 sm:$0xff]  }
  0x48   : > { %1036 = vmatpush1.bf16.msra.mxu0 %v8524_v42  ;;  %1079 = vmatpush1.bf16.msra.mxu1 %v8527_v43 }
  0x49   : > { %1902 = vmatprep.subr.bf16.mxu0 %v8532_v44  ;;  %1945 = vmatprep.subr.bf16.mxu1 %v8547_v45 }
  0x4b   : > { %7044 = vmatmul.mubr.msk.bf16.vlgmr.msra.gmra.mxu0 %vm705_vm0, %v957_v48  ;;  %7045 = vmatmul.mubr.msk.bf16.vlgmr.msra.gmra.mxu1 %vm705_vm0, %v957_v48 }
  0x4c   : > { %1903 = vmatpush1.bf16.msra.mxu0 %v8530_v46  ;;  %1946 = vmatpush1.bf16.msra.mxu1 %v8545_v47  ;;  %v1117_v47 = vlaneseq }
  0x4d   : > { %1904 = vmatprep.subr.bf16.mxu0 %v8535_v49  ;;  %1947 = vmatprep.subr.bf16.mxu1 %v8553_v58 }
  0x50   : > { %1905 = vmatpush1.bf16.msra.mxu0 %v8533_v50  ;;  %1948 = vmatpush1.bf16.msra.mxu1 %v8551_v60 }
  0x51   : > { %1906 = vmatprep.subr.bf16.mxu0 %v8538_v51  ;;  %1949 = vmatprep.subr.bf16.mxu1 %v8559_v62 }
  0x54   : > { %1907 = vmatpush1.bf16.msra.mxu0 %v8536_v52  ;;  %1950 = vmatpush1.bf16.msra.mxu1 %v8557_v0  ;;  %v1118_v52 = vshrl.u32 %v1117_v47, 7 }
  0x55   : > { %1908 = vmatprep.subr.bf16.mxu0 %v8541_v53  ;;  %1951 = vmatprep.subr.bf16.mxu1 %v8565_v5 }
  0x56   : > { %v9866_v58 = vsub.s32 1, %v1118_v52 }
  0x58   : > { %1909 = vmatpush1.bf16.msra.mxu0 %v8539_v54  ;;  %1952 = vmatpush1.bf16.msra.mxu1 %v8563_v4 }
  0x59   : > { %1910 = vmatprep.subr.bf16.mxu0 %v8544_v55  ;;  %1953 = vmatprep.subr.bf16.mxu1 %v8571_v7  ;;  %v9859_v55 = vsub.s32 0, %v1118_v52 }
  0x5c   : > { %1911 = vmatpush1.bf16.msra.mxu0 %v8542_v56  ;;  %1954 = vmatpush1.bf16.msra.mxu1 %v8569_v9  ;;  %v9861_v56 = vsub.s32 2, %v1118_v52 }
  0x5d   : > { %1912 = vmatprep.subr.bf16.mxu0 %v8550_v57  ;;  %1955 = vmatprep.subr.bf16.mxu1 %v8577_v11  ;;  %v1115_v57 = vld [vmem:[%s12014_s20] sm:$0xf]  ;;  %s594_s20 = sand.u32 1, %s9390_s30  }
  0x5e   : > { %v1120_v0 = vrot.slane %v1115_v57, %v9859_v55  ;;  %v1128_v4 = vrot.slane %v1115_v57, %v9861_v56  ;;  %v1124_v5 = vrot.slane %v1115_v57, %v9866_v58  ;;  %s595_s24 = scalar_lea.vmem [#allocation2], %s594_s20  ;;  %s6882_s1 = scalar_lea.sflag [#allocation3], %s594_s20 }
  0x5f   : > { %s6897_s0 = sshll.u32 %s595_s24, 4  ;;  %s11918_s0 = int_to_ptr.vmem [resolvable:$true] %s6897_s0 }
  0x60   : > { %1913 = vmatpush1.bf16.msra.mxu0 %v8548_v59  ;;  %1956 = vmatpush1.bf16.msra.mxu1 %v8575_v13  ;;  %v1131_v59 = vsub.s32 3, %v1118_v52  ;;  %s9338_s2 = scalar_lea.vmem %s11918_s0, 16 }
  0x61   : > { %1914 = vmatprep.subr.bf16.mxu0 %v8556_v61  ;;  %1957 = vmatprep.subr.bf16.mxu1 %v8583_v17  ;;  %p9339_p11 = scmp.ne.s32.totalorder %s11918_s0, %s9338_s2 }
  0x63   : > { %p9340_p12 = pnand %p9339_p11, %p9542_p5 }
  0x64   : > { %1915 = vmatpush1.bf16.msra.mxu0 %v8554_v63  ;;  %1958 = vmatpush1.bf16.msra.mxu1 %v8581_v16 }
  0x65   : > { %1916 = vmatprep.subr.bf16.mxu0 %v8562_v3  ;;  %1959 = vmatprep.subr.bf16.mxu1 %v8589_v19  ;;  %p9341_p13 = pneg %p9340_p12 }
  0x68   : > { %1917 = vmatpush1.bf16.msra.mxu0 %v8560_v1  ;;  %1960 = vmatpush1.bf16.msra.mxu1 %v8587_v21 }
  0x69   : > { %1918 = vmatprep.subr.bf16.mxu0 %v8568_v6  ;;  %1969 = vmatprep.subr.bf16.mxu1 %v8595_v23  ;;  %v1132_v6 = vrot.slane %v1115_v57, %v1131_v59 }
  0x6c   : > { %1919 = vmatpush2.bf16.msra.mxu0 %v8566_v8  ;;  %1970 = vmatpush2.bf16.msra.mxu1 %v8593_v25 }
  0x6d   : > { %1920 = vmatprep.subr.bf16.mxu0 %v8574_v10  ;;  %1971 = vmatprep.subr.bf16.mxu1 %v8601_v27 }
  0x70   : > { %1921 = vmatpush2.bf16.msra.mxu0 %v8572_v12  ;;  %1972 = vmatpush2.bf16.msra.mxu1 %v8599_v29 }
  0x71   : > { %1922 = vmatprep.subr.bf16.mxu0 %v8580_v15  ;;  %1973 = vmatprep.subr.bf16.mxu1 %v8607_v31 }
  0x74   : > { %1923 = vmatpush2.bf16.msra.mxu0 %v8578_v14  ;;  %1974 = vmatpush2.bf16.msra.mxu1 %v8605_v33 }
  0x75   : > { %1924 = vmatprep.subr.bf16.mxu0 %v8586_v18  ;;  %1975 = vmatprep.subr.bf16.mxu1 %v8613_v37 }
  0x78   : > { %1925 = vmatpush2.bf16.msra.mxu0 %v8584_v20  ;;  %1976 = vmatpush2.bf16.msra.mxu1 %v8611_v36 }
  0x79   : > { %1926 = vmatprep.subr.bf16.mxu0 %v8592_v22  ;;  %8150 = vmatprep.subr.bf16.mxu1 %v8614_v38 }
  0x7c   : > { %1927 = vmatpush2.bf16.msra.mxu0 %v8590_v24 }
  0x7d   : > { %1928 = vmatprep.subr.bf16.mxu0 %v8598_v26 }
  0x80   : > { %1929 = vmatpush2.bf16.msra.mxu0 %v8596_v28 }
  0x81   : > { %1930 = vmatprep.subr.bf16.mxu0 %v8604_v30 }
  0x84   : > { %1931 = vmatpush2.bf16.msra.mxu0 %v8602_v32 }
  0x85   : > { %1932 = vmatprep.subr.bf16.mxu0 %v8610_v35 }
  0x88   : > { %1933 = vmatpush2.bf16.msra.mxu0 %v8608_v34 }
  0x89   : > { %2029 = vmatprep.subr.bf16.mxu0 %v9400_v2 }
  0xf3   : > { %v743_v39 = vpop.f32.mrf.mxu0  ;;  %v786_v40 = vpop.f32.mrf.mxu1 }
  0xf5   : > { %v745_v41 = vpop.f32.mrf.mxu0  ;;  %v788_v42 = vpop.f32.mrf.mxu1 }
  0xf7   : > { %v790_v43 = vpop.f32.mrf.mxu1  ;;  %v747_v44 = vpop.f32.mrf.mxu0 }
  0xf9   : > { %v792_v45 = vpop.f32.mrf.mxu1  ;;  %v749_v46 = vpop.f32.mrf.mxu0 }
  0xff   : > { %v891_v48 = vpop.f32.mrf.mxu0  ;;  %v934_v49 = vpop.f32.mrf.mxu1 }
 0x100   : > { %v892_v62 = vadd.f32 %v891_v48, %v743_v39  ;;  %v935_v63 = vadd.f32 %v934_v49, %v786_v40 }
 0x101   : > { %v893_v50 = vpop.f32.mrf.mxu0  ;;  %v936_v51 = vpop.f32.mrf.mxu1 }
 0x102   : > { %v894_v7 = vadd.f32 %v893_v50, %v745_v41  ;;  %v937_v8 = vadd.f32 %v936_v51, %v788_v42 }
 0x103   : > { %v895_v53 = vpop.f32.mrf.mxu0  ;;  %v938_v54 = vpop.f32.mrf.mxu1 }
 0x104   : > { %v896_v16 = vadd.f32 %v895_v53, %v747_v44  ;;  %v939_v17 = vadd.f32 %v938_v54, %v790_v43 }
 0x105   : > { %v897_v60 = vpop.f32.mrf.mxu0  ;;  %v940_v61 = vpop.f32.mrf.mxu1 }
 0x106   : > { %v898_v18 = vadd.f32 %v897_v60, %v749_v46  ;;  %v941_v21 = vadd.f32 %v940_v61, %v792_v45 }
 0x10b   : > { %v1055_v1 = vpop.f32.mrf.mxu0  ;;  %v1098_v3 = vpop.f32.mrf.mxu1 }
 0x10c   : > { %v1107_v9 = vadd.f32 %v1055_v1, %v892_v62  ;;  %v1109_v10 = vadd.f32 %v1098_v3, %v935_v63 }
 0x10d   : > { %v1057_v11 = vpop.f32.mrf.mxu0  ;;  %v1100_v12 = vpop.f32.mrf.mxu1 }
 0x10e   : > { %v1137_v13 = vadd.f32 %v1120_v0, %v1107_v9  ;;  %v1108_v14 = vadd.f32 %v1057_v11, %v894_v7  ;;  %v1110_v15 = vadd.f32 %v1100_v12, %v937_v8  ;;  %v1139_v22 = vadd.f32 %v1128_v4, %v1109_v10  ;;  %v8616_v7 = vld [vmem:[%s12013_s23 + $0x4d0] ss:$12 sps:$4 sm:$0xff]  }
 0x10f   : > { %v1059_v19 = vpop.f32.mrf.mxu0  ;;  %v1102_v20 = vpop.f32.mrf.mxu1 }
 0x110   : > { %v1138_v23 = vadd.f32 %v1124_v5, %v1108_v14  ;;  %v1140_v24 = vadd.f32 %v1132_v6, %v1110_v15  ;;  %v1111_v25 = vadd.f32 %v1059_v19, %v896_v16  ;;  %v1113_v26 = vadd.f32 %v1102_v20, %v939_v17  ;;  %v8617_v14 = vld [vmem:[%s12013_s23 + $0x3f8] ss:$12 sps:$4 sm:$0xff]   ;;  %v8620_v19 = vld [vmem:[%s12013_s23 + $0x3e0] ss:$12 sps:$4 sm:$0xff]  }
 0x111   : > { %v1061_v27 = vpop.f32.mrf.mxu0  ;;  %v1104_v28 = vpop.f32.mrf.mxu1  ;;  %v1145_v29 = vmax.f32 %v1137_v13, 0.0  ;;  %v1147_v36 = vmax.f32 %v1139_v22, 0.0  ;;  %v8618_v17 = vld [vmem:[%s12013_s23 + $0x338] ss:$12 sps:$4 sm:$0xff]   ;;  %v8621_v20 = vld [vmem:[%s12013_s23 + $0x320] ss:$12 sps:$4 sm:$0xff]  }
 0x112   : > { %v1146_v30 = vmax.f32 %v1138_v23, 0.0  ;;  %v1112_v31 = vadd.f32 %v1061_v27, %v898_v18  ;;  %v1114_v32 = vadd.f32 %v1104_v28, %v941_v21  ;;  %v1141_v33 = vadd.f32 %v1120_v0, %v1111_v25  ;;  %v8619_v18 = vld [vmem:[%s12013_s23 + $0x4b8] ss:$12 sps:$4 sm:$0xff]   ;;  %v8622_v21 = vld [vmem:[%s12013_s23 + $0x4a0] ss:$12 sps:$4 sm:$0xff]  }
 0x113   : > { %v1143_v34 = vadd.f32 %v1128_v4, %v1113_v26  ;;  %v1148_v35 = vmax.f32 %v1140_v24, 0.0  ;;  %v8623_v22 = vld [vmem:[%s12013_s23 + $0x3c8] ss:$12 sps:$4 sm:$0xff]   ;;  %v8626_v25 = vld [vmem:[%s12013_s23 + $0x3b0] ss:$12 sps:$4 sm:$0xff]  }
 0x114   : > { %v1142_v37 = vadd.f32 %v1124_v5, %v1112_v31  ;;  %v1144_v38 = vadd.f32 %v1132_v6, %v1114_v32  ;;  %v1153_v39 = vadd.f32 %v1146_v30, %v1145_v29  ;;  %v1149_v40 = vmax.f32 %v1141_v33, 0.0  ;;  %v8615_v6 = vld [vmem:[%s12013_s23 + $0x350] ss:$12 sps:$4 sm:$0xff]   ;;  %v8624_v23 = vld [vmem:[%s12013_s23 + $0x308] ss:$12 sps:$4 sm:$0xff]  }
 0x115   : > { %v1151_v41 = vmax.f32 %v1143_v34, 0.0  ;;  %v1156_v48 = vsel %vm1155_vm1, %v1148_v35, 0.0  ;;  %v8625_v24 = vld [vmem:[%s12013_s23 + $0x488] ss:$12 sps:$4 sm:$0xff]   ;;  %v8627_v26 = vld [vmem:[%s12013_s23 + $0x2f0] ss:$12 sps:$4 sm:$0xff]  }
 0x116   : > { %v1150_v42 = vmax.f32 %v1142_v37, 0.0  ;;  %v1152_v43 = vmax.f32 %v1144_v38, 0.0  ;;  %v1154_v44 = vadd.f32 %v1153_v39, %v1147_v36  ;;  %v1161_v45 = vsel %vm1160_vm2, %v1149_v40, 0.0  ;;  %v8628_v27 = vld [vmem:[%s12013_s23 + $0x470] ss:$12 sps:$4 sm:$0xff]  }
 0x117   : > { %v9872_v46 = vpack.c.bf16 %v1149_v40, %v1145_v29  ;;  %v9874_v47 = vpack.c.bf16 %v1151_v41, %v1147_v36  ;;  %v1164_v57 = vsel %vm1160_vm2, %v1151_v41, 0.0  ;;  %v8629_v28 = vld [vmem:[%s12013_s23 + $0x398] ss:$12 sps:$4 sm:$0xff]   ;;  %v8632_v31 = vld [vmem:[%s12013_s23 + $0x380] ss:$12 sps:$4 sm:$0xff]  }
 0x118   : > { %v1162_v49 = vsel %vm1160_vm2, %v1150_v42, 0.0  ;;  %v9878_v50 = vpack.c.bf16 %v1150_v42, %v1146_v30  ;;  %v1157_v51 = vadd.f32 %v1156_v48, %v1154_v44  ;;  %v9880_v52 = vpack.c.bf16 %v1152_v43, %v1148_v35  ;;  %v8630_v29 = vld [vmem:[%s12013_s23 + $0x2d8] ss:$12 sps:$4 sm:$0xff]   ;;  %v8633_v32 = vld [vmem:[%s12013_s23 + $0x2c0] ss:$12 sps:$4 sm:$0xff]  }
 0x119   : > { %v1163_v53 = vadd.f32 %v1162_v49, %v1161_v45  ;;  %v1423_v54 = vshll.u32 %v9872_v46, 16  ;;  %v1167_v62 = vsel %vm1166_vm3, %v1152_v43, 0.0  ;;  %v1437_v0 = vshll.u32 %v9874_v47, 16  ;;  %v8631_v30 = vld [vmem:[%s12013_s23 + $0x458] ss:$12 sps:$4 sm:$0xff]  }
 0x11a   : > { %1158 = vadd.xlane.f32.xlu0 %v1157_v51  ;;  %v1430_v59 = vshll.u32 %v9878_v50, 16  ;;  %v1444_v60 = vshll.u32 %v9880_v52, 16  ;;  %v1428_v1 = vshrl.u32 %v9878_v50, 16  ;;  %v1442_v4 = vshrl.u32 %v9880_v52, 16  ;;  %v8634_v33 = vld [vmem:[%s12013_s23 + $0x440] ss:$12 sps:$4 sm:$0xff]  }
 0x11b   : > { %v1165_v61 = vadd.f32 %v1164_v57, %v1163_v53  ;;  %v1425_v63 = vrot.slane %v1423_v54, 1  ;;  %v1421_v9 = vshrl.u32 %v9872_v46, 16  ;;  %v1435_v10 = vshrl.u32 %v9874_v47, 16  ;;  %v8635_v34 = vld [vmem:[%s12013_s23 + $0x368] ss:$12 sps:$4 sm:$0xff]  }
 0x11c   : > { %v1432_v3 = vrot.slane %v1430_v59, 1  ;;  %v1446_v5 = vrot.slane %v1444_v60, 1  ;;  %v1439_v11 = vrot.slane %v1437_v0, 1  ;;  %v8636_v35 = vld [vmem:[%s12013_s23 + $0x2a8] ss:$12 sps:$4 sm:$0xff]  }
 0x11d   : > { %v1168_v8 = vadd.f32 %v1167_v62, %v1165_v61  ;;  %v9901_v15 = vor.u32 %v1425_v63, %v1421_v9  ;;  %v8637_v36 = vld [vmem:[%s12013_s23 + $0x428] ss:$12 sps:$4 sm:$0xff]   ;;  %v8640_v37 = vld [vmem:[%s12013_s23 + $0xac] ss:$12 sps:$4 sm:$0xff]   ;;  %v8641_v39 = vld [vmem:[%s12013_s23 + $0x530] ss:$12 sps:$4 sm:$0xff]  }
 0x11e   : > { %v1433_v12 = vor.u32 %v1432_v3, %v1428_v1  ;;  %v1447_v13 = vor.u32 %v1446_v5, %v1442_v4  ;;  %v9903_v16 = vor.u32 %v1439_v11, %v1435_v10  ;;  %v8638_v38 = vld [vmem:[%s12013_s23 + $0xa8] ss:$12 sps:$4 sm:$0xff]   ;;  %v8642_v41 = vld [vmem:[%s12013_s23 + $0x90] ss:$12 sps:$4 sm:$0xff]   ;;  %v8645_v42 = vld [vmem:[%s12013_s23 + $0x518] ss:$12 sps:$4 sm:$0xff]  }
 0x11f   : > { %1169 = vadd.xlane.f32.xlu0 %v1168_v8  ;;  %v8644_v40 = vld [vmem:[%s12013_s23 + $0x94] ss:$12 sps:$4 sm:$0xff]   ;;  %v8648_v43 = vld [vmem:[%s12013_s23 + $0x7c] ss:$12 sps:$4 sm:$0xff]   ;;  %v8646_v44 = vld [vmem:[%s12013_s23 + $0x78] ss:$12 sps:$4 sm:$0xff]  }
 0x120   : > { %1934 = vmatprep.mubr.bf16.mxu0 %v1433_v12  ;;  %7242 = vmatprep.mubr.msk.bf16.mxu1 %vm1155_vm1, %v1447_v13  ;;  %v8649_v45 = vld [vmem:[%s12013_s23 + $0x500] ss:$12 sps:$4 sm:$0xff]   ;;  %v8652_v48 = vld [vmem:[%s12013_s23 + $0x64] ss:$12 sps:$4 sm:$0xff]   ;;  %v8653_v51 = vld [vmem:[%s12013_s23 + $0x4e8] ss:$12 sps:$4 sm:$0xff]  }
 0x121   : > { %1935 = vmatmul.mubr.bf16.vlgmr.msra.gmra.mxu0 %v9901_v15  ;;  %1978 = vmatmul.mubr.bf16.vlgmr.msra.gmra.mxu1 %v9903_v16  ;;  %v8650_v49 = vld [vmem:[%s12013_s23 + $0x60] ss:$12 sps:$4 sm:$0xff]   ;;  %v8654_v57 = vld [vmem:[%s12013_s23 + $0x48] ss:$12 sps:$4 sm:$0xff]   ;;  %v8660_v61 = vld [vmem:[%s12013_s23 + $0x30] ss:$12 sps:$4 sm:$0xff]  }
 0x122   : > { %8151 = vmatpush3.bf16.msra.mxu1 %v8615_v6  ;;  %2030 = vmatpush1.bf16.msra.mxu0 %v8616_v7  ;;  %v8656_v53 = vld [vmem:[%s12013_s23 + $0x4c] ss:$12 sps:$4 sm:$0xff]   ;;  %v8657_v59 = vld [vmem:[%s12013_s23 + $0x228] ss:$12 sps:$4 sm:$0xff]   ;;  %v8663_v62 = vld [vmem:[%s12013_s23 + $0x210] ss:$12 sps:$4 sm:$0xff]  }
 0x123   : > { %2020 = vmatprep.mubr.bf16.mxu1 %v1433_v12  ;;  %7243 = vmatprep.mubr.msk.bf16.mxu0 %vm1155_vm1, %v1447_v13  ;;  %v8659_v54 = vld [vmem:[%s12013_s23 + $0x22c] ss:$12 sps:$4 sm:$0xff]   ;;  %v8662_v60 = vld [vmem:[%s12013_s23 + $0x34] ss:$12 sps:$4 sm:$0xff]   ;;  %v8668_v0 = vld [vmem:[%s12013_s23 + $0x1c] ss:$12 sps:$4 sm:$0xff]  }
 0x124   : > { %8152 = vmatprep.subr.bf16.mxu1 %v8617_v14  ;;  %2031 = vmatprep.subr.bf16.mxu0 %v9400_v2  ;;  %v8665_v63 = vld [vmem:[%s12013_s23 + $0x214] ss:$12 sps:$4 sm:$0xff]   ;;  %v8671_v1 = vld [vmem:[%s12013_s23 + $0x1fc] ss:$12 sps:$4 sm:$0xff]   ;;  %v8666_v3 = vld [vmem:[%s12013_s23 + $0x18] ss:$12 sps:$4 sm:$0xff]  }
 0x125   : > { %v8669_v4 = vld [vmem:[%s12013_s23 + $0x1f8] ss:$12 sps:$4 sm:$0xff]   ;;  %v8672_v7 = vld [vmem:[%s12013_s23] ss:$12 sps:$4 sm:$0xff]   ;;  %v8678_v11 = vld [vmem:[%s12013_s23 + $0x168] ss:$12 sps:$4 sm:$0xff]  }
 0x126   : > { %8153 = vmatpush3.bf16.msra.mxu1 %v8618_v17  ;;  %2032 = vmatpush1.bf16.msra.mxu0 %v8619_v18  ;;  %v8674_v5 = vld [vmem:[%s12013_s23 + $0x4] ss:$12 sps:$4 sm:$0xff]   ;;  %v8675_v8 = vld [vmem:[%s12013_s23 + $0x1e0] ss:$12 sps:$4 sm:$0xff]   ;;  %v8681_v12 = vld [vmem:[%s12013_s23 + $0x1c8] ss:$12 sps:$4 sm:$0xff]  }
 0x127   : > { %8154 = vmatprep.subr.bf16.mxu1 %v8620_v19  ;;  %2033 = vmatprep.subr.bf16.mxu0 %v9400_v2  ;;  %v8677_v6 = vld [vmem:[%s12013_s23 + $0x1e4] ss:$12 sps:$4 sm:$0xff]   ;;  %v8680_v9 = vld [vmem:[%s12013_s23 + $0x16c] ss:$12 sps:$4 sm:$0xff]   ;;  %v8686_v13 = vld [vmem:[%s12013_s23 + $0x154] ss:$12 sps:$4 sm:$0xff]  }
 0x128   : > { %v8683_v10 = vld [vmem:[%s12013_s23 + $0x1cc] ss:$12 sps:$4 sm:$0xff]   ;;  %v8689_v14 = vld [vmem:[%s12013_s23 + $0x1b4] ss:$12 sps:$4 sm:$0xff]   ;;  %v8692_v17 = vld [vmem:[%s12013_s23 + $0x13c] ss:$12 sps:$4 sm:$0xff]  }
 0x129   : > { %v8695_v18 = vld [vmem:[%s12013_s23 + $0x19c] ss:$12 sps:$4 sm:$0xff]   ;;  %v8690_v19 = vld [vmem:[%s12013_s23 + $0x138] ss:$12 sps:$4 sm:$0xff]  }
 0x12a   : > { %8155 = vmatpush3.bf16.msra.mxu1 %v8621_v20  ;;  %2034 = vmatpush1.bf16.msra.mxu0 %v8622_v21  ;;  %v8693_v20 = vld [vmem:[%s12013_s23 + $0x198] ss:$12 sps:$4 sm:$0xff]  }
 0x12b   : > { %8156 = vmatprep.subr.bf16.mxu1 %v8623_v22  ;;  %2035 = vmatprep.subr.bf16.mxu0 %v9400_v2  ;;  %v8698_v21 = vld [vmem:[%s12013_s23 + $0x124] ss:$12 sps:$4 sm:$0xff]  }
 0x12c   : > { %v8701_v22 = vld [vmem:[%s12013_s23 + $0x184] ss:$12 sps:$4 sm:$0xff]  }
 0x12e   : > { %8157 = vmatpush3.bf16.msra.mxu1 %v8624_v23  ;;  %2036 = vmatpush1.bf16.msra.mxu0 %v8625_v24  ;;  %v8696_v23 = vld [vmem:[%s12013_s23 + $0x120] ss:$12 sps:$4 sm:$0xff]  }
 0x12f   : > { %8158 = vmatprep.subr.bf16.mxu1 %v8626_v25  ;;  %2037 = vmatprep.subr.bf16.mxu0 %v9400_v2  ;;  %v8699_v24 = vld [vmem:[%s12013_s23 + $0x180] ss:$12 sps:$4 sm:$0xff]  }
 0x130   : > { %v8704_v25 = vld [vmem:[%s12013_s23 + $0x10c] ss:$12 sps:$4 sm:$0xff]  }
 0x132   : > { %8159 = vmatpush3.bf16.msra.mxu1 %v8627_v26  ;;  %2038 = vmatpush1.bf16.msra.mxu0 %v8628_v27  ;;  %v8707_v26 = vld [vmem:[%s12013_s23 + $0x28c] ss:$12 sps:$4 sm:$0xff]   ;;  %v8702_v27 = vld [vmem:[%s12013_s23 + $0x108] ss:$12 sps:$4 sm:$0xff]  }
 0x133   : > { %8160 = vmatprep.subr.bf16.mxu1 %v8629_v28  ;;  %2039 = vmatprep.subr.bf16.mxu0 %v9400_v2  ;;  %v8705_v28 = vld [vmem:[%s12013_s23 + $0x288] ss:$12 sps:$4 sm:$0xff]  }
 0x136   : > { %8161 = vmatpush3.bf16.msra.mxu1 %v8630_v29  ;;  %2040 = vmatpush1.bf16.msra.mxu0 %v8631_v30  ;;  %v8710_v29 = vld [vmem:[%s12013_s23 + $0xf4] ss:$12 sps:$4 sm:$0xff]  }
 0x137   : > { %8162 = vmatprep.subr.bf16.mxu1 %v8632_v31  ;;  %2041 = vmatprep.subr.bf16.mxu0 %v9400_v2  ;;  %v8713_v30 = vld [vmem:[%s12013_s23 + $0x274] ss:$12 sps:$4 sm:$0xff]   ;;  %v8708_v31 = vld [vmem:[%s12013_s23 + $0xf0] ss:$12 sps:$4 sm:$0xff]  }
 0x13a   : > { %8163 = vmatpush3.bf16.msra.mxu1 %v8633_v32  ;;  %2042 = vmatpush1.bf16.msra.mxu0 %v8634_v33  ;;  %v8711_v32 = vld [vmem:[%s12013_s23 + $0x270] ss:$12 sps:$4 sm:$0xff]  }
 0x13b   : > { %8164 = vmatprep.subr.bf16.mxu1 %v8635_v34  ;;  %2043 = vmatprep.subr.bf16.mxu0 %v9400_v2  ;;  %v8716_v33 = vld [vmem:[%s12013_s23 + $0xdc] ss:$12 sps:$4 sm:$0xff]  }
 0x13c   : > { %v8719_v34 = vld [vmem:[%s12013_s23 + $0x25c] ss:$12 sps:$4 sm:$0xff]  }
 0x13e   : > { %8165 = vmatpush3.bf16.msra.mxu1 %v8636_v35  ;;  %2044 = vmatpush1.bf16.msra.mxu0 %v8637_v36  ;;  %v8714_v35 = vld [vmem:[%s12013_s23 + $0xd8] ss:$12 sps:$4 sm:$0xff]  }
 0x13f   : > { %2053 = vmatprep.subr.bf16.mxu0 %v9400_v2  ;;  %2520 = vmatprep.subr.bf16.mxu1 %v8640_v37  ;;  %v8717_v36 = vld [vmem:[%s12013_s23 + $0x258] ss:$12 sps:$4 sm:$0xff]  }
 0x140   : > { %v8722_v37 = vld [vmem:[%s12013_s23 + $0xc4] ss:$12 sps:$4 sm:$0xff]  }
 0x141   : > { %2021 = vmatmul.mubr.bf16.vlgmr.msra.gmra.mxu1 %v9901_v15  ;;  %v8684_v15 = vld [vmem:[%s12013_s23 + $0x150] ss:$12 sps:$4 sm:$0xff]  }
 0x142   : > { %2054 = vmatpush2.bf16.msra.mxu0 %v8641_v39  ;;  %2521 = vmatpush1.bf16.msra.mxu1 %v8638_v38  ;;  %v8725_v38 = vld [vmem:[%s12013_s23 + $0x244] ss:$12 sps:$4 sm:$0xff]   ;;  %v8720_v39 = vld [vmem:[%s12013_s23 + $0xc0] ss:$12 sps:$4 sm:$0xff]  }
 0x143   : > { %2552 = vmatprep.mubr.bf16.mxu1 %v9878_v50  ;;  %2055 = vmatprep.subr.bf16.mxu0 %v9400_v2 }
 0x144   : > { %2522 = vmatprep.subr.bf16.mxu1 %v8644_v40  ;;  %v8723_v40 = vld [vmem:[%s12013_s23 + $0x240] ss:$12 sps:$4 sm:$0xff]  }
 0x146   : > { %2056 = vmatpush2.bf16.msra.mxu0 %v8645_v42  ;;  %2523 = vmatpush1.bf16.msra.mxu1 %v8642_v41  ;;  %v8726_v41 = vld [vmem:[%s12013_s23 + $0x170] ss:$12 sps:$4 sm:$0xff]  }
 0x147   : > { %2057 = vmatprep.subr.bf16.mxu0 %v9400_v2  ;;  %2524 = vmatprep.subr.bf16.mxu1 %v8648_v43  ;;  %v8727_v42 = vld [vmem:[%s12013_s23 + $0xb0] ss:$12 sps:$4 sm:$0xff]  }
 0x148   : > { %v8728_v43 = vld [vmem:[%s12013_s23 + $0x230] ss:$12 sps:$4 sm:$0xff]  }
 0x14a   : > { %2058 = vmatpush2.bf16.msra.mxu0 %v8649_v45  ;;  %2525 = vmatpush1.bf16.msra.mxu1 %v8646_v44  ;;  %v8729_v44 = vld [vmem:[%s12013_s23 + $0x158] ss:$12 sps:$4 sm:$0xff]  }
 0x14b   : > { %2059 = vmatprep.subr.bf16.mxu0 %v9400_v2  ;;  %2526 = vmatprep.subr.bf16.mxu1 %v8652_v48  ;;  %v8730_v45 = vld [vmem:[%s12013_s23 + $0x98] ss:$12 sps:$4 sm:$0xff]  }
 0x14c   : > { %v8731_v48 = vld [vmem:[%s12013_s23 + $0x218] ss:$12 sps:$4 sm:$0xff]  }
 0x14e   : > { %2060 = vmatpush2.bf16.msra.mxu0 %v8653_v51  ;;  %2527 = vmatpush1.bf16.msra.mxu1 %v8650_v49  ;;  %v8732_v49 = vld [vmem:[%s12013_s23 + $0x140] ss:$12 sps:$4 sm:$0xff]  }
 0x14f   : > { %2528 = vmatprep.subr.bf16.mxu1 %v8656_v53  ;;  %2563 = vmatprep.subr.bf16.mxu0 %v8659_v54  ;;  %v8733_v51 = vld [vmem:[%s12013_s23 + $0x80] ss:$12 sps:$4 sm:$0xff]   ;;  %v8735_v54 = vld [vmem:[%s12013_s23 + $0x128] ss:$12 sps:$4 sm:$0xff]  }
 0x150   : > { %v8734_v53 = vld [vmem:[%s12013_s23 + $0x200] ss:$12 sps:$4 sm:$0xff]  }
 0x151   : > { %2062 = vmatmul.mubr.bf16.vlgmr.msra.gmra.mxu0 %v9903_v16  ;;  %v8687_v16 = vld [vmem:[%s12013_s23 + $0x1b0] ss:$12 sps:$4 sm:$0xff]  }
 0x152   : > { %2529 = vmatpush1.bf16.msra.mxu1 %v8654_v57  ;;  %2564 = vmatpush1.bf16.msra.mxu0 %v8657_v59  ;;  %v8736_v57 = vld [vmem:[%s12013_s23 + $0x68] ss:$12 sps:$4 sm:$0xff]  }
 0x153   : > { %7328 = vmatprep.mubr.msk.bf16.mxu0 %vm1155_vm1, %v9880_v52  ;;  %2530 = vmatprep.subr.bf16.mxu1 %v8662_v60  ;;  %v8737_v59 = vld [vmem:[%s12013_s23 + $0x1e8] ss:$12 sps:$4 sm:$0xff]   ;;  %v8738_v60 = vld [vmem:[%s12013_s23 + $0x110] ss:$12 sps:$4 sm:$0xff]  }
 0x154   : > { %2565 = vmatprep.subr.bf16.mxu0 %v8665_v63  ;;  %v8741_v63 = vld [vmem:[%s12013_s23 + $0xf8] ss:$12 sps:$4 sm:$0xff]  }
 0x156   : > { %2531 = vmatpush1.bf16.msra.mxu1 %v8660_v61  ;;  %2566 = vmatpush1.bf16.msra.mxu0 %v8663_v62  ;;  %v8739_v61 = vld [vmem:[%s12013_s23 + $0x50] ss:$12 sps:$4 sm:$0xff]  }
 0x157   : > { %2532 = vmatprep.subr.bf16.mxu1 %v8668_v0  ;;  %2567 = vmatprep.subr.bf16.mxu0 %v8671_v1  ;;  %v8740_v62 = vld [vmem:[%s12013_s23 + $0x1d0] ss:$12 sps:$4 sm:$0xff]   ;;  %v8742_v0 = vld [vmem:[%s12013_s23 + $0x38] ss:$12 sps:$4 sm:$0xff]  }
 0x158   : > { %v8743_v1 = vld [vmem:[%s12013_s23 + $0x1b8] ss:$12 sps:$4 sm:$0xff]  }
 0x15a   : > { %2533 = vmatpush1.bf16.msra.mxu1 %v8666_v3  ;;  %2568 = vmatpush1.bf16.msra.mxu0 %v8669_v4  ;;  %v8744_v3 = vld [vmem:[%s12013_s23 + $0xe0] ss:$12 sps:$4 sm:$0xff]  }
 0x15b   : > { %2534 = vmatprep.subr.bf16.mxu1 %v8674_v5  ;;  %2569 = vmatprep.subr.bf16.mxu0 %v8677_v6  ;;  %v8745_v4 = vld [vmem:[%s12013_s23 + $0x20] ss:$12 sps:$4 sm:$0xff]   ;;  %v8747_v6 = vld [vmem:[%s12013_s23 + $0xc8] ss:$12 sps:$4 sm:$0xff]  }
 0x15c   : > { %v8746_v5 = vld [vmem:[%s12013_s23 + $0x1a0] ss:$12 sps:$4 sm:$0xff]  }
 0x15e   : > { %2535 = vmatpush1.bf16.msra.mxu1 %v8672_v7  ;;  %2570 = vmatpush1.bf16.msra.mxu0 %v8675_v8  ;;  %v8748_v7 = vld [vmem:[%s12013_s23 + $0x8] ss:$12 sps:$4 sm:$0xff]  }
 0x15f   : > { %2536 = vmatprep.subr.bf16.mxu1 %v8680_v9  ;;  %2571 = vmatprep.subr.bf16.mxu0 %v8683_v10  ;;  %v8749_v8 = vld [vmem:[%s12013_s23 + $0x188] ss:$12 sps:$4 sm:$0xff]   ;;  %v8752_v9 = vld [vmem:[%s12013_s23 + $0x5ec] ss:$12 sps:$4 sm:$0xff]  }
 0x160   : > { %v8750_v10 = vld [vmem:[%s12013_s23 + $0x5e8] ss:$12 sps:$4 sm:$0xff]  }
 0x162   : > { %2537 = vmatpush2.bf16.msra.mxu1 %v8678_v11  ;;  %2572 = vmatpush1.bf16.msra.mxu0 %v8681_v12  ;;  %v8753_v11 = vld [vmem:[%s12013_s23 + $0x290] ss:$12 sps:$4 sm:$0xff]   ;;  %v8756_v12 = vld [vmem:[%s12013_s23 + $0x5d4] ss:$12 sps:$4 sm:$0xff]  }
 0x163   : > { %2538 = vmatprep.subr.bf16.mxu1 %v8686_v13  ;;  %2573 = vmatprep.subr.bf16.mxu0 %v8689_v14  ;;  %v2806_v13 = vrot.slane %v9878_v50, 1  ;;  %v8754_v14 = vld [vmem:[%s12013_s23 + $0x5d0] ss:$12 sps:$4 sm:$0xff]  }
 0x166   : > { %2539 = vmatpush2.bf16.msra.mxu1 %v8684_v15  ;;  %2574 = vmatpush1.bf16.msra.mxu0 %v8687_v16  ;;  %v8757_v15 = vld [vmem:[%s12013_s23 + $0x278] ss:$12 sps:$4 sm:$0xff]   ;;  %v8760_v16 = vld [vmem:[%s12013_s23 + $0x5bc] ss:$12 sps:$4 sm:$0xff]  }
 0x167   : > { %2540 = vmatprep.subr.bf16.mxu1 %v8692_v17  ;;  %2575 = vmatprep.subr.bf16.mxu0 %v8695_v18  ;;  %v8758_v17 = vld [vmem:[%s12013_s23 + $0x5b8] ss:$12 sps:$4 sm:$0xff]   ;;  %v8761_v18 = vld [vmem:[%s12013_s23 + $0x260] ss:$12 sps:$4 sm:$0xff]  }
 0x16a   : > { %2541 = vmatpush2.bf16.msra.mxu1 %v8690_v19  ;;  %2576 = vmatpush1.bf16.msra.mxu0 %v8693_v20  ;;  %v8764_v19 = vld [vmem:[%s12013_s23 + $0x5a4] ss:$12 sps:$4 sm:$0xff]   ;;  %v8762_v20 = vld [vmem:[%s12013_s23 + $0x5a0] ss:$12 sps:$4 sm:$0xff]  }
 0x16b   : > { %2542 = vmatprep.subr.bf16.mxu1 %v8698_v21  ;;  %2577 = vmatprep.subr.bf16.mxu0 %v8701_v22  ;;  %v8765_v21 = vld [vmem:[%s12013_s23 + $0x248] ss:$12 sps:$4 sm:$0xff]   ;;  %v8768_v22 = vld [vmem:[%s12013_s23 + $0x58c] ss:$12 sps:$4 sm:$0xff]  }
 0x16e   : > { %2543 = vmatpush2.bf16.msra.mxu1 %v8696_v23  ;;  %2578 = vmatpush1.bf16.msra.mxu0 %v8699_v24  ;;  %v8771_v23 = vld [vmem:[%s12013_s23 + $0x76c] ss:$12 sps:$4 sm:$0xff]   ;;  %v8766_v24 = vld [vmem:[%s12013_s23 + $0x588] ss:$12 sps:$4 sm:$0xff]  }
 0x16f   : > { %2544 = vmatprep.subr.bf16.mxu1 %v8704_v25  ;;  %2587 = vmatprep.subr.bf16.mxu0 %v8707_v26  ;;  %v8769_v25 = vld [vmem:[%s12013_s23 + $0x768] ss:$12 sps:$4 sm:$0xff]  }
 0x170   : > { %v8774_v26 = vld [vmem:[%s12013_s23 + $0x574] ss:$12 sps:$4 sm:$0xff]  }
 0x172   : > { %2545 = vmatpush2.bf16.msra.mxu1 %v8702_v27  ;;  %2588 = vmatpush2.bf16.msra.mxu0 %v8705_v28  ;;  %v8777_v27 = vld [vmem:[%s12013_s23 + $0x754] ss:$12 sps:$4 sm:$0xff]   ;;  %v2808_v28 = vrot.slane %v9880_v52, 1 }
 0x173   : > { %2546 = vmatprep.subr.bf16.mxu1 %v8710_v29  ;;  %2589 = vmatprep.subr.bf16.mxu0 %v8713_v30  ;;  %v8772_v29 = vld [vmem:[%s12013_s23 + $0x570] ss:$12 sps:$4 sm:$0xff]  }
 0x174   : > { %v8775_v30 = vld [vmem:[%s12013_s23 + $0x750] ss:$12 sps:$4 sm:$0xff]  }
 0x176   : > { %2547 = vmatpush2.bf16.msra.mxu1 %v8708_v31  ;;  %2590 = vmatpush2.bf16.msra.mxu0 %v8711_v32  ;;  %v8780_v31 = vld [vmem:[%s12013_s23 + $0x55c] ss:$12 sps:$4 sm:$0xff]  }
 0x177   : > { %2548 = vmatprep.subr.bf16.mxu1 %v8716_v33  ;;  %2591 = vmatprep.subr.bf16.mxu0 %v8719_v34  ;;  %v8783_v32 = vld [vmem:[%s12013_s23 + $0x73c] ss:$12 sps:$4 sm:$0xff]   ;;  %v8778_v33 = vld [vmem:[%s12013_s23 + $0x558] ss:$12 sps:$4 sm:$0xff]  }
 0x178   : > { %v8781_v34 = vld [vmem:[%s12013_s23 + $0x738] ss:$12 sps:$4 sm:$0xff]  }
 0x17a   : > { %2549 = vmatpush2.bf16.msra.mxu1 %v8714_v35  ;;  %2592 = vmatpush2.bf16.msra.mxu0 %v8717_v36  ;;  %v8786_v35 = vld [vmem:[%s12013_s23 + $0x544] ss:$12 sps:$4 sm:$0xff]  }
 0x17b   : > { %2550 = vmatprep.subr.bf16.mxu1 %v8722_v37  ;;  %2593 = vmatprep.subr.bf16.mxu0 %v8725_v38  ;;  %v8789_v36 = vld [vmem:[%s12013_s23 + $0x724] ss:$12 sps:$4 sm:$0xff]   ;;  %v8784_v37 = vld [vmem:[%s12013_s23 + $0x540] ss:$12 sps:$4 sm:$0xff]  }
 0x17c   : > { %v8787_v38 = vld [vmem:[%s12013_s23 + $0x720] ss:$12 sps:$4 sm:$0xff]  }
 0x17e   : > { %2551 = vmatpush2.bf16.msra.mxu1 %v8720_v39  ;;  %2594 = vmatpush2.bf16.msra.mxu0 %v8723_v40  ;;  %v8792_v39 = vld [vmem:[%s12013_s23 + $0x6ac] ss:$12 sps:$4 sm:$0xff]  }
 0x17f   : > { %8172 = vmatprep.subr.bf16.mxu1 %v8726_v41  ;;  %2647 = vmatprep.subr.bf16.mxu0 %v9400_v2  ;;  %v8795_v40 = vld [vmem:[%s12013_s23 + $0x70c] ss:$12 sps:$4 sm:$0xff]   ;;  %v8790_v41 = vld [vmem:[%s12013_s23 + $0x6a8] ss:$12 sps:$4 sm:$0xff]  }
 0x181   : > { %2553 = vmatmul.mubr.bf16.vlgmr.msra.gmra.mxu1 %v9872_v46  ;;  %2596 = vmatmul.mubr.bf16.vlgmr.msra.gmra.mxu0 %v9874_v47 }
 0x182   : > { %8173 = vmatpush3.bf16.msra.mxu1 %v8727_v42  ;;  %2638 = vmatprep.mubr.bf16.mxu1 %v9878_v50  ;;  %v8793_v42 = vld [vmem:[%s12013_s23 + $0x708] ss:$12 sps:$4 sm:$0xff]   ;;  %v8845_v50 = vld [vmem:[%s12013_s23 + $0x5c0] ss:$12 sps:$4 sm:$0xff]  }
 0x183   : > { %2648 = vmatpush1.bf16.msra.mxu0 %v8728_v43  ;;  %7329 = vmatprep.mubr.msk.bf16.mxu0 %vm1155_vm1, %v9880_v52  ;;  %v8798_v43 = vld [vmem:[%s12013_s23 + $0x694] ss:$12 sps:$4 sm:$0xff]  }
 0x184   : > { %8174 = vmatprep.subr.bf16.mxu1 %v8729_v44  ;;  %2649 = vmatprep.subr.bf16.mxu0 %v9400_v2  ;;  %v8801_v44 = vld [vmem:[%s12013_s23 + $0x6f4] ss:$12 sps:$4 sm:$0xff]  }
 0x185   : > { %v8847_v52 = vld [vmem:[%s12013_s23 + $0x668] ss:$12 sps:$4 sm:$0xff]  }
 0x186   : > { %8175 = vmatpush3.bf16.msra.mxu1 %v8730_v45  ;;  %v8796_v45 = vld [vmem:[%s12013_s23 + $0x690] ss:$12 sps:$4 sm:$0xff]  }
 0x187   : > { %2650 = vmatpush1.bf16.msra.mxu0 %v8731_v48  ;;  %8176 = vmatprep.subr.bf16.mxu1 %v8732_v49  ;;  %v8799_v48 = vld [vmem:[%s12013_s23 + $0x6f0] ss:$12 sps:$4 sm:$0xff]  }
 0x188   : > { %2651 = vmatprep.subr.bf16.mxu0 %v9400_v2  ;;  %v8804_v49 = vld [vmem:[%s12013_s23 + $0x67c] ss:$12 sps:$4 sm:$0xff]  }
 0x18a   : > { %8177 = vmatpush3.bf16.msra.mxu1 %v8733_v51  ;;  %v8807_v51 = vld [vmem:[%s12013_s23 + $0x6dc] ss:$12 sps:$4 sm:$0xff]  }
 0x18b   : > { %2652 = vmatpush1.bf16.msra.mxu0 %v8734_v53  ;;  %8178 = vmatprep.subr.bf16.mxu1 %v8735_v54  ;;  %v8802_v53 = vld [vmem:[%s12013_s23 + $0x678] ss:$12 sps:$4 sm:$0xff]  }
 0x18c   : > { %2653 = vmatprep.subr.bf16.mxu0 %v9400_v2  ;;  %v8805_v54 = vld [vmem:[%s12013_s23 + $0x6d8] ss:$12 sps:$4 sm:$0xff]  }
 0x18e   : > { %8179 = vmatpush3.bf16.msra.mxu1 %v8736_v57  ;;  %v8810_v57 = vld [vmem:[%s12013_s23 + $0x664] ss:$12 sps:$4 sm:$0xff]  }
 0x18f   : > { %2654 = vmatpush1.bf16.msra.mxu0 %v8737_v59  ;;  %8180 = vmatprep.subr.bf16.mxu1 %v8738_v60  ;;  %v8813_v59 = vld [vmem:[%s12013_s23 + $0x6c4] ss:$12 sps:$4 sm:$0xff]   ;;  %v8808_v60 = vld [vmem:[%s12013_s23 + $0x660] ss:$12 sps:$4 sm:$0xff]  }
 0x190   : > { %2655 = vmatprep.subr.bf16.mxu0 %v9400_v2 }
 0x192   : > { %8181 = vmatpush3.bf16.msra.mxu1 %v8739_v61  ;;  %v8811_v61 = vld [vmem:[%s12013_s23 + $0x6c0] ss:$12 sps:$4 sm:$0xff]  }
 0x193   : > { %2656 = vmatpush1.bf16.msra.mxu0 %v8740_v62  ;;  %8182 = vmatprep.subr.bf16.mxu1 %v8741_v63  ;;  %v8816_v62 = vld [vmem:[%s12013_s23 + $0x64c] ss:$12 sps:$4 sm:$0xff]  }
 0x194   : > { %2657 = vmatprep.subr.bf16.mxu0 %v9400_v2  ;;  %v8819_v63 = vld [vmem:[%s12013_s23 + $0x7cc] ss:$12 sps:$4 sm:$0xff]  }
 0x196   : > { %8183 = vmatpush3.bf16.msra.mxu1 %v8742_v0  ;;  %v8814_v0 = vld [vmem:[%s12013_s23 + $0x648] ss:$12 sps:$4 sm:$0xff]  }
 0x197   : > { %2658 = vmatpush1.bf16.msra.mxu0 %v8743_v1  ;;  %8184 = vmatprep.subr.bf16.mxu1 %v8744_v3  ;;  %v8817_v1 = vld [vmem:[%s12013_s23 + $0x7c8] ss:$12 sps:$4 sm:$0xff]  }
 0x198   : > { %2659 = vmatprep.subr.bf16.mxu0 %v9400_v2  ;;  %v8822_v3 = vld [vmem:[%s12013_s23 + $0x634] ss:$12 sps:$4 sm:$0xff]  }
 0x19a   : > { %8185 = vmatpush3.bf16.msra.mxu1 %v8745_v4  ;;  %v8825_v4 = vld [vmem:[%s12013_s23 + $0x7b4] ss:$12 sps:$4 sm:$0xff]  }
 0x19b   : > { %2660 = vmatpush1.bf16.msra.mxu0 %v8746_v5  ;;  %8186 = vmatprep.subr.bf16.mxu1 %v8747_v6  ;;  %v8820_v5 = vld [vmem:[%s12013_s23 + $0x630] ss:$12 sps:$4 sm:$0xff]  }
 0x19c   : > { %2661 = vmatprep.subr.bf16.mxu0 %v9400_v2  ;;  %v8823_v6 = vld [vmem:[%s12013_s23 + $0x7b0] ss:$12 sps:$4 sm:$0xff]  }
 0x19e   : > { %8187 = vmatpush3.bf16.msra.mxu1 %v8748_v7  ;;  %v8828_v7 = vld [vmem:[%s12013_s23 + $0x61c] ss:$12 sps:$4 sm:$0xff]  }
 0x19f   : > { %2662 = vmatpush1.bf16.msra.mxu0 %v8749_v8  ;;  %3263 = vmatprep.subr.bf16.mxu1 %v8752_v9  ;;  %v8831_v8 = vld [vmem:[%s12013_s23 + $0x79c] ss:$12 sps:$4 sm:$0xff]   ;;  %v8826_v9 = vld [vmem:[%s12013_s23 + $0x618] ss:$12 sps:$4 sm:$0xff]  }
 0x1a0   : > { %2671 = vmatprep.subr.bf16.mxu0 %v9400_v2 }
 0x1a1   : > { %2639 = vmatmul.mubr.bf16.vlgmr.msra.gmra.mxu1 %v9872_v46 }
 0x1a2   : > { %3264 = vmatpush1.bf16.msra.mxu1 %v8750_v10  ;;  %3295 = vmatprep.mubr.bf16.mxu1 %v2806_v13  ;;  %v8829_v10 = vld [vmem:[%s12013_s23 + $0x798] ss:$12 sps:$4 sm:$0xff]  }
 0x1a3   : > { %2672 = vmatpush2.bf16.msra.mxu0 %v8753_v11  ;;  %3265 = vmatprep.subr.bf16.mxu1 %v8756_v12  ;;  %v8834_v11 = vld [vmem:[%s12013_s23 + $0x604] ss:$12 sps:$4 sm:$0xff]  }
 0x1a4   : > { %2673 = vmatprep.subr.bf16.mxu0 %v9400_v2  ;;  %v8837_v12 = vld [vmem:[%s12013_s23 + $0x784] ss:$12 sps:$4 sm:$0xff]  }
 0x1a6   : > { %3266 = vmatpush1.bf16.msra.mxu1 %v8754_v14  ;;  %v8832_v14 = vld [vmem:[%s12013_s23 + $0x600] ss:$12 sps:$4 sm:$0xff]  }
 0x1a7   : > { %2674 = vmatpush2.bf16.msra.mxu0 %v8757_v15  ;;  %3267 = vmatprep.subr.bf16.mxu1 %v8760_v16  ;;  %v8835_v15 = vld [vmem:[%s12013_s23 + $0x780] ss:$12 sps:$4 sm:$0xff]   ;;  %v8838_v16 = vld [vmem:[%s12013_s23 + $0x6b0] ss:$12 sps:$4 sm:$0xff]  }
 0x1a8   : > { %2675 = vmatprep.subr.bf16.mxu0 %v9400_v2 }
 0x1aa   : > { %3268 = vmatpush1.bf16.msra.mxu1 %v8758_v17  ;;  %v8839_v17 = vld [vmem:[%s12013_s23 + $0x5f0] ss:$12 sps:$4 sm:$0xff]  }
 0x1ab   : > { %2676 = vmatpush2.bf16.msra.mxu0 %v8761_v18  ;;  %3269 = vmatprep.subr.bf16.mxu1 %v8764_v19  ;;  %v2805_v18 = vrot.slane %v9872_v46, 1  ;;  %v8840_v19 = vld [vmem:[%s12013_s23 + $0x770] ss:$12 sps:$4 sm:$0xff]  }
 0x1ac   : > { %2677 = vmatprep.subr.bf16.mxu0 %v9400_v2 }
 0x1ae   : > { %3270 = vmatpush1.bf16.msra.mxu1 %v8762_v20  ;;  %v2807_v20 = vrot.slane %v9874_v47, 1 }
 0x1af   : > { %2678 = vmatpush2.bf16.msra.mxu0 %v8765_v21  ;;  %3271 = vmatprep.subr.bf16.mxu1 %v8768_v22  ;;  %v8841_v21 = vld [vmem:[%s12013_s23 + $0x698] ss:$12 sps:$4 sm:$0xff]  }
 0x1b0   : > { %3306 = vmatprep.subr.bf16.mxu0 %v8771_v23  ;;  %v8842_v22 = vld [vmem:[%s12013_s23 + $0x5d8] ss:$12 sps:$4 sm:$0xff]  }
 0x1b1   : > { %v8843_v23 = vld [vmem:[%s12013_s23 + $0x758] ss:$12 sps:$4 sm:$0xff]  }
 0x1b2   : > { %2680 = vmatmul.mubr.bf16.vlgmr.msra.gmra.mxu0 %v9874_v47  ;;  %3272 = vmatpush1.bf16.msra.mxu1 %v8766_v24  ;;  %v8844_v24 = vld [vmem:[%s12013_s23 + $0x680] ss:$12 sps:$4 sm:$0xff]   ;;  %v8884_v47 = vld [vmem:[%s11967_s5 + $0x258] ss:$12 sps:$4 sm:$0xff]  }
 0x1b3   : > { %3307 = vmatpush1.bf16.msra.mxu0 %v8769_v25  ;;  %7526 = vmatprep.mubr.msk.bf16.mxu0 %vm1155_vm1, %v2808_v28  ;;  %v8848_v25 = vld [vmem:[%s12013_s23 + $0x5a8] ss:$12 sps:$4 sm:$0xff]  }
 0x1b4   : > { %3273 = vmatprep.subr.bf16.mxu1 %v8774_v26  ;;  %3308 = vmatprep.subr.bf16.mxu0 %v8777_v27  ;;  %v8849_v26 = vld [vmem:[%s12013_s23 + $0x728] ss:$12 sps:$4 sm:$0xff]   ;;  %v8850_v27 = vld [vmem:[%s12013_s23 + $0x650] ss:$12 sps:$4 sm:$0xff]  }
 0x1b6   : > { %3274 = vmatpush1.bf16.msra.mxu1 %v8772_v29  ;;  %v8852_v29 = vld [vmem:[%s12013_s23 + $0x710] ss:$12 sps:$4 sm:$0xff]  }
 0x1b7   : > { %3309 = vmatpush1.bf16.msra.mxu0 %v8775_v30  ;;  %3275 = vmatprep.subr.bf16.mxu1 %v8780_v31  ;;  %v8853_v30 = vld [vmem:[%s12013_s23 + $0x638] ss:$12 sps:$4 sm:$0xff]  }
 0x1b8   : > { %3310 = vmatprep.subr.bf16.mxu0 %v8783_v32  ;;  %v8854_v31 = vld [vmem:[%s12013_s23 + $0x578] ss:$12 sps:$4 sm:$0xff]  }
 0x1ba   : > { %3276 = vmatpush1.bf16.msra.mxu1 %v8778_v33  ;;  %v8855_v33 = vld [vmem:[%s12013_s23 + $0x6f8] ss:$12 sps:$4 sm:$0xff]  }
 0x1bb   : > { %3311 = vmatpush1.bf16.msra.mxu0 %v8781_v34  ;;  %3277 = vmatprep.subr.bf16.mxu1 %v8786_v35  ;;  %v8856_v34 = vld [vmem:[%s12013_s23 + $0x620] ss:$12 sps:$4 sm:$0xff]  }
 0x1bc   : > { %3312 = vmatprep.subr.bf16.mxu0 %v8789_v36  ;;  %v8857_v35 = vld [vmem:[%s12013_s23 + $0x560] ss:$12 sps:$4 sm:$0xff]  }
 0x1be   : > { %3278 = vmatpush1.bf16.msra.mxu1 %v8784_v37  ;;  %v8858_v37 = vld [vmem:[%s12013_s23 + $0x6e0] ss:$12 sps:$4 sm:$0xff]  }
 0x1bf   : > { %3313 = vmatpush1.bf16.msra.mxu0 %v8787_v38  ;;  %3279 = vmatprep.subr.bf16.mxu1 %v8792_v39  ;;  %v8859_v38 = vld [vmem:[%s12013_s23 + $0x608] ss:$12 sps:$4 sm:$0xff]  }
 0x1c0   : > { %3314 = vmatprep.subr.bf16.mxu0 %v8795_v40  ;;  %v8860_v39 = vld [vmem:[%s12013_s23 + $0x548] ss:$12 sps:$4 sm:$0xff]  }
 0x1c2   : > { %3280 = vmatpush2.bf16.msra.mxu1 %v8790_v41  ;;  %v8861_v41 = vld [vmem:[%s12013_s23 + $0x6c8] ss:$12 sps:$4 sm:$0xff]  }
 0x1c3   : > { %3315 = vmatpush1.bf16.msra.mxu0 %v8793_v42  ;;  %3281 = vmatprep.subr.bf16.mxu1 %v8798_v43  ;;  %v8868_v42 = vld [vmem:[%s11967_s5 + $0x2ec] ss:$12 sps:$4 sm:$0xff]   ;;  %v8866_v43 = vld [vmem:[%s11967_s5 + $0x2e8] ss:$12 sps:$4 sm:$0xff]  }
 0x1c4   : > { %3316 = vmatprep.subr.bf16.mxu0 %v8801_v44 }
 0x1c6   : > { %3282 = vmatpush2.bf16.msra.mxu1 %v8796_v45  ;;  %v8862_v45 = vld [vmem:[%s12013_s23 + $0x7d0] ss:$12 sps:$4 sm:$0xff]  }
 0x1c7   : > { %3317 = vmatpush1.bf16.msra.mxu0 %v8799_v48  ;;  %3283 = vmatprep.subr.bf16.mxu1 %v8804_v49  ;;  %v8871_v48 = vld [vmem:[%s11967_s5 + $0x2d4] ss:$12 sps:$4 sm:$0xff]  }
 0x1c8   : > { %3318 = vmatprep.subr.bf16.mxu0 %v8807_v51  ;;  %v8869_v51 = vld [vmem:[%s11967_s5 + $0x2d0] ss:$12 sps:$4 sm:$0xff]  }
 0x1ca   : > { %3284 = vmatpush2.bf16.msra.mxu1 %v8802_v53 }
 0x1cb   : > { %3319 = vmatpush1.bf16.msra.mxu0 %v8805_v54  ;;  %3285 = vmatprep.subr.bf16.mxu1 %v8810_v57  ;;  %v8863_v57 = vld [vmem:[%s12013_s23 + $0x7b8] ss:$12 sps:$4 sm:$0xff]  }
 0x1cc   : > { %3320 = vmatprep.subr.bf16.mxu0 %v8813_v59  ;;  %v8874_v59 = vld [vmem:[%s11967_s5 + $0x2bc] ss:$12 sps:$4 sm:$0xff]  }
 0x1ce   : > { %3286 = vmatpush2.bf16.msra.mxu1 %v8808_v60 }
 0x1cf   : > { %3321 = vmatpush1.bf16.msra.mxu0 %v8811_v61  ;;  %3287 = vmatprep.subr.bf16.mxu1 %v8816_v62  ;;  %v8872_v61 = vld [vmem:[%s11967_s5 + $0x2b8] ss:$12 sps:$4 sm:$0xff]  }
 0x1d0   : > { %3330 = vmatprep.subr.bf16.mxu0 %v8819_v63 }
 0x1d2   : > { %3288 = vmatpush2.bf16.msra.mxu1 %v8814_v0  ;;  %v8864_v0 = vld [vmem:[%s12013_s23 + $0x7a0] ss:$12 sps:$4 sm:$0xff]  }
 0x1d3   : > { %3331 = vmatpush2.bf16.msra.mxu0 %v8817_v1  ;;  %3289 = vmatprep.subr.bf16.mxu1 %v8822_v3  ;;  %v8877_v1 = vld [vmem:[%s11967_s5 + $0x2a4] ss:$12 sps:$4 sm:$0xff]  }
 0x1d4   : > { %3332 = vmatprep.subr.bf16.mxu0 %v8825_v4  ;;  %v8875_v4 = vld [vmem:[%s11967_s5 + $0x2a0] ss:$12 sps:$4 sm:$0xff]  }
 0x1d6   : > { %3290 = vmatpush2.bf16.msra.mxu1 %v8820_v5 }
 0x1d7   : > { %3333 = vmatpush2.bf16.msra.mxu0 %v8823_v6  ;;  %3291 = vmatprep.subr.bf16.mxu1 %v8828_v7  ;;  %v8865_v6 = vld [vmem:[%s12013_s23 + $0x788] ss:$12 sps:$4 sm:$0xff]   ;;  %v8880_v7 = vld [vmem:[%s11967_s5 + $0x28c] ss:$12 sps:$4 sm:$0xff]  }
 0x1d8   : > { %3334 = vmatprep.subr.bf16.mxu0 %v8831_v8  ;;  %v8878_v8 = vld [vmem:[%s11967_s5 + $0x288] ss:$12 sps:$4 sm:$0xff]  }
 0x1da   : > { %3292 = vmatpush2.bf16.msra.mxu1 %v8826_v9 }
 0x1db   : > { %3335 = vmatpush2.bf16.msra.mxu0 %v8829_v10  ;;  %3293 = vmatprep.subr.bf16.mxu1 %v8834_v11  ;;  %v8883_v10 = vld [vmem:[%s11967_s5 + $0x274] ss:$12 sps:$4 sm:$0xff]  }
 0x1dc   : > { %3336 = vmatprep.subr.bf16.mxu0 %v8837_v12 }
 0x1de   : > { %3294 = vmatpush2.bf16.msra.mxu1 %v8832_v14  ;;  %v8881_v14 = vld [vmem:[%s11967_s5 + $0x270] ss:$12 sps:$4 sm:$0xff]  }
 0x1df   : > { %3337 = vmatpush2.bf16.msra.mxu0 %v8835_v15  ;;  %8194 = vmatprep.subr.bf16.mxu1 %v8838_v16  ;;  %v8886_v16 = vld [vmem:[%s11967_s5 + $0x25c] ss:$12 sps:$4 sm:$0xff]  }
 0x1e0   : > { %3390 = vmatprep.subr.bf16.mxu0 %v9400_v2 }
 0x1e1   : > { %3296 = vmatmul.mubr.bf16.vlgmr.msra.gmra.mxu1 %v2805_v18  ;;  %v10510_v32 = vpop.f32.mrf.mxu1  ;;  %v10560_v53 = vpop.f32.mrf.mxu0 }
 0x1e2   : > { %3339 = vmatmul.mubr.bf16.vlgmr.msra.gmra.mxu0 %v2807_v20  ;;  %8195 = vmatpush3.bf16.msra.mxu1 %v8839_v17 }
 0x1e3   : > { %3381 = vmatprep.mubr.bf16.mxu1 %v2806_v13  ;;  %3391 = vmatpush1.bf16.msra.mxu0 %v8840_v19  ;;  %v8846_v13 = vld [vmem:[%s12013_s23 + $0x740] ss:$12 sps:$4 sm:$0xff]   ;;  %v10522_v36 = vpop.f32.mrf.mxu1  ;;  %v10572_v62 = vpop.f32.mrf.mxu0 }
 0x1e4   : > { %7527 = vmatprep.mubr.msk.bf16.mxu0 %vm1155_vm1, %v2808_v28  ;;  %8196 = vmatprep.subr.bf16.mxu1 %v8841_v21  ;;  %v8851_v28 = vld [vmem:[%s12013_s23 + $0x590] ss:$12 sps:$4 sm:$0xff]   ;;  %v8887_v21 = vld [vmem:[%s11967_s5 + $0x240] ss:$12 sps:$4 sm:$0xff]  }
 0x1e5   : > { %3392 = vmatprep.subr.bf16.mxu0 %v9400_v2  ;;  %v10534_v40 = vpop.f32.mrf.mxu1  ;;  %v10584_v5 = vpop.f32.mrf.mxu0 }
 0x1e6   : > { %8197 = vmatpush3.bf16.msra.mxu1 %v8842_v22  ;;  %v8892_v22 = vld [vmem:[%s11967_s5 + $0x3ac] ss:$12 sps:$4 sm:$0xff]  }
 0x1e7   : > { %3393 = vmatpush1.bf16.msra.mxu0 %v8843_v23  ;;  %8198 = vmatprep.subr.bf16.mxu1 %v8844_v24  ;;  %v10546_v44 = vpop.f32.mrf.mxu1  ;;  %v10596_v9 = vpop.f32.mrf.mxu0  ;;  %v8890_v23 = vld [vmem:[%s11967_s5 + $0x3a8] ss:$12 sps:$4 sm:$0xff]  }
 0x1e8   : > { %3394 = vmatprep.subr.bf16.mxu0 %v9400_v2  ;;  %v8895_v24 = vld [vmem:[%s11967_s5 + $0x394] ss:$12 sps:$4 sm:$0xff]  }
 0x1ea   : > { %8199 = vmatpush3.bf16.msra.mxu1 %v8845_v50  ;;  %v8893_v50 = vld [vmem:[%s11967_s5 + $0x390] ss:$12 sps:$4 sm:$0xff]  }
 0x1eb   : > { %3395 = vmatpush1.bf16.msra.mxu0 %v8846_v13  ;;  %8200 = vmatprep.subr.bf16.mxu1 %v8847_v52  ;;  %v8898_v13 = vld [vmem:[%s11967_s5 + $0x37c] ss:$12 sps:$4 sm:$0xff]   ;;  %v8896_v52 = vld [vmem:[%s11967_s5 + $0x378] ss:$12 sps:$4 sm:$0xff]  }
 0x1ec   : > { %3396 = vmatprep.subr.bf16.mxu0 %v9400_v2 }
 0x1ee   : > { %8201 = vmatpush3.bf16.msra.mxu1 %v8848_v25  ;;  %v8901_v25 = vld [vmem:[%s11967_s5 + $0x364] ss:$12 sps:$4 sm:$0xff]  }
 0x1ef   : > { %3397 = vmatpush1.bf16.msra.mxu0 %v8849_v26  ;;  %8202 = vmatprep.subr.bf16.mxu1 %v8850_v27  ;;  %v8899_v26 = vld [vmem:[%s11967_s5 + $0x360] ss:$12 sps:$4 sm:$0xff]  }
 0x1f0   : > { %3398 = vmatprep.subr.bf16.mxu0 %v9400_v2  ;;  %v8904_v27 = vld [vmem:[%s11967_s5 + $0x34c] ss:$12 sps:$4 sm:$0xff]  }
 0x1f2   : > { %8203 = vmatpush3.bf16.msra.mxu1 %v8851_v28  ;;  %v8902_v28 = vld [vmem:[%s11967_s5 + $0x348] ss:$12 sps:$4 sm:$0xff]  }
 0x1f3   : > { %3399 = vmatpush1.bf16.msra.mxu0 %v8852_v29  ;;  %8204 = vmatprep.subr.bf16.mxu1 %v8853_v30  ;;  %v8907_v29 = vld [vmem:[%s11967_s5 + $0x334] ss:$12 sps:$4 sm:$0xff]   ;;  %v8905_v30 = vld [vmem:[%s11967_s5 + $0x330] ss:$12 sps:$4 sm:$0xff]  }
 0x1f4   : > { %3400 = vmatprep.subr.bf16.mxu0 %v9400_v2 }
 0x1f6   : > { %8205 = vmatpush3.bf16.msra.mxu1 %v8854_v31  ;;  %v8910_v31 = vld [vmem:[%s11967_s5 + $0x31c] ss:$12 sps:$4 sm:$0xff]  }
 0x1f7   : > { %3401 = vmatpush1.bf16.msra.mxu0 %v8855_v33  ;;  %8206 = vmatprep.subr.bf16.mxu1 %v8856_v34  ;;  %v8908_v33 = vld [vmem:[%s11967_s5 + $0x318] ss:$12 sps:$4 sm:$0xff]  }
 0x1f8   : > { %3402 = vmatprep.subr.bf16.mxu0 %v9400_v2  ;;  %v8913_v34 = vld [vmem:[%s11967_s5 + $0x304] ss:$12 sps:$4 sm:$0xff]  }
 0x1fa   : > { %8207 = vmatpush3.bf16.msra.mxu1 %v8857_v35  ;;  %v8911_v35 = vld [vmem:[%s11967_s5 + $0x300] ss:$12 sps:$4 sm:$0xff]  }
 0x1fb   : > { %3403 = vmatpush1.bf16.msra.mxu0 %v8858_v37  ;;  %8208 = vmatprep.subr.bf16.mxu1 %v8859_v38  ;;  %v8914_v37 = vld [vmem:[%s11967_s5 + $0x468] ss:$12 sps:$4 sm:$0xff]   ;;  %v8916_v38 = vld [vmem:[%s11967_s5 + $0x46c] ss:$12 sps:$4 sm:$0xff]  }
 0x1fc   : > { %3404 = vmatprep.subr.bf16.mxu0 %v9400_v2 }
 0x1fe   : > { %8209 = vmatpush3.bf16.msra.mxu1 %v8860_v39  ;;  %v9401_v39 = vmov 0.0  }
 0x1ff   : > { %3405 = vmatpush1.bf16.msra.mxu0 %v8861_v41  ;;  %4101 = vmatprep.subr.bf16.mxu1 %v8868_v42  ;;  %v8918_v41 = vld [vmem:[%s11967_s5 + $0x450] ss:$12 sps:$4 sm:$0xff]   ;;  %v8920_v42 = vld [vmem:[%s11967_s5 + $0x454] ss:$12 sps:$4 sm:$0xff]  }
 0x200   : > { %3414 = vmatprep.subr.bf16.mxu0 %v9400_v2 }
 0x201   : > { %v8166_v49 = vpop.f32.mrf.mxu1  ;;  %3382 = vmatmul.mubr.bf16.vlgmr.msra.gmra.mxu1 %v2805_v18 }
 0x202   : > { %4102 = vmatpush1.bf16.msra.mxu1 %v8866_v43  ;;  %v8924_v43 = vld [vmem:[%s11967_s5 + $0x43c] ss:$12 sps:$4 sm:$0xff]  }
 0x203   : > { %3415 = vmatpush2.bf16.msra.mxu0 %v8862_v45  ;;  %v8167_v54 = vpop.f32.mrf.mxu1  ;;  %4103 = vmatprep.subr.bf16.mxu1 %v8871_v48  ;;  %v8922_v45 = vld [vmem:[%s11967_s5 + $0x438] ss:$12 sps:$4 sm:$0xff]  }
 0x204   : > { %v8168_v46 = vadd.f32 %v8167_v54, %v8166_v49  ;;  %3416 = vmatprep.subr.bf16.mxu0 %v9400_v2  ;;  %v8928_v49 = vld [vmem:[%s11967_s5 + $0x424] ss:$12 sps:$4 sm:$0xff]  }
 0x205   : > { %v8169_v60 = vpop.f32.mrf.mxu1 }
 0x206   : > { %4104 = vmatpush1.bf16.msra.mxu1 %v8869_v51  ;;  %v8926_v51 = vld [vmem:[%s11967_s5 + $0x420] ss:$12 sps:$4 sm:$0xff]  }
 0x207   : > { %3417 = vmatpush2.bf16.msra.mxu0 %v8863_v57  ;;  %v8170_v63 = vpop.f32.mrf.mxu1  ;;  %4105 = vmatprep.subr.bf16.mxu1 %v8874_v59  ;;  %v8932_v57 = vld [vmem:[%s11967_s5 + $0x40c] ss:$12 sps:$4 sm:$0xff]   ;;  %v8930_v59 = vld [vmem:[%s11967_s5 + $0x408] ss:$12 sps:$4 sm:$0xff]  }
 0x208   : > { %v8171_v3 = vadd.f32 %v8170_v63, %v8169_v60  ;;  %3418 = vmatprep.subr.bf16.mxu0 %v9400_v2  ;;  %v8936_v60 = vld [vmem:[%s11967_s5 + $0x3f4] ss:$12 sps:$4 sm:$0xff]   ;;  %v8938_v63 = vld [vmem:[%s11967_s5 + $0x3d8] ss:$12 sps:$4 sm:$0xff]  }
 0x20a   : > { %4106 = vmatpush1.bf16.msra.mxu1 %v8872_v61  ;;  %v8934_v61 = vld [vmem:[%s11967_s5 + $0x3f0] ss:$12 sps:$4 sm:$0xff]  }
 0x20b   : > { %3419 = vmatpush2.bf16.msra.mxu0 %v8864_v0  ;;  %4107 = vmatprep.subr.bf16.mxu1 %v8877_v1  ;;  %v8940_v0 = vld [vmem:[%s11967_s5 + $0x3dc] ss:$12 sps:$4 sm:$0xff]  }
 0x20c   : > { %3420 = vmatprep.subr.bf16.mxu0 %v9400_v2 }
 0x20e   : > { %4108 = vmatpush1.bf16.msra.mxu1 %v8875_v4 }
 0x20f   : > { %3421 = vmatpush2.bf16.msra.mxu0 %v8865_v6  ;;  %4109 = vmatprep.subr.bf16.mxu1 %v8880_v7  ;;  %v8942_v6 = vld [vmem:[%s11967_s5 + $0x3c0] ss:$12 sps:$4 sm:$0xff]  }
 0x210   : > { %4144 = vmatprep.subr.bf16.mxu0 %v8916_v38 }
 0x211   : > { %v2063_v11 = vpop.f32.mrf.mxu0 }
 0x212   : > { %v10601_v12 = vadd.f32 %v8168_v46, %v2063_v11  ;;  %3423 = vmatmul.mubr.bf16.vlgmr.msra.gmra.mxu0 %v2807_v20  ;;  %4110 = vmatpush1.bf16.msra.mxu1 %v8878_v8  ;;  %v8889_v20 = vld [vmem:[%s11967_s5 + $0x244] ss:$12 sps:$4 sm:$0xff]  }
 0x213   : > { %v2065_v15 = vpop.f32.mrf.mxu0  ;;  %4111 = vmatprep.subr.bf16.mxu1 %v8883_v10  ;;  %4176 = vmatprep.mubr.bf16.mxu0 %v9400_v2  ;;  %v8946_v8 = vld [vmem:[%s11967_s5 + $0x3b0] ss:$12 sps:$4 sm:$0xff]  }
 0x214   : > { %4145 = vmatpush1.bf16.msra.mxu0 %v8914_v37 }
 0x215   : > { %v2066_v17 = vpop.f32.mrf.mxu0  ;;  %4146 = vmatprep.subr.bf16.mxu0 %v8920_v42 }
 0x216   : > { %v10612_v18 = vadd.f32 %v8171_v3, %v2066_v17  ;;  %4112 = vmatpush1.bf16.msra.mxu1 %v8881_v14  ;;  %v8944_v3 = vld [vmem:[%s11967_s5 + $0x3c4] ss:$12 sps:$4 sm:$0xff]  }
 0x217   : > { %v2068_v19 = vpop.f32.mrf.mxu0  ;;  %4113 = vmatprep.subr.bf16.mxu1 %v8886_v16 }
 0x218   : > { %4147 = vmatpush1.bf16.msra.mxu0 %v8918_v41 }
 0x219   : > { %4148 = vmatprep.subr.bf16.mxu0 %v8924_v43 }
 0x21a   : > { %4114 = vmatpush1.bf16.msra.mxu1 %v8884_v47 }
 0x21b   : > { %4115 = vmatprep.subr.bf16.mxu1 %v8889_v20 }
 0x21c   : > { %4149 = vmatpush1.bf16.msra.mxu0 %v8922_v45 }
 0x21d   : > { %4150 = vmatprep.subr.bf16.mxu0 %v8928_v49 }
 0x21e   : > { %4116 = vmatpush1.bf16.msra.mxu1 %v8887_v21 }
 0x21f   : > { %4117 = vmatprep.subr.bf16.mxu1 %v8892_v22 }
 0x220   : > { %4151 = vmatpush1.bf16.msra.mxu0 %v8926_v51 }
 0x221   : > { %4152 = vmatprep.subr.bf16.mxu0 %v8932_v57 }
 0x222   : > { %4118 = vmatpush2.bf16.msra.mxu1 %v8890_v23 }
 0x223   : > { %4119 = vmatprep.subr.bf16.mxu1 %v8895_v24 }
 0x224   : > { %4153 = vmatpush1.bf16.msra.mxu0 %v8930_v59 }
 0x225   : > { %4154 = vmatprep.subr.bf16.mxu0 %v8936_v60 }
 0x226   : > { %4120 = vmatpush2.bf16.msra.mxu1 %v8893_v50 }
 0x227   : > { %4121 = vmatprep.subr.bf16.mxu1 %v8898_v13 }
 0x228   : > { %4155 = vmatpush1.bf16.msra.mxu0 %v8934_v61 }
 0x229   : > { %4156 = vmatprep.subr.bf16.mxu0 %v8940_v0 }
 0x22a   : > { %4122 = vmatpush2.bf16.msra.mxu1 %v8896_v52 }
 0x22b   : > { %4123 = vmatprep.subr.bf16.mxu1 %v8901_v25  ;;  %v1980_v25 = vadd.f32 %v10510_v32, %v10560_v53 }
 0x22c   : > { %4157 = vmatpush1.bf16.msra.mxu0 %v8938_v63 }
 0x22d   : > { %4158 = vmatprep.subr.bf16.mxu0 %v8944_v3 }
 0x22e   : > { %4124 = vmatpush2.bf16.msra.mxu1 %v8899_v26  ;;  %v1982_v26 = vadd.f32 %v10522_v36, %v10572_v62 }
 0x22f   : > { %4125 = vmatprep.subr.bf16.mxu1 %v8904_v27 }
 0x230   : > { %4159 = vmatpush1.bf16.msra.mxu0 %v8942_v6 }
 0x231   : > { %8216 = vmatprep.subr.bf16.mxu0 %v8946_v8 }
 0x232   : > { %4126 = vmatpush2.bf16.msra.mxu1 %v8902_v28  ;;  %v1984_v28 = vadd.f32 %v10534_v40, %v10584_v5 }
 0x233   : > { %4127 = vmatprep.subr.bf16.mxu1 %v8907_v29 }
 0x236   : > { %4128 = vmatpush2.bf16.msra.mxu1 %v8905_v30  ;;  %v1986_v30 = vadd.f32 %v10546_v44, %v10596_v9 }
 0x237   : > { %4129 = vmatprep.subr.bf16.mxu1 %v8910_v31 }
 0x23a   : > { %4130 = vmatpush2.bf16.msra.mxu1 %v8908_v33 }
 0x23b   : > { %4131 = vmatprep.subr.bf16.mxu1 %v8913_v34 }
 0x23e   : > { %4132 = vmatpush2.bf16.msra.mxu1 %v8911_v35 }
 0x23f   : > { %8350 = vmatprep.subr.bf16.mxu1 %v9401_v39 }
 0x241   : > { %v2554_v48 = vpop.f32.mrf.mxu1  ;;  %v2597_v7 = vpop.f32.mrf.mxu0 }
 0x242   : > { %v2555_v27 = vadd.f32 %v2554_v48, %v1980_v25 }
 0x243   : > { %v2556_v54 = vpop.f32.mrf.mxu1  ;;  %v2599_v11 = vpop.f32.mrf.mxu0 }
 0x244   : > { %v2598_v33 = vadd.f32 %v2597_v7, %v2555_v27 }
 0x245   : > { %v2558_v46 = vpop.f32.mrf.mxu1  ;;  %v2601_v15 = vpop.f32.mrf.mxu0 }
 0x246   : > { %v2559_v32 = vadd.f32 %v2558_v46, %v1984_v28  ;;  %v8937_v28 = vld [vmem:[%s11967_s5 + $0x3f8] ss:$12 sps:$4 sm:$0xff]  }
 0x247   : > { %v2560_v1 = vpop.f32.mrf.mxu1  ;;  %v2603_v47 = vpop.f32.mrf.mxu0 }
 0x248   : > { %v2561_v38 = vadd.f32 %v2560_v1, %v1986_v30  ;;  %v2602_v43 = vadd.f32 %v2601_v15, %v2559_v32 }
 0x24a   : > { %v2604_v51 = vadd.f32 %v2603_v47, %v2561_v38 }
 0x261   : > { %v8188_v4 = vpop.f32.mrf.mxu1 }
 0x263   : > { %v8189_v10 = vpop.f32.mrf.mxu1 }
 0x264   : > { %v8190_v16 = vadd.f32 %v8189_v10, %v8188_v4 }
 0x265   : > { %v8191_v14 = vpop.f32.mrf.mxu1 }
 0x266   : > { %v2641_v20 = vadd.f32 %v8190_v16, %v10601_v12  ;;  %v10736_v12 = vld [vmem:[%s12015_s4] sm:$0x7]  ;;  %s11916_s4 = scalar_lea.hbm %s12017_s28, %s8146_s25 }
 0x267   : > { %v8192_v17 = vpop.f32.mrf.mxu1  ;;  %v3442_v36 = vrot.slane %v10736_v12, %v9859_v55  ;;  %v3446_v35 = vrot.slane %v10736_v12, %v9866_v58 }
 0x268   : > { %v8193_v19 = vadd.f32 %v8192_v17, %v8191_v14 }
 0x26a   : > { %v2644_v24 = vadd.f32 %v8193_v19, %v10612_v18  ;;  %v2557_v18 = vadd.f32 %v2556_v54, %v1982_v26  ;;  %v8933_v26 = vld [vmem:[%s11967_s5 + $0x410] ss:$12 sps:$4 sm:$0xff]  }
 0x26c   : > { %v2600_v37 = vadd.f32 %v2599_v11, %v2557_v18 }
 0x272   : > { %v2681_v21 = vpop.f32.mrf.mxu0 }
 0x273   : > { %v10724_v22 = vadd.f32 %v2681_v21, %v2641_v20  ;;  %v8917_v21 = vld [vmem:[%s11967_s5 + $0x470] ss:$12 sps:$4 sm:$0xff]  }
 0x274   : > { %v2683_v23 = vpop.f32.mrf.mxu0 }
 0x276   : > { %v2684_v50 = vpop.f32.mrf.mxu0 }
 0x277   : > { %v10727_v13 = vadd.f32 %v2684_v50, %v2644_v24  ;;  %v8921_v24 = vld [vmem:[%s11967_s5 + $0x458] ss:$12 sps:$4 sm:$0xff]   ;;  %v8925_v50 = vld [vmem:[%s11967_s5 + $0x440] ss:$12 sps:$4 sm:$0xff]  }
 0x278   : > { %v2686_v52 = vpop.f32.mrf.mxu0 }
 0x279   : > { %v8929_v52 = vld [vmem:[%s11967_s5 + $0x428] ss:$12 sps:$4 sm:$0xff]  }
 0x2a1   : > { %v3297_v29 = vpop.f32.mrf.mxu1 }
 0x2a2   : > { %v3340_v31 = vpop.f32.mrf.mxu0 }
 0x2a3   : > { %v3341_v53 = vadd.f32 %v3340_v31, %v3297_v29  ;;  %v3299_v62 = vpop.f32.mrf.mxu1  ;;  %v8941_v29 = vld [vmem:[%s11967_s5 + $0x3e0] ss:$12 sps:$4 sm:$0xff]  }
 0x2a4   : > { %v3342_v34 = vpop.f32.mrf.mxu0 }
 0x2a5   : > { %v3431_v40 = vadd.f32 %v3341_v53, %v2598_v33  ;;  %v3343_v5 = vadd.f32 %v3342_v34, %v3299_v62  ;;  %v3301_v41 = vpop.f32.mrf.mxu1  ;;  %v3450_v53 = vrot.slane %v10736_v12, %v9861_v56  ;;  %v8949_v34 = vld [vmem:[%s11967_s5 + $0x22c] ss:$12 sps:$4 sm:$0xff]  }
 0x2a6   : > { %v3344_v42 = vpop.f32.mrf.mxu0 }
 0x2a7   : > { %v3454_v44 = vadd.f32 %v3442_v36, %v3431_v40  ;;  %v3432_v9 = vadd.f32 %v3343_v5, %v2600_v37  ;;  %v3345_v45 = vadd.f32 %v3344_v42, %v3301_v41  ;;  %v3303_v48 = vpop.f32.mrf.mxu1 }
 0x2a8   : > { %v3346_v49 = vpop.f32.mrf.mxu0 }
 0x2a9   : > { %v3455_v54 = vadd.f32 %v3446_v35, %v3432_v9  ;;  %v3434_v57 = vadd.f32 %v3345_v45, %v2602_v43  ;;  %v3347_v59 = vadd.f32 %v3346_v49, %v3303_v48  ;;  %v3460_v46 = vmax.f32 %v3454_v44, 0.0 }
 0x2ab   : > { %v3461_v60 = vmax.f32 %v3455_v54, 0.0  ;;  %v3457_v61 = vadd.f32 %v3442_v36, %v3434_v57  ;;  %v3435_v63 = vadd.f32 %v3347_v59, %v2604_v51  ;;  %v8945_v36 = vld [vmem:[%s11967_s5 + $0x3c8] ss:$12 sps:$4 sm:$0xff]   ;;  %v8950_v57 = vld [vmem:[%s11967_s5 + $0x2f0] ss:$12 sps:$4 sm:$0xff]  }
 0x2ad   : > { %v3463_v0 = vmax.f32 %v3457_v61, 0.0  ;;  %v3458_v1 = vadd.f32 %v3446_v35, %v3435_v63  ;;  %v10746_v3 = vadd.f32 %v3461_v60, %v3460_v46  ;;  %v8952_v61 = vld [vmem:[%s11967_s5 + $0x210] ss:$12 sps:$4 sm:$0xff]   ;;  %v8955_v63 = vld [vmem:[%s11967_s5 + $0x2d8] ss:$12 sps:$4 sm:$0xff]  }
 0x2af   : > { %v10748_v4 = vpack.c.bf16 %v3463_v0, %v3460_v46  ;;  %v3464_v6 = vmax.f32 %v3458_v1, 0.0  ;;  %v3471_v10 = vsel %vm3470_vm4, %v3463_v0, 0.0  ;;  %v8951_v46 = vld [vmem:[%s11967_s5 + $0x398] ss:$12 sps:$4 sm:$0xff]   ;;  %v8956_v0 = vld [vmem:[%s11967_s5 + $0x380] ss:$12 sps:$4 sm:$0xff]  }
 0x2b0   : > { %v8959_v1 = vld [vmem:[%s11967_s5 + $0x1fc] ss:$12 sps:$4 sm:$0xff]  }
 0x2b1   : > { %v10750_v7 = vpack.c.bf16 %v3464_v6, %v3461_v60  ;;  %v3696_v8 = vshll.u32 %v10748_v4, 16  ;;  %v3472_v11 = vsel %vm3470_vm4, %v3464_v6, 0.0  ;;  %v3694_v19 = vshrl.u32 %v10748_v4, 16  ;;  %v8954_v60 = vld [vmem:[%s11967_s5 + $0x214] ss:$12 sps:$4 sm:$0xff]  }
 0x2b2   : > { %v3473_v14 = vadd.f32 %v3472_v11, %v3471_v10  ;;  %v8960_v6 = vld [vmem:[%s11967_s5 + $0x2c0] ss:$12 sps:$4 sm:$0xff]   ;;  %v8964_v10 = vld [vmem:[%s11967_s5 + $0x1e4] ss:$12 sps:$4 sm:$0xff]  }
 0x2b3   : > { %v3703_v15 = vshll.u32 %v10750_v7, 16  ;;  %v3698_v16 = vrot.slane %v3696_v8, 1  ;;  %v3701_v17 = vshrl.u32 %v10750_v7, 16  ;;  %v8961_v8 = vld [vmem:[%s11967_s5 + $0x368] ss:$12 sps:$4 sm:$0xff]  }
 0x2b4   : > { %v8962_v11 = vld [vmem:[%s11967_s5 + $0x1e0] ss:$12 sps:$4 sm:$0xff]  }
 0x2b5   : > { %v3705_v47 = vrot.slane %v3703_v15, 1  ;;  %v10763_v23 = vor.u32 %v3698_v16, %v3694_v19  ;;  %v8966_v15 = vld [vmem:[%s11967_s5 + $0x350] ss:$12 sps:$4 sm:$0xff]   ;;  %v8969_v16 = vld [vmem:[%s11967_s5 + $0x1cc] ss:$12 sps:$4 sm:$0xff]  }
 0x2b6   : > { %v8971_v19 = vld [vmem:[%s11967_s5 + $0x338] ss:$12 sps:$4 sm:$0xff]  }
 0x2b7   : > { %v10758_v20 = vor.u32 %v3705_v47, %v3701_v17  ;;  %v8967_v17 = vld [vmem:[%s11967_s5 + $0x1c8] ss:$12 sps:$4 sm:$0xff]   ;;  %v8970_v47 = vld [vmem:[%s11967_s5 + $0x290] ss:$12 sps:$4 sm:$0xff]  }
 0x2b9   : > { %4133 = vmatprep.mubr.bf16.mxu1 %v10758_v20 }
 0x2ba   : > { %4134 = vmatmul.mubr.bf16.vlgmr.msra.gmra.mxu1 %v10763_v23 }
 0x2bb   : > { %8351 = vmatpush3.bf16.msra.mxu1 %v8917_v21  ;;  %8366 = vmatprep.mubr.msk.bf16.mxu1 %vm9402_vm5, %v9401_v39  ;;  %v8972_v21 = vld [vmem:[%s11967_s5 + $0x1b0] ss:$12 sps:$4 sm:$0xff]  }
 0x2bc   : > { %8352 = vmatprep.subr.bf16.mxu1 %v9401_v39 }
 0x2bf   : > { %8353 = vmatpush3.bf16.msra.mxu1 %v8921_v24  ;;  %v8975_v24 = vld [vmem:[%s11967_s5 + $0x278] ss:$12 sps:$4 sm:$0xff]  }
 0x2c0   : > { %8354 = vmatprep.subr.bf16.mxu1 %v9401_v39 }
 0x2c1   : > { %v8210_v25 = vpop.f32.mrf.mxu1 }
 0x2c3   : > { %8355 = vmatpush3.bf16.msra.mxu1 %v8925_v50  ;;  %v8211_v27 = vpop.f32.mrf.mxu1  ;;  %v8976_v50 = vld [vmem:[%s11967_s5 + $0x320] ss:$12 sps:$4 sm:$0xff]  }
 0x2c4   : > { %8356 = vmatprep.subr.bf16.mxu1 %v9401_v39  ;;  %v8212_v30 = vadd.f32 %v8211_v27, %v8210_v25  ;;  %v8977_v25 = vld [vmem:[%s11967_s5 + $0x198] ss:$12 sps:$4 sm:$0xff]   ;;  %v8981_v27 = vld [vmem:[%s11967_s5 + $0x308] ss:$12 sps:$4 sm:$0xff]  }
 0x2c5   : > { %v8213_v18 = vpop.f32.mrf.mxu1 }
 0x2c7   : > { %8357 = vmatpush3.bf16.msra.mxu1 %v8929_v52  ;;  %v8214_v31 = vpop.f32.mrf.mxu1  ;;  %v8979_v52 = vld [vmem:[%s11967_s5 + $0x19c] ss:$12 sps:$4 sm:$0xff]  }
 0x2c8   : > { %8358 = vmatprep.subr.bf16.mxu1 %v9401_v39  ;;  %v8215_v35 = vadd.f32 %v8214_v31, %v8213_v18  ;;  %v8982_v18 = vld [vmem:[%s11967_s5 + $0x180] ss:$12 sps:$4 sm:$0xff]   ;;  %v8989_v31 = vld [vmem:[%s11967_s5 + $0x170] ss:$12 sps:$4 sm:$0xff]  }
 0x2cb   : > { %8359 = vmatpush3.bf16.msra.mxu1 %v8933_v26  ;;  %v8980_v26 = vld [vmem:[%s11967_s5 + $0x260] ss:$12 sps:$4 sm:$0xff]  }
 0x2cc   : > { %8360 = vmatprep.subr.bf16.mxu1 %v9401_v39 }
 0x2cf   : > { %8361 = vmatpush3.bf16.msra.mxu1 %v8937_v28  ;;  %v8984_v28 = vld [vmem:[%s11967_s5 + $0x184] ss:$12 sps:$4 sm:$0xff]  }
 0x2d0   : > { %8362 = vmatprep.subr.bf16.mxu1 %v9401_v39 }
 0x2d2   : > { %v3424_v33 = vpop.f32.mrf.mxu0 }
 0x2d3   : > { %v3425_v32 = vadd.f32 %v8212_v30, %v3424_v33  ;;  %8363 = vmatpush3.bf16.msra.mxu1 %v8941_v29  ;;  %v8985_v29 = vld [vmem:[%s11967_s5 + $0x248] ss:$12 sps:$4 sm:$0xff]   ;;  %v8988_v30 = vld [vmem:[%s11967_s5 + $0xac] ss:$12 sps:$4 sm:$0xff]  }
 0x2d4   : > { %v3426_v62 = vpop.f32.mrf.mxu0  ;;  %8364 = vmatprep.subr.bf16.mxu1 %v9401_v39  ;;  %v8986_v33 = vld [vmem:[%s11967_s5 + $0xa8] ss:$12 sps:$4 sm:$0xff]  }
 0x2d5   : > { %v3433_v37 = vadd.f32 %v3425_v32, %v10724_v22  ;;  %v8990_v32 = vld [vmem:[%s11967_s5 + $0xb0] ss:$12 sps:$4 sm:$0xff]  }
 0x2d6   : > { %v3427_v38 = vpop.f32.mrf.mxu0  ;;  %v8991_v62 = vld [vmem:[%s11967_s5 + $0x90] ss:$12 sps:$4 sm:$0xff]  }
 0x2d7   : > { %v3428_v40 = vadd.f32 %v8215_v35, %v3427_v38  ;;  %v3456_v5 = vadd.f32 %v3450_v53, %v3433_v37  ;;  %8365 = vmatpush3.bf16.msra.mxu1 %v8945_v36  ;;  %v8994_v36 = vld [vmem:[%s11967_s5 + $0x158] ss:$12 sps:$4 sm:$0xff]   ;;  %v8999_v35 = vld [vmem:[%s11967_s5 + $0x140] ss:$12 sps:$4 sm:$0xff]  }
 0x2d8   : > { %v3429_v12 = vpop.f32.mrf.mxu0  ;;  %4696 = vmatprep.subr.bf16.mxu1 %v8949_v34  ;;  %v8995_v34 = vld [vmem:[%s11967_s5 + $0x98] ss:$12 sps:$4 sm:$0xff]   ;;  %v9000_v38 = vld [vmem:[%s11967_s5 + $0x80] ss:$12 sps:$4 sm:$0xff]  }
 0x2d9   : > { %v3436_v41 = vadd.f32 %v3428_v40, %v10727_v13  ;;  %v3462_v42 = vmax.f32 %v3456_v5, 0.0  ;;  %v8947_v13 = vld [vmem:[%s11967_s5 + $0x228] ss:$12 sps:$4 sm:$0xff]   ;;  %v8996_v37 = vld [vmem:[%s11967_s5 + $0x78] ss:$12 sps:$4 sm:$0xff]  }
 0x2da   : > { %v9003_v40 = vld [vmem:[%s11967_s5 + $0x64] ss:$12 sps:$4 sm:$0xff]   ;;  %v9004_v5 = vld [vmem:[%s11967_s5 + $0x128] ss:$12 sps:$4 sm:$0xff]   ;;  %v9001_v12 = vld [vmem:[%s11967_s5 + $0x60] ss:$12 sps:$4 sm:$0xff]  }
 0x2db   : > { %v3459_v43 = vadd.f32 %v3450_v53, %v3436_v41  ;;  %v3467_v44 = vadd.f32 %v10746_v3, %v3462_v42  ;;  %v8957_v3 = vld [vmem:[%s11967_s5 + $0x1f8] ss:$12 sps:$4 sm:$0xff]   ;;  %v8993_v53 = vld [vmem:[%s11967_s5 + $0x94] ss:$12 sps:$4 sm:$0xff]  }
 0x2dc   : > { %v9005_v41 = vld [vmem:[%s11967_s5 + $0x68] ss:$12 sps:$4 sm:$0xff]  }
 0x2dd   : > { %v3465_v9 = vmax.f32 %v3459_v43, 0.0  ;;  %3468 = vadd.xlane.f32.xlu1 %v3467_v44  ;;  %v9009_v43 = vld [vmem:[%s11967_s5 + $0x110] ss:$12 sps:$4 sm:$0xff]   ;;  %v9006_v44 = vld [vmem:[%s11967_s5 + $0x48] ss:$12 sps:$4 sm:$0xff]  }
 0x2df   : > { %v10805_v45 = vpack.c.bf16 %v3465_v9, %v3462_v42  ;;  %v3474_v48 = vsel %vm3470_vm4, %v3465_v9, 0.0  ;;  %v9008_v42 = vld [vmem:[%s11967_s5 + $0x4c] ss:$12 sps:$4 sm:$0xff]   ;;  %v9010_v9 = vld [vmem:[%s11967_s5 + $0x50] ss:$12 sps:$4 sm:$0xff]  }
 0x2e0   : > { %v3475_v49 = vadd.f32 %v3474_v48, %v3473_v14  ;;  %v8965_v14 = vld [vmem:[%s11967_s5 + $0x2a8] ss:$12 sps:$4 sm:$0xff]  }
 0x2e1   : > { %v3710_v22 = vshll.u32 %v10805_v45, 16  ;;  %v3708_v51 = vshrl.u32 %v10805_v45, 16  ;;  %v9013_v48 = vld [vmem:[%s11967_s5 + $0x34] ss:$12 sps:$4 sm:$0xff]  }
 0x2e2   : > { %3476 = vadd.xlane.f32.xlu1 %v3475_v49  ;;  %v9014_v49 = vld [vmem:[%s11967_s5 + $0xf8] ss:$12 sps:$4 sm:$0xff]  }
 0x2e3   : > { %v3712_v54 = vrot.slane %v3710_v22, 1  ;;  %v9011_v22 = vld [vmem:[%s11967_s5 + $0x30] ss:$12 sps:$4 sm:$0xff]  }
 0x2e5   : > { %v3713_v59 = vor.u32 %v3712_v54, %v3708_v51  ;;  %v9015_v51 = vld [vmem:[%s11967_s5 + $0x38] ss:$12 sps:$4 sm:$0xff]   ;;  %v9018_v54 = vld [vmem:[%s11967_s5 + $0x1c] ss:$12 sps:$4 sm:$0xff]  }
 0x2e7   : > { %4177 = vmatmul.mubr.bf16.vlgmr.msra.gmra.mxu0 %v3713_v59  ;;  %8367 = vmatmul.mubr.bf16.vlgmr.msra.gmra.mxu1 %v3713_v59  ;;  %v9020_v59 = vld [vmem:[%s11967_s5 + $0x20] ss:$12 sps:$4 sm:$0xff]  }
 0x2e8   : > { %8217 = vmatpush3.bf16.msra.mxu0 %v8950_v57  ;;  %4697 = vmatpush1.bf16.msra.mxu1 %v8947_v13  ;;  %v9019_v13 = vld [vmem:[%s11967_s5 + $0xe0] ss:$12 sps:$4 sm:$0xff]   ;;  %v9016_v57 = vld [vmem:[%s11967_s5 + $0x18] ss:$12 sps:$4 sm:$0xff]  }
 0x2e9   : > { %4219 = vmatprep.mubr.bf16.mxu0 %v10758_v20  ;;  %8218 = vmatprep.subr.bf16.mxu0 %v8951_v46  ;;  %v8974_v20 = vld [vmem:[%s11967_s5 + $0x1b4] ss:$12 sps:$4 sm:$0xff]   ;;  %v9023_v46 = vld [vmem:[%s11967_s5 + $0x4] ss:$12 sps:$4 sm:$0xff]  }
 0x2ea   : > { %4698 = vmatprep.subr.bf16.mxu1 %v8954_v60  ;;  %4728 = vmatprep.mubr.bf16.mxu1 %v9400_v2  ;;  %v9024_v60 = vld [vmem:[%s11967_s5 + $0xc8] ss:$12 sps:$4 sm:$0xff]  }
 0x2ec   : > { %8219 = vmatpush3.bf16.msra.mxu0 %v8955_v63  ;;  %4699 = vmatpush1.bf16.msra.mxu1 %v8952_v61  ;;  %v9021_v61 = vld [vmem:[%s11967_s5] ss:$12 sps:$4 sm:$0xff]   ;;  %v9025_v63 = vld [vmem:[%s11967_s5 + $0x8] ss:$12 sps:$4 sm:$0xff]  }
 0x2ed   : > { %8220 = vmatprep.subr.bf16.mxu0 %v8956_v0  ;;  %4700 = vmatprep.subr.bf16.mxu1 %v8959_v1  ;;  %v9028_v0 = vld [vmem:[%s11967_s5 + $0x16c] ss:$12 sps:$4 sm:$0xff]  }
 0x2ee   : > { %v9031_v1 = vld [vmem:[%s11967_s5 + $0x52c] ss:$12 sps:$4 sm:$0xff]  }
 0x2f0   : > { %8221 = vmatpush3.bf16.msra.mxu0 %v8960_v6  ;;  %4701 = vmatpush1.bf16.msra.mxu1 %v8957_v3  ;;  %v9026_v3 = vld [vmem:[%s11967_s5 + $0x168] ss:$12 sps:$4 sm:$0xff]  }
 0x2f1   : > { %8222 = vmatprep.subr.bf16.mxu0 %v8961_v8  ;;  %4702 = vmatprep.subr.bf16.mxu1 %v8964_v10  ;;  %v9029_v6 = vld [vmem:[%s11967_s5 + $0x528] ss:$12 sps:$4 sm:$0xff]  }
 0x2f2   : > { %v9034_v8 = vld [vmem:[%s11967_s5 + $0x154] ss:$12 sps:$4 sm:$0xff]  }
 0x2f3   : > { %v9037_v10 = vld [vmem:[%s11967_s5 + $0x514] ss:$12 sps:$4 sm:$0xff]  }
 0x2f4   : > { %8223 = vmatpush3.bf16.msra.mxu0 %v8965_v14  ;;  %4703 = vmatpush1.bf16.msra.mxu1 %v8962_v11  ;;  %v4922_v11 = vrot.slane %v10750_v7, 1  ;;  %v9032_v14 = vld [vmem:[%s11967_s5 + $0x150] ss:$12 sps:$4 sm:$0xff]  }
 0x2f5   : > { %8224 = vmatprep.subr.bf16.mxu0 %v8966_v15  ;;  %4704 = vmatprep.subr.bf16.mxu1 %v8969_v16  ;;  %v9035_v15 = vld [vmem:[%s11967_s5 + $0x510] ss:$12 sps:$4 sm:$0xff]  }
 0x2f6   : > { %v9040_v16 = vld [vmem:[%s11967_s5 + $0x13c] ss:$12 sps:$4 sm:$0xff]  }
 0x2f8   : > { %8225 = vmatpush3.bf16.msra.mxu0 %v8970_v47  ;;  %4705 = vmatpush1.bf16.msra.mxu1 %v8967_v17  ;;  %v9043_v17 = vld [vmem:[%s11967_s5 + $0x4fc] ss:$12 sps:$4 sm:$0xff]   ;;  %v9038_v47 = vld [vmem:[%s11967_s5 + $0x138] ss:$12 sps:$4 sm:$0xff]  }
 0x2f9   : > { %8226 = vmatprep.subr.bf16.mxu0 %v8971_v19  ;;  %4706 = vmatprep.subr.bf16.mxu1 %v8974_v20  ;;  %v9041_v19 = vld [vmem:[%s11967_s5 + $0x4f8] ss:$12 sps:$4 sm:$0xff]  }
 0x2fa   : > { %v9046_v20 = vld [vmem:[%s11967_s5 + $0x124] ss:$12 sps:$4 sm:$0xff]  }
 0x2fc   : > { %8227 = vmatpush3.bf16.msra.mxu0 %v8975_v24  ;;  %4707 = vmatpush1.bf16.msra.mxu1 %v8972_v21  ;;  %v9049_v21 = vld [vmem:[%s11967_s5 + $0x4e4] ss:$12 sps:$4 sm:$0xff]   ;;  %v9044_v24 = vld [vmem:[%s11967_s5 + $0x120] ss:$12 sps:$4 sm:$0xff]  }
 0x2fd   : > { %8228 = vmatprep.subr.bf16.mxu0 %v8976_v50  ;;  %4708 = vmatprep.subr.bf16.mxu1 %v8979_v52  ;;  %v9047_v50 = vld [vmem:[%s11967_s5 + $0x4e0] ss:$12 sps:$4 sm:$0xff]  }
 0x2fe   : > { %v9052_v52 = vld [vmem:[%s11967_s5 + $0x10c] ss:$12 sps:$4 sm:$0xff]  }
 0x300   : > { %8229 = vmatpush3.bf16.msra.mxu0 %v8980_v26  ;;  %4709 = vmatpush1.bf16.msra.mxu1 %v8977_v25  ;;  %v9055_v25 = vld [vmem:[%s11967_s5 + $0x4cc] ss:$12 sps:$4 sm:$0xff]   ;;  %v9050_v26 = vld [vmem:[%s11967_s5 + $0x108] ss:$12 sps:$4 sm:$0xff]  }
 0x301   : > { %8230 = vmatprep.subr.bf16.mxu0 %v8981_v27  ;;  %4710 = vmatprep.subr.bf16.mxu1 %v8984_v28  ;;  %v9053_v27 = vld [vmem:[%s11967_s5 + $0x4c8] ss:$12 sps:$4 sm:$0xff]  }
 0x302   : > { %v9058_v28 = vld [vmem:[%s11967_s5 + $0xf4] ss:$12 sps:$4 sm:$0xff]  }
 0x304   : > { %8231 = vmatpush3.bf16.msra.mxu0 %v8985_v29  ;;  %4711 = vmatpush1.bf16.msra.mxu1 %v8982_v18  ;;  %v9061_v18 = vld [vmem:[%s11967_s5 + $0x4b4] ss:$12 sps:$4 sm:$0xff]   ;;  %v9056_v29 = vld [vmem:[%s11967_s5 + $0xf0] ss:$12 sps:$4 sm:$0xff]  }
 0x305   : > { %4653 = vmatprep.subr.bf16.mxu0 %v8988_v30  ;;  %8247 = vmatprep.subr.bf16.mxu1 %v8989_v31  ;;  %v9059_v30 = vld [vmem:[%s11967_s5 + $0x4b0] ss:$12 sps:$4 sm:$0xff]  }
 0x306   : > { %v9064_v31 = vld [vmem:[%s11967_s5 + $0xdc] ss:$12 sps:$4 sm:$0xff]  }
 0x307   : > { %4220 = vmatmul.mubr.bf16.vlgmr.msra.gmra.mxu0 %v10763_v23  ;;  %4729 = vmatmul.mubr.bf16.vlgmr.msra.gmra.mxu1 %v10805_v45  ;;  %v8998_v23 = vld [vmem:[%s11967_s5 + $0x7c] ss:$12 sps:$4 sm:$0xff]  }
 0x308   : > { %4654 = vmatpush1.bf16.msra.mxu0 %v8986_v33  ;;  %4685 = vmatprep.mubr.bf16.mxu0 %v10750_v7  ;;  %v9067_v33 = vld [vmem:[%s11967_s5 + $0x49c] ss:$12 sps:$4 sm:$0xff]  }
 0x309   : > { %8248 = vmatpush3.bf16.msra.mxu1 %v8990_v32  ;;  %4771 = vmatprep.mubr.bf16.mxu1 %v10750_v7  ;;  %v9062_v32 = vld [vmem:[%s11967_s5 + $0xd8] ss:$12 sps:$4 sm:$0xff]   ;;  %v9145_v7 = vld [vmem:[%s11967_s5 + $0x4e8] ss:$12 sps:$4 sm:$0xff]  }
 0x30a   : > { %4655 = vmatprep.subr.bf16.mxu0 %v8993_v53  ;;  %8249 = vmatprep.subr.bf16.mxu1 %v8994_v36  ;;  %v9065_v53 = vld [vmem:[%s11967_s5 + $0x498] ss:$12 sps:$4 sm:$0xff]  }
 0x30b   : > { %v9070_v36 = vld [vmem:[%s11967_s5 + $0xc4] ss:$12 sps:$4 sm:$0xff]  }
 0x30c   : > { %4656 = vmatpush1.bf16.msra.mxu0 %v8991_v62  ;;  %v9073_v62 = vld [vmem:[%s11967_s5 + $0x484] ss:$12 sps:$4 sm:$0xff]  }
 0x30d   : > { %8250 = vmatpush3.bf16.msra.mxu1 %v8995_v34  ;;  %4657 = vmatprep.subr.bf16.mxu0 %v8998_v23  ;;  %v9068_v34 = vld [vmem:[%s11967_s5 + $0xc0] ss:$12 sps:$4 sm:$0xff]  }
 0x30e   : > { %8251 = vmatprep.subr.bf16.mxu1 %v8999_v35  ;;  %v9071_v23 = vld [vmem:[%s11967_s5 + $0x480] ss:$12 sps:$4 sm:$0xff]  }
 0x30f   : > { %v9076_v35 = vld [vmem:[%s11967_s5 + $0x5ec] ss:$12 sps:$4 sm:$0xff]  }
 0x310   : > { %4658 = vmatpush1.bf16.msra.mxu0 %v8996_v37  ;;  %v9077_v37 = vld [vmem:[%s11967_s5 + $0x230] ss:$12 sps:$4 sm:$0xff]  }
 0x311   : > { %8252 = vmatpush3.bf16.msra.mxu1 %v9000_v38  ;;  %4659 = vmatprep.subr.bf16.mxu0 %v9003_v40  ;;  %v9074_v38 = vld [vmem:[%s11967_s5 + $0x5e8] ss:$12 sps:$4 sm:$0xff]  }
 0x312   : > { %8253 = vmatprep.subr.bf16.mxu1 %v9004_v5  ;;  %v9080_v40 = vld [vmem:[%s11967_s5 + $0x5d4] ss:$12 sps:$4 sm:$0xff]   ;;  %v9081_v5 = vld [vmem:[%s11967_s5 + $0x218] ss:$12 sps:$4 sm:$0xff]  }
 0x314   : > { %4660 = vmatpush1.bf16.msra.mxu0 %v9001_v12  ;;  %v9078_v12 = vld [vmem:[%s11967_s5 + $0x5d0] ss:$12 sps:$4 sm:$0xff]  }
 0x315   : > { %8254 = vmatpush3.bf16.msra.mxu1 %v9005_v41  ;;  %4661 = vmatprep.subr.bf16.mxu0 %v9008_v42  ;;  %v9084_v41 = vld [vmem:[%s11967_s5 + $0x5bc] ss:$12 sps:$4 sm:$0xff]   ;;  %v9085_v42 = vld [vmem:[%s11967_s5 + $0x200] ss:$12 sps:$4 sm:$0xff]  }
 0x316   : > { %8255 = vmatprep.subr.bf16.mxu1 %v9009_v43  ;;  %v9082_v43 = vld [vmem:[%s11967_s5 + $0x5b8] ss:$12 sps:$4 sm:$0xff]  }
 0x318   : > { %4662 = vmatpush1.bf16.msra.mxu0 %v9006_v44  ;;  %v9088_v44 = vld [vmem:[%s11967_s5 + $0x5a4] ss:$12 sps:$4 sm:$0xff]  }
 0x319   : > { %8256 = vmatpush3.bf16.msra.mxu1 %v9010_v9  ;;  %4663 = vmatprep.subr.bf16.mxu0 %v9013_v48  ;;  %v9089_v9 = vld [vmem:[%s11967_s5 + $0x1e8] ss:$12 sps:$4 sm:$0xff]   ;;  %v9086_v48 = vld [vmem:[%s11967_s5 + $0x5a0] ss:$12 sps:$4 sm:$0xff]  }
 0x31a   : > { %8257 = vmatprep.subr.bf16.mxu1 %v9014_v49  ;;  %v9092_v49 = vld [vmem:[%s11967_s5 + $0x58c] ss:$12 sps:$4 sm:$0xff]  }
 0x31c   : > { %4664 = vmatpush1.bf16.msra.mxu0 %v9011_v22  ;;  %v9093_v22 = vld [vmem:[%s11967_s5 + $0x1d0] ss:$12 sps:$4 sm:$0xff]  }
 0x31d   : > { %8258 = vmatpush3.bf16.msra.mxu1 %v9015_v51  ;;  %4665 = vmatprep.subr.bf16.mxu0 %v9018_v54  ;;  %v9090_v51 = vld [vmem:[%s11967_s5 + $0x588] ss:$12 sps:$4 sm:$0xff]  }
 0x31e   : > { %8259 = vmatprep.subr.bf16.mxu1 %v9019_v13  ;;  %v9096_v54 = vld [vmem:[%s11967_s5 + $0x574] ss:$12 sps:$4 sm:$0xff]   ;;  %v9097_v13 = vld [vmem:[%s11967_s5 + $0x1b8] ss:$12 sps:$4 sm:$0xff]  }
 0x320   : > { %4666 = vmatpush1.bf16.msra.mxu0 %v9016_v57  ;;  %v9094_v57 = vld [vmem:[%s11967_s5 + $0x570] ss:$12 sps:$4 sm:$0xff]  }
 0x321   : > { %8260 = vmatpush3.bf16.msra.mxu1 %v9020_v59  ;;  %4667 = vmatprep.subr.bf16.mxu0 %v9023_v46  ;;  %v9100_v59 = vld [vmem:[%s11967_s5 + $0x55c] ss:$12 sps:$4 sm:$0xff]   ;;  %v9101_v46 = vld [vmem:[%s11967_s5 + $0x1a0] ss:$12 sps:$4 sm:$0xff]  }
 0x322   : > { %8261 = vmatprep.subr.bf16.mxu1 %v9024_v60  ;;  %v9098_v60 = vld [vmem:[%s11967_s5 + $0x558] ss:$12 sps:$4 sm:$0xff]  }
 0x324   : > { %4668 = vmatpush1.bf16.msra.mxu0 %v9021_v61  ;;  %v9104_v61 = vld [vmem:[%s11967_s5 + $0x544] ss:$12 sps:$4 sm:$0xff]  }
 0x325   : > { %8262 = vmatpush3.bf16.msra.mxu1 %v9025_v63  ;;  %4669 = vmatprep.subr.bf16.mxu0 %v9028_v0  ;;  %v9105_v63 = vld [vmem:[%s11967_s5 + $0x188] ss:$12 sps:$4 sm:$0xff]   ;;  %v9102_v0 = vld [vmem:[%s11967_s5 + $0x540] ss:$12 sps:$4 sm:$0xff]  }
 0x326   : > { %5311 = vmatprep.subr.bf16.mxu1 %v9031_v1  ;;  %v9108_v1 = vld [vmem:[%s11967_s5 + $0x6ac] ss:$12 sps:$4 sm:$0xff]  }
 0x328   : > { %4772 = vmatmul.mubr.bf16.vlgmr.msra.gmra.mxu1 %v10748_v4  ;;  %4670 = vmatpush2.bf16.msra.mxu0 %v9026_v3  ;;  %v9106_v3 = vld [vmem:[%s11967_s5 + $0x6a8] ss:$12 sps:$4 sm:$0xff]  }
 0x329   : > { %5312 = vmatpush1.bf16.msra.mxu1 %v9029_v6  ;;  %5343 = vmatprep.mubr.bf16.mxu1 %v4922_v11  ;;  %v9109_v6 = vld [vmem:[%s11967_s5 + $0x6b0] ss:$12 sps:$4 sm:$0xff]  }
 0x32a   : > { %4671 = vmatprep.subr.bf16.mxu0 %v9034_v8  ;;  %5313 = vmatprep.subr.bf16.mxu1 %v9037_v10  ;;  %v9112_v8 = vld [vmem:[%s11967_s5 + $0x694] ss:$12 sps:$4 sm:$0xff]   ;;  %v4921_v10 = vrot.slane %v10748_v4, 1 }
 0x32c   : > { %4672 = vmatpush2.bf16.msra.mxu0 %v9032_v14  ;;  %v9110_v14 = vld [vmem:[%s11967_s5 + $0x690] ss:$12 sps:$4 sm:$0xff]  }
 0x32d   : > { %5314 = vmatpush1.bf16.msra.mxu1 %v9035_v15  ;;  %4673 = vmatprep.subr.bf16.mxu0 %v9040_v16  ;;  %v9113_v15 = vld [vmem:[%s11967_s5 + $0x698] ss:$12 sps:$4 sm:$0xff]   ;;  %v9116_v16 = vld [vmem:[%s11967_s5 + $0x67c] ss:$12 sps:$4 sm:$0xff]  }
 0x32e   : > { %5315 = vmatprep.subr.bf16.mxu1 %v9043_v17  ;;  %v9114_v17 = vld [vmem:[%s11967_s5 + $0x678] ss:$12 sps:$4 sm:$0xff]  }
 0x330   : > { %4674 = vmatpush2.bf16.msra.mxu0 %v9038_v47  ;;  %v9117_v47 = vld [vmem:[%s11967_s5 + $0x680] ss:$12 sps:$4 sm:$0xff]  }
 0x331   : > { %5316 = vmatpush1.bf16.msra.mxu1 %v9041_v19  ;;  %4675 = vmatprep.subr.bf16.mxu0 %v9046_v20  ;;  %v9120_v19 = vld [vmem:[%s11967_s5 + $0x664] ss:$12 sps:$4 sm:$0xff]   ;;  %v9118_v20 = vld [vmem:[%s11967_s5 + $0x660] ss:$12 sps:$4 sm:$0xff]  }
 0x332   : > { %5317 = vmatprep.subr.bf16.mxu1 %v9049_v21  ;;  %v9121_v21 = vld [vmem:[%s11967_s5 + $0x668] ss:$12 sps:$4 sm:$0xff]  }
 0x334   : > { %4676 = vmatpush2.bf16.msra.mxu0 %v9044_v24  ;;  %v9124_v24 = vld [vmem:[%s11967_s5 + $0x64c] ss:$12 sps:$4 sm:$0xff]  }
 0x335   : > { %5318 = vmatpush1.bf16.msra.mxu1 %v9047_v50  ;;  %4677 = vmatprep.subr.bf16.mxu0 %v9052_v52  ;;  %v9122_v50 = vld [vmem:[%s11967_s5 + $0x648] ss:$12 sps:$4 sm:$0xff]   ;;  %v9125_v52 = vld [vmem:[%s11967_s5 + $0x650] ss:$12 sps:$4 sm:$0xff]  }
 0x336   : > { %5319 = vmatprep.subr.bf16.mxu1 %v9055_v25  ;;  %v9128_v25 = vld [vmem:[%s11967_s5 + $0x634] ss:$12 sps:$4 sm:$0xff]  }
 0x338   : > { %4678 = vmatpush2.bf16.msra.mxu0 %v9050_v26  ;;  %v9126_v26 = vld [vmem:[%s11967_s5 + $0x630] ss:$12 sps:$4 sm:$0xff]  }
 0x339   : > { %5320 = vmatpush1.bf16.msra.mxu1 %v9053_v27  ;;  %4679 = vmatprep.subr.bf16.mxu0 %v9058_v28  ;;  %v9129_v27 = vld [vmem:[%s11967_s5 + $0x638] ss:$12 sps:$4 sm:$0xff]   ;;  %v9132_v28 = vld [vmem:[%s11967_s5 + $0x61c] ss:$12 sps:$4 sm:$0xff]  }
 0x33a   : > { %5321 = vmatprep.subr.bf16.mxu1 %v9061_v18  ;;  %v9130_v18 = vld [vmem:[%s11967_s5 + $0x618] ss:$12 sps:$4 sm:$0xff]  }
 0x33c   : > { %4680 = vmatpush2.bf16.msra.mxu0 %v9056_v29  ;;  %v9133_v29 = vld [vmem:[%s11967_s5 + $0x620] ss:$12 sps:$4 sm:$0xff]  }
 0x33d   : > { %5322 = vmatpush1.bf16.msra.mxu1 %v9059_v30  ;;  %4681 = vmatprep.subr.bf16.mxu0 %v9064_v31  ;;  %v9136_v30 = vld [vmem:[%s11967_s5 + $0x604] ss:$12 sps:$4 sm:$0xff]   ;;  %v9134_v31 = vld [vmem:[%s11967_s5 + $0x600] ss:$12 sps:$4 sm:$0xff]  }
 0x33e   : > { %5323 = vmatprep.subr.bf16.mxu1 %v9067_v33  ;;  %v9137_v33 = vld [vmem:[%s11967_s5 + $0x608] ss:$12 sps:$4 sm:$0xff]  }
 0x340   : > { %4682 = vmatpush2.bf16.msra.mxu0 %v9062_v32  ;;  %v9138_v32 = vld [vmem:[%s11967_s5 + $0x5f0] ss:$12 sps:$4 sm:$0xff]  }
 0x341   : > { %5324 = vmatpush1.bf16.msra.mxu1 %v9065_v53  ;;  %4683 = vmatprep.subr.bf16.mxu0 %v9070_v36  ;;  %v9139_v53 = vld [vmem:[%s11967_s5 + $0x530] ss:$12 sps:$4 sm:$0xff]   ;;  %v4923_v36 = vrot.slane %v10805_v45, 1 }
 0x342   : > { %5325 = vmatprep.subr.bf16.mxu1 %v9073_v62  ;;  %v9140_v62 = vld [vmem:[%s11967_s5 + $0x5d8] ss:$12 sps:$4 sm:$0xff]  }
 0x344   : > { %4684 = vmatpush2.bf16.msra.mxu0 %v9068_v34  ;;  %v9141_v34 = vld [vmem:[%s11967_s5 + $0x518] ss:$12 sps:$4 sm:$0xff]  }
 0x345   : > { %5326 = vmatpush1.bf16.msra.mxu1 %v9071_v23  ;;  %8370 = vmatprep.subr.bf16.mxu0 %v9401_v39  ;;  %v9143_v23 = vld [vmem:[%s11967_s5 + $0x500] ss:$12 sps:$4 sm:$0xff]  }
 0x346   : > { %5327 = vmatprep.subr.bf16.mxu1 %v9076_v35  ;;  %v9144_v35 = vld [vmem:[%s11967_s5 + $0x5a8] ss:$12 sps:$4 sm:$0xff]  }
 0x347   : > { %4686 = vmatmul.mubr.bf16.vlgmr.msra.gmra.mxu0 %v10748_v4 }
 0x348   : > { %8371 = vmatpush3.bf16.msra.mxu0 %v9077_v37  ;;  %8386 = vmatprep.mubr.msk.bf16.mxu0 %vm9402_vm5, %v9401_v39  ;;  %v9147_v37 = vld [vmem:[%s11967_s5 + $0x4d0] ss:$12 sps:$4 sm:$0xff]  }
 0x349   : > { %5328 = vmatpush2.bf16.msra.mxu1 %v9074_v38  ;;  %8372 = vmatprep.subr.bf16.mxu0 %v9401_v39  ;;  %v9148_v38 = vld [vmem:[%s11967_s5 + $0x578] ss:$12 sps:$4 sm:$0xff]  }
 0x34a   : > { %5329 = vmatprep.subr.bf16.mxu1 %v9080_v40  ;;  %v9149_v40 = vld [vmem:[%s11967_s5 + $0x4b8] ss:$12 sps:$4 sm:$0xff]  }
 0x34c   : > { %8373 = vmatpush3.bf16.msra.mxu0 %v9081_v5 }
 0x34d   : > { %5330 = vmatpush2.bf16.msra.mxu1 %v9078_v12  ;;  %8374 = vmatprep.subr.bf16.mxu0 %v9401_v39  ;;  %v9150_v12 = vld [vmem:[%s11967_s5 + $0x560] ss:$12 sps:$4 sm:$0xff]  }
 0x34e   : > { %5331 = vmatprep.subr.bf16.mxu1 %v9084_v41  ;;  %v9151_v41 = vld [vmem:[%s11967_s5 + $0x4a0] ss:$12 sps:$4 sm:$0xff]  }
 0x350   : > { %8375 = vmatpush3.bf16.msra.mxu0 %v9085_v42 }
 0x351   : > { %5332 = vmatpush2.bf16.msra.mxu1 %v9082_v43  ;;  %8376 = vmatprep.subr.bf16.mxu0 %v9401_v39  ;;  %v9152_v43 = vld [vmem:[%s11967_s5 + $0x548] ss:$12 sps:$4 sm:$0xff]  }
 0x352   : > { %5333 = vmatprep.subr.bf16.mxu1 %v9088_v44  ;;  %v9153_v44 = vld [vmem:[%s11967_s5 + $0x488] ss:$12 sps:$4 sm:$0xff]  }
 0x354   : > { %8377 = vmatpush3.bf16.msra.mxu0 %v9089_v9 }
 0x355   : > { %5334 = vmatpush2.bf16.msra.mxu1 %v9086_v48  ;;  %8378 = vmatprep.subr.bf16.mxu0 %v9401_v39  ;;  %v9156_v48 = vld [vmem:[%s11969_s7 + $0x1b4] ss:$8 sps:$4 sm:$0xff]  }
 0x356   : > { %5335 = vmatprep.subr.bf16.mxu1 %v9092_v49  ;;  %v9154_v49 = vld [vmem:[%s11969_s7 + $0x1b0] ss:$8 sps:$4 sm:$0xff]  }
 0x358   : > { %8379 = vmatpush3.bf16.msra.mxu0 %v9093_v22 }
 0x359   : > { %5336 = vmatpush2.bf16.msra.mxu1 %v9090_v51  ;;  %8380 = vmatprep.subr.bf16.mxu0 %v9401_v39  ;;  %v9159_v51 = vld [vmem:[%s11969_s7 + $0x1a4] ss:$8 sps:$4 sm:$0xff]  }
 0x35a   : > { %5337 = vmatprep.subr.bf16.mxu1 %v9096_v54 }
 0x35c   : > { %8381 = vmatpush3.bf16.msra.mxu0 %v9097_v13  ;;  %v9157_v13 = vld [vmem:[%s11969_s7 + $0x1a0] ss:$8 sps:$4 sm:$0xff]  }
 0x35d   : > { %5338 = vmatpush2.bf16.msra.mxu1 %v9094_v57  ;;  %8382 = vmatprep.subr.bf16.mxu0 %v9401_v39 }
 0x35e   : > { %5339 = vmatprep.subr.bf16.mxu1 %v9100_v59  ;;  %v9162_v59 = vld [vmem:[%s11969_s7 + $0x194] ss:$8 sps:$4 sm:$0xff]  }
 0x360   : > { %8383 = vmatpush3.bf16.msra.mxu0 %v9101_v46 }
 0x361   : > { %5340 = vmatpush2.bf16.msra.mxu1 %v9098_v60  ;;  %8384 = vmatprep.subr.bf16.mxu0 %v9401_v39  ;;  %v9160_v60 = vld [vmem:[%s11969_s7 + $0x190] ss:$8 sps:$4 sm:$0xff]  }
 0x362   : > { %5341 = vmatprep.subr.bf16.mxu1 %v9104_v61  ;;  %v9165_v61 = vld [vmem:[%s11969_s7 + $0x184] ss:$8 sps:$4 sm:$0xff]  }
 0x364   : > { %8385 = vmatpush3.bf16.msra.mxu0 %v9105_v63  ;;  %v9163_v63 = vld [vmem:[%s11969_s7 + $0x180] ss:$8 sps:$4 sm:$0xff]  }
 0x365   : > { %5342 = vmatpush2.bf16.msra.mxu1 %v9102_v0  ;;  %5354 = vmatprep.subr.bf16.mxu0 %v9108_v1  ;;  %v9168_v0 = vld [vmem:[%s11969_s7 + $0x174] ss:$8 sps:$4 sm:$0xff]   ;;  %v9166_v1 = vld [vmem:[%s11969_s7 + $0x170] ss:$8 sps:$4 sm:$0xff]  }
 0x366   : > { %8390 = vmatprep.subr.bf16.mxu1 %v9401_v39 }
 0x367   : > { %8387 = vmatmul.mubr.bf16.vlgmr.msra.gmra.mxu0 %v10805_v45  ;;  %v9142_v45 = vld [vmem:[%s11967_s5 + $0x5c0] ss:$12 sps:$4 sm:$0xff]  }
 0x368   : > { %5344 = vmatmul.mubr.bf16.vlgmr.msra.gmra.mxu1 %v4921_v10  ;;  %5355 = vmatpush1.bf16.msra.mxu0 %v9106_v3  ;;  %v9171_v3 = vld [vmem:[%s11969_s7 + $0x164] ss:$8 sps:$4 sm:$0xff]  }
 0x369   : > { %8391 = vmatpush3.bf16.msra.mxu1 %v9109_v6  ;;  %5356 = vmatprep.subr.bf16.mxu0 %v9112_v8  ;;  %v9169_v6 = vld [vmem:[%s11969_s7 + $0x160] ss:$8 sps:$4 sm:$0xff]  }
 0x36a   : > { %8392 = vmatprep.subr.bf16.mxu1 %v9401_v39  ;;  %5386 = vmatprep.mubr.bf16.mxu0 %v9400_v2 }
 0x36b   : > { %8406 = vmatprep.mubr.msk.bf16.mxu1 %vm9402_vm5, %v9401_v39 }
 0x36c   : > { %5357 = vmatpush1.bf16.msra.mxu0 %v9110_v14  ;;  %v9172_v14 = vld [vmem:[%s11969_s7 + $0x150] ss:$8 sps:$4 sm:$0xff]  }
 0x36d   : > { %8393 = vmatpush3.bf16.msra.mxu1 %v9113_v15  ;;  %5358 = vmatprep.subr.bf16.mxu0 %v9116_v16  ;;  %v9177_v16 = vld [vmem:[%s11969_s7 + $0x144] ss:$8 sps:$4 sm:$0xff]  }
 0x36e   : > { %8394 = vmatprep.subr.bf16.mxu1 %v9401_v39 }
 0x370   : > { %5359 = vmatpush1.bf16.msra.mxu0 %v9114_v17  ;;  %v9175_v17 = vld [vmem:[%s11969_s7 + $0x140] ss:$8 sps:$4 sm:$0xff]  }
 0x371   : > { %8395 = vmatpush3.bf16.msra.mxu1 %v9117_v47  ;;  %5360 = vmatprep.subr.bf16.mxu0 %v9120_v19  ;;  %v9180_v19 = vld [vmem:[%s11969_s7 + $0x234] ss:$8 sps:$4 sm:$0xff]  }
 0x372   : > { %8396 = vmatprep.subr.bf16.mxu1 %v9401_v39 }
 0x374   : > { %5361 = vmatpush1.bf16.msra.mxu0 %v9118_v20  ;;  %v9178_v20 = vld [vmem:[%s11969_s7 + $0x230] ss:$8 sps:$4 sm:$0xff]  }
 0x375   : > { %8397 = vmatpush3.bf16.msra.mxu1 %v9121_v21  ;;  %5362 = vmatprep.subr.bf16.mxu0 %v9124_v24  ;;  %v9183_v24 = vld [vmem:[%s11969_s7 + $0x224] ss:$8 sps:$4 sm:$0xff]  }
 0x376   : > { %8398 = vmatprep.subr.bf16.mxu1 %v9401_v39 }
 0x378   : > { %5363 = vmatpush1.bf16.msra.mxu0 %v9122_v50 }
 0x379   : > { %8399 = vmatpush3.bf16.msra.mxu1 %v9125_v52  ;;  %5364 = vmatprep.subr.bf16.mxu0 %v9128_v25  ;;  %v9181_v52 = vld [vmem:[%s11969_s7 + $0x220] ss:$8 sps:$4 sm:$0xff]  }
 0x37a   : > { %8400 = vmatprep.subr.bf16.mxu1 %v9401_v39  ;;  %v11312_v5 = vpop.f32.mrf.mxu1 }
 0x37c   : > { %5365 = vmatpush1.bf16.msra.mxu0 %v9126_v26  ;;  %v11320_v42 = vpop.f32.mrf.mxu1  ;;  %v9186_v26 = vld [vmem:[%s11969_s7 + $0x214] ss:$8 sps:$4 sm:$0xff]  }
 0x37d   : > { %8401 = vmatpush3.bf16.msra.mxu1 %v9129_v27  ;;  %5366 = vmatprep.subr.bf16.mxu0 %v9132_v28 }
 0x37e   : > { %8402 = vmatprep.subr.bf16.mxu1 %v9401_v39  ;;  %v11328_v9 = vpop.f32.mrf.mxu1 }
 0x380   : > { %5367 = vmatpush1.bf16.msra.mxu0 %v9130_v18  ;;  %v11336_v22 = vpop.f32.mrf.mxu1 }
 0x381   : > { %8403 = vmatpush3.bf16.msra.mxu1 %v9133_v29  ;;  %5368 = vmatprep.subr.bf16.mxu0 %v9136_v30  ;;  %v9184_v29 = vld [vmem:[%s11969_s7 + $0x210] ss:$8 sps:$4 sm:$0xff]  }
 0x382   : > { %8404 = vmatprep.subr.bf16.mxu1 %v9401_v39 }
 0x384   : > { %5369 = vmatpush1.bf16.msra.mxu0 %v9134_v31  ;;  %v9189_v31 = vld [vmem:[%s11969_s7 + $0x204] ss:$8 sps:$4 sm:$0xff]  }
 0x385   : > { %8405 = vmatpush3.bf16.msra.mxu1 %v9137_v33  ;;  %8278 = vmatprep.subr.bf16.mxu0 %v9138_v32 }
 0x387   : > { %5387 = vmatmul.mubr.bf16.vlgmr.msra.gmra.mxu0 %v4923_v36 }
 0x388   : > { %8407 = vmatmul.mubr.bf16.vlgmr.msra.gmra.mxu1 %v4923_v36  ;;  %8279 = vmatpush3.bf16.msra.mxu0 %v9139_v53  ;;  %v9187_v53 = vld [vmem:[%s11969_s7 + $0x200] ss:$8 sps:$4 sm:$0xff]   ;;  %v9192_v36 = vld [vmem:[%s11969_s7 + $0x1f4] ss:$8 sps:$4 sm:$0xff]  }
 0x389   : > { %5429 = vmatprep.mubr.bf16.mxu0 %v4922_v11  ;;  %8280 = vmatprep.subr.bf16.mxu0 %v9140_v62  ;;  %v9146_v11 = vld [vmem:[%s11967_s5 + $0x590] ss:$12 sps:$4 sm:$0xff]  }
 0x38a   : > { %5930 = vmatprep.mubr.bf16.mxu1 %v9400_v2  ;;  %v9190_v62 = vld [vmem:[%s11969_s7 + $0x1f0] ss:$8 sps:$4 sm:$0xff]  }
 0x38c   : > { %8281 = vmatpush3.bf16.msra.mxu0 %v9141_v34  ;;  %v9195_v34 = vld [vmem:[%s11969_s7 + $0x1e4] ss:$8 sps:$4 sm:$0xff]  }
 0x38d   : > { %8282 = vmatprep.subr.bf16.mxu0 %v9142_v45  ;;  %v9193_v45 = vld [vmem:[%s11969_s7 + $0x1e0] ss:$8 sps:$4 sm:$0xff]  }
 0x390   : > { %8283 = vmatpush3.bf16.msra.mxu0 %v9143_v23  ;;  %v9198_v23 = vld [vmem:[%s11969_s7 + $0x1d4] ss:$8 sps:$4 sm:$0xff]  }
 0x391   : > { %8284 = vmatprep.subr.bf16.mxu0 %v9144_v35  ;;  %v9196_v35 = vld [vmem:[%s11969_s7 + $0x1d0] ss:$8 sps:$4 sm:$0xff]  }
 0x394   : > { %8285 = vmatpush3.bf16.msra.mxu0 %v9145_v7  ;;  %v9201_v7 = vld [vmem:[%s11969_s7 + $0x1c4] ss:$8 sps:$4 sm:$0xff]  }
 0x395   : > { %8286 = vmatprep.subr.bf16.mxu0 %v9146_v11  ;;  %v9199_v11 = vld [vmem:[%s11969_s7 + $0x1c0] ss:$8 sps:$4 sm:$0xff]  }
 0x398   : > { %8287 = vmatpush3.bf16.msra.mxu0 %v9147_v37  ;;  %v9204_v37 = vld [vmem:[%s11969_s7 + $0x134] ss:$8 sps:$4 sm:$0xff]  }
 0x399   : > { %8288 = vmatprep.subr.bf16.mxu0 %v9148_v38  ;;  %v9210_v38 = vld [vmem:[%s11969_s7 + $0x274] ss:$8 sps:$4 sm:$0xff]  }
 0x39a   : > { %5906 = vmatprep.subr.bf16.mxu1 %v9210_v38 }
 0x39c   : > { %8289 = vmatpush3.bf16.msra.mxu0 %v9149_v40  ;;  %v9208_v40 = vld [vmem:[%s11969_s7 + $0x270] ss:$8 sps:$4 sm:$0xff]  }
 0x39d   : > { %8290 = vmatprep.subr.bf16.mxu0 %v9150_v12  ;;  %5907 = vmatpush1.bf16.msra.mxu1 %v9208_v40  ;;  %v9216_v12 = vld [vmem:[%s11969_s7 + $0x264] ss:$8 sps:$4 sm:$0xff]  }
 0x39e   : > { %5908 = vmatprep.subr.bf16.mxu1 %v9216_v12 }
 0x3a0   : > { %8291 = vmatpush3.bf16.msra.mxu0 %v9151_v41  ;;  %v9214_v41 = vld [vmem:[%s11969_s7 + $0x260] ss:$8 sps:$4 sm:$0xff]  }
 0x3a1   : > { %8292 = vmatprep.subr.bf16.mxu0 %v9152_v43  ;;  %5909 = vmatpush1.bf16.msra.mxu1 %v9214_v41  ;;  %v9220_v43 = vld [vmem:[%s11969_s7 + $0x250] ss:$8 sps:$4 sm:$0xff]  }
 0x3a4   : > { %8293 = vmatpush3.bf16.msra.mxu0 %v9153_v44  ;;  %v9222_v44 = vld [vmem:[%s11969_s7 + $0x254] ss:$8 sps:$4 sm:$0xff]  }
 0x3a5   : > { %5857 = vmatprep.subr.bf16.mxu0 %v9156_v48  ;;  %5910 = vmatprep.subr.bf16.mxu1 %v9222_v44  ;;  %v9226_v48 = vld [vmem:[%s11969_s7 + $0x240] ss:$8 sps:$4 sm:$0xff]  }
 0x3a6   : > { %5911 = vmatpush1.bf16.msra.mxu1 %v9220_v43 }
 0x3a7   : > { %5430 = vmatmul.mubr.bf16.vlgmr.msra.gmra.mxu0 %v4921_v10  ;;  %v4262_v54 = vpop.f32.mrf.mxu1  ;;  %v11370_v8 = vpop.f32.mrf.mxu0  ;;  %v9174_v10 = vld [vmem:[%s11969_s7 + $0x154] ss:$8 sps:$4 sm:$0xff]  }
 0x3a8   : > { %5858 = vmatpush1.bf16.msra.mxu0 %v9154_v49  ;;  %v9228_v49 = vld [vmem:[%s11969_s7 + $0x244] ss:$8 sps:$4 sm:$0xff]  }
 0x3a9   : > { %v8368_v57 = vpop.f32.mrf.mxu1  ;;  %5859 = vmatprep.subr.bf16.mxu0 %v9159_v51  ;;  %v11378_v15 = vpop.f32.mrf.mxu0  ;;  %5912 = vmatprep.subr.bf16.mxu1 %v9228_v49  ;;  %v9234_v51 = vld [vmem:[%s11969_s7 + $0x74] ss:$8 sps:$4 sm:$0xff]  }
 0x3aa   : > { %5913 = vmatpush1.bf16.msra.mxu1 %v9226_v48 }
 0x3ab   : > { %v4265_v46 = vpop.f32.mrf.mxu1  ;;  %v11386_v47 = vpop.f32.mrf.mxu0  ;;  %6141 = vmatprep.subr.bf16.mxu1 %v9234_v51 }
 0x3ac   : > { %5860 = vmatpush1.bf16.msra.mxu0 %v9157_v13 }
 0x3ad   : > { %v8369_v4 = vpop.f32.mrf.mxu1  ;;  %5861 = vmatprep.subr.bf16.mxu0 %v9162_v59  ;;  %v11394_v21 = vpop.f32.mrf.mxu0 }
 0x3b0   : > { %5862 = vmatpush1.bf16.msra.mxu0 %v9160_v60 }
 0x3b1   : > { %5863 = vmatprep.subr.bf16.mxu0 %v9165_v61 }
 0x3b4   : > { %5864 = vmatpush1.bf16.msra.mxu0 %v9163_v63 }
 0x3b5   : > { %5865 = vmatprep.subr.bf16.mxu0 %v9168_v0 }
 0x3b8   : > { %5866 = vmatpush1.bf16.msra.mxu0 %v9166_v1 }
 0x3b9   : > { %5867 = vmatprep.subr.bf16.mxu0 %v9171_v3 }
 0x3bc   : > { %5868 = vmatpush1.bf16.msra.mxu0 %v9169_v6 }
 0x3bd   : > { %5869 = vmatprep.subr.bf16.mxu0 %v9174_v10 }
 0x3c0   : > { %5870 = vmatpush1.bf16.msra.mxu0 %v9172_v14 }
 0x3c1   : > { %5871 = vmatprep.subr.bf16.mxu0 %v9177_v16 }
 0x3c4   : > { %5872 = vmatpush1.bf16.msra.mxu0 %v9175_v17 }
 0x3c5   : > { %5873 = vmatprep.subr.bf16.mxu0 %v9180_v19 }
 0x3c7   : > { %v8232_v50 = vpop.f32.mrf.mxu0 }
 0x3c8   : > { %5874 = vmatpush2.bf16.msra.mxu0 %v9178_v20 }
 0x3c9   : > { %v8233_v25 = vpop.f32.mrf.mxu0  ;;  %5875 = vmatprep.subr.bf16.mxu0 %v9183_v24 }
 0x3ca   : > { %v8234_v27 = vadd.f32 %v8233_v25, %v8232_v50 }
 0x3cb   : > { %v8235_v28 = vpop.f32.mrf.mxu0 }
 0x3cc   : > { %v4263_v18 = vadd.f32 %v8234_v27, %v4262_v54  ;;  %5876 = vmatpush2.bf16.msra.mxu0 %v9181_v52  ;;  %v4730_v54 = vpop.f32.mrf.mxu1  ;;  %v4179_v27 = vadd.f32 %v11370_v8, %v11312_v5 }
 0x3cd   : > { %v8236_v30 = vpop.f32.mrf.mxu0  ;;  %5877 = vmatprep.subr.bf16.mxu0 %v9186_v26 }
 0x3ce   : > { %v8237_v33 = vadd.f32 %v8236_v30, %v8235_v28  ;;  %v4732_v13 = vpop.f32.mrf.mxu1 }
 0x3d0   : > { %v4266_v32 = vadd.f32 %v8237_v33, %v4265_v46  ;;  %5878 = vmatpush2.bf16.msra.mxu0 %v9184_v29  ;;  %v4734_v57 = vpop.f32.mrf.mxu1  ;;  %v4181_v29 = vadd.f32 %v11378_v15, %v11320_v42 }
 0x3d1   : > { %5879 = vmatprep.subr.bf16.mxu0 %v9189_v31  ;;  %v4183_v31 = vadd.f32 %v11386_v47, %v11328_v9 }
 0x3d2   : > { %v4736_v59 = vpop.f32.mrf.mxu1 }
 0x3d4   : > { %5880 = vmatpush2.bf16.msra.mxu0 %v9187_v53  ;;  %v4185_v53 = vadd.f32 %v11394_v21, %v11336_v22 }
 0x3d5   : > { %5881 = vmatprep.subr.bf16.mxu0 %v9192_v36 }
 0x3d8   : > { %5882 = vmatpush2.bf16.msra.mxu0 %v9190_v62 }
 0x3d9   : > { %5883 = vmatprep.subr.bf16.mxu0 %v9195_v34 }
 0x3dc   : > { %5884 = vmatpush2.bf16.msra.mxu0 %v9193_v45 }
 0x3dd   : > { %5885 = vmatprep.subr.bf16.mxu0 %v9198_v23 }
 0x3e0   : > { %5886 = vmatpush2.bf16.msra.mxu0 %v9196_v35 }
 0x3e1   : > { %5887 = vmatprep.subr.bf16.mxu0 %v9201_v7 }
 0x3e4   : > { %5888 = vmatpush2.bf16.msra.mxu0 %v9199_v11 }
 0x3e5   : > { %6190 = vmatprep.subr.bf16.mxu0 %v9204_v37 }
 0x3e8   : > { %v8263_v46 = vpop.f32.mrf.mxu1 }
 0x3ea   : > { %v8264_v4 = vpop.f32.mrf.mxu1 }
 0x3eb   : > { %v8265_v1 = vadd.f32 %v8264_v4, %v8263_v46 }
 0x3ec   : > { %v8266_v63 = vpop.f32.mrf.mxu1 }
 0x3ed   : > { %v4774_v14 = vadd.f32 %v8265_v1, %v4263_v18  ;;  %v11479_v18 = vld [vmem:[%s11968_s6] sm:$0x7] }
 0x3ee   : > { %v8267_v3 = vpop.f32.mrf.mxu1  ;;  %v5490_v42 = vrot.slane %v11479_v18, %v9859_v55  ;;  %v5494_v45 = vrot.slane %v11479_v18, %v9866_v58 }
 0x3ef   : > { %v8268_v10 = vadd.f32 %v8267_v3, %v8266_v63 }
 0x3f1   : > { %v4777_v20 = vadd.f32 %v8268_v10, %v4266_v32 }
 0x407   : > { %v4687_v60 = vpop.f32.mrf.mxu0 }
 0x408   : > { %v4688_v30 = vadd.f32 %v4687_v60, %v4179_v27  ;;  %v9211_v27 = vld [vmem:[%s11969_s7 + $0x110] ss:$8 sps:$4 sm:$0xff]  }
 0x409   : > { %v4689_v61 = vpop.f32.mrf.mxu0 }
 0x40a   : > { %v4690_v33 = vadd.f32 %v4689_v61, %v4181_v29  ;;  %v4731_v5 = vadd.f32 %v4730_v54, %v4688_v30  ;;  %v9217_v30 = vld [vmem:[%s11969_s7 + $0x100] ss:$8 sps:$4 sm:$0xff]  }
 0x40b   : > { %v4691_v0 = vpop.f32.mrf.mxu0 }
 0x40c   : > { %v4692_v8 = vadd.f32 %v4691_v0, %v4183_v31  ;;  %v4733_v23 = vadd.f32 %v4732_v13, %v4690_v33  ;;  %v9225_v33 = vld [vmem:[%s11969_s7 + $0x2f4] ss:$8 sps:$4 sm:$0xff]  }
 0x40d   : > { %v4693_v6 = vpop.f32.mrf.mxu0 }
 0x40e   : > { %v4694_v9 = vadd.f32 %v4693_v6, %v4185_v53  ;;  %v4735_v22 = vadd.f32 %v4734_v57, %v4692_v8  ;;  %v5498_v8 = vrot.slane %v11479_v18, %v9861_v56 }
 0x410   : > { %v4737_v41 = vadd.f32 %v4736_v59, %v4694_v9 }
 0x427   : > { %v4814_v16 = vpop.f32.mrf.mxu0 }
 0x428   : > { %v11468_v17 = vadd.f32 %v4814_v16, %v4774_v14  ;;  %v5345_v25 = vpop.f32.mrf.mxu1 }
 0x429   : > { %v8388_v19 = vpop.f32.mrf.mxu0 }
 0x42a   : > { %v5347_v26 = vpop.f32.mrf.mxu1 }
 0x42b   : > { %v4817_v24 = vpop.f32.mrf.mxu0 }
 0x42c   : > { %v11470_v50 = vadd.f32 %v4817_v24, %v4777_v20  ;;  %v5349_v28 = vpop.f32.mrf.mxu1  ;;  %v9202_v20 = vld [vmem:[%s11969_s7 + $0x130] ss:$8 sps:$4 sm:$0xff]  }
 0x42d   : > { %v8389_v52 = vpop.f32.mrf.mxu0 }
 0x42e   : > { %v5351_v32 = vpop.f32.mrf.mxu1  ;;  %v9207_v52 = vld [vmem:[%s11969_s7 + $0x124] ss:$8 sps:$4 sm:$0xff]  }
 0x447   : > { %v5388_v36 = vpop.f32.mrf.mxu0 }
 0x448   : > { %v5389_v62 = vadd.f32 %v5388_v36, %v5345_v25  ;;  %v11487_v15 = vpop.f32.mrf.mxu1  ;;  %v9205_v25 = vld [vmem:[%s11969_s7 + $0x120] ss:$8 sps:$4 sm:$0xff]  }
 0x449   : > { %v5390_v34 = vpop.f32.mrf.mxu0 }
 0x44a   : > { %v5479_v47 = vadd.f32 %v5389_v62, %v4731_v5  ;;  %v5391_v35 = vadd.f32 %v5390_v34, %v5347_v26  ;;  %v8408_v7 = vpop.f32.mrf.mxu1  ;;  %v9213_v26 = vld [vmem:[%s11969_s7 + $0x114] ss:$8 sps:$4 sm:$0xff]  }
 0x44b   : > { %v5392_v11 = vpop.f32.mrf.mxu0 }
 0x44c   : > { %v5502_v21 = vadd.f32 %v5490_v42, %v5479_v47  ;;  %v5480_v37 = vadd.f32 %v5391_v35, %v4733_v23  ;;  %v5393_v38 = vadd.f32 %v5392_v11, %v5349_v28  ;;  %v5475_v40 = vpop.f32.mrf.mxu1  ;;  %v9219_v28 = vld [vmem:[%s11969_s7 + $0x104] ss:$8 sps:$4 sm:$0xff]  }
 0x44d   : > { %v5394_v12 = vpop.f32.mrf.mxu0  ;;  %v1172_v23 = vld [vmem:[%s11971_s9 + $0x8] sm:$0x3f] }
 0x44e   : > { %v5503_v55 = vadd.f32 %v5494_v45, %v5480_v37  ;;  %v5482_v43 = vadd.f32 %v5393_v38, %v4735_v22  ;;  %v5395_v44 = vadd.f32 %v5394_v12, %v5351_v32  ;;  %v8409_v48 = vpop.f32.mrf.mxu1  ;;  %v5508_v49 = vmax.f32 %v5502_v21, 0.0  ;;  %v1159_v32 = vpop.xlane.xlu0 %1158 }
 0x450   : > { %v5509_v51 = vmax.f32 %v5503_v55, 0.0  ;;  %v5505_v58 = vadd.f32 %v5490_v42, %v5482_v43  ;;  %v5483_v54 = vadd.f32 %v5395_v44, %v4737_v41  ;;  %v3469_v42 = vpop.xlane.xlu1 %3468  ;;  %v9223_v41 = vld [vmem:[%s11969_s7 + $0x2f0] ss:$8 sps:$4 sm:$0xff]  }
 0x452   : > { %v5511_v13 = vmax.f32 %v5505_v58, 0.0  ;;  %v5506_v46 = vadd.f32 %v5494_v45, %v5483_v54  ;;  %v5514_v60 = vadd.f32 %v5509_v51, %v5508_v49  ;;  %v1170_v9 = vpop.xlane.xlu0 %1169  ;;  %v9231_v54 = vld [vmem:[%s11969_s7 + $0x2e4] ss:$8 sps:$4 sm:$0xff]  }
 0x453   : > { %v1174_v7 = vmul.f32 %v1172_v23, %v1170_v9  ;;  %v9276_v23 = vld [vmem:[%s11969_s7 + $0x4] ss:$8 sps:$4 sm:$0xff]   ;;  %v9271_v9 = vld [vmem:[%s11969_s7 + $0x370] ss:$8 sps:$4 sm:$0xff]  }
 0x454   : > { %v11491_v4 = vpack.c.bf16 %v5511_v13, %v5508_v49  ;;  %v5512_v57 = vmax.f32 %v5506_v46, 0.0  ;;  %v5520_v59 = vsel %vm5519_vm6, %v5511_v13, 0.0  ;;  %v3477_v11 = vpop.xlane.xlu1 %3476 }
 0x455   : > { %v1178_v55 = vsel %vm1177_vm7, %v1174_v7, 0.0  ;;  %v9280_v7 = vld [vmem:[%s11969_s7 + $0xf0] ss:$8 sps:$4 sm:$0xff]  }
 0x456   : > { %v11493_v61 = vpack.c.bf16 %v5512_v57, %v5509_v51  ;;  %v5634_v63 = vshll.u32 %v11491_v4, 16  ;;  %v5521_v0 = vsel %vm5519_vm6, %v5512_v57, 0.0  ;;  %v5632_v16 = vshrl.u32 %v11491_v4, 16 }
 0x457   : > { %v11496_v1 = vadd.f32 %v5521_v0, %v5520_v59  ;;  %v9232_v0 = vld [vmem:[%s11969_s7 + $0x70] ss:$8 sps:$4 sm:$0xff]  }
 0x458   : > { %v5641_v3 = vshll.u32 %v11493_v61, 16  ;;  %v5636_v6 = vrot.slane %v5634_v63, 1  ;;  %v5639_v10 = vshrl.u32 %v11493_v61, 16  ;;  %v6268_v49 = vrot.slane %v11493_v61, 1 }
 0x45a   : > { %v5643_v14 = vrot.slane %v5641_v3, 1  ;;  %v5637_v24 = vor.u32 %v5636_v6, %v5632_v16  ;;  %v9235_v16 = vld [vmem:[%s11969_s7 + $0x2d0] ss:$8 sps:$4 sm:$0xff]  }
 0x45c   : > { %v5644_v19 = vor.u32 %v5643_v14, %v5639_v10  ;;  %v9237_v10 = vld [vmem:[%s11969_s7 + $0x2d4] ss:$8 sps:$4 sm:$0xff]   ;;  %v9240_v14 = vld [vmem:[%s11969_s7 + $0x64] ss:$8 sps:$4 sm:$0xff]  }
 0x45e   : > { %5889 = vmatprep.mubr.bf16.mxu0 %v5644_v19  ;;  %v9243_v19 = vld [vmem:[%s11969_s7 + $0x2c4] ss:$8 sps:$4 sm:$0xff]  }
 0x45f   : > { %5890 = vmatmul.mubr.bf16.vlgmr.msra.gmra.mxu0 %v5637_v24  ;;  %v9246_v24 = vld [vmem:[%s11969_s7 + $0x54] ss:$8 sps:$4 sm:$0xff]  }
 0x460   : > { %6191 = vmatpush1.bf16.msra.mxu0 %v9202_v20  ;;  %6214 = vmatprep.mubr.bf16.mxu0 %v9400_v2  ;;  %v9238_v20 = vld [vmem:[%s11969_s7 + $0x60] ss:$8 sps:$4 sm:$0xff]  }
 0x461   : > { %6192 = vmatprep.subr.bf16.mxu0 %v9207_v52  ;;  %v9241_v52 = vld [vmem:[%s11969_s7 + $0x2c0] ss:$8 sps:$4 sm:$0xff]  }
 0x464   : > { %6193 = vmatpush1.bf16.msra.mxu0 %v9205_v25  ;;  %v9244_v25 = vld [vmem:[%s11969_s7 + $0x50] ss:$8 sps:$4 sm:$0xff]  }
 0x465   : > { %6194 = vmatprep.subr.bf16.mxu0 %v9213_v26  ;;  %v9252_v26 = vld [vmem:[%s11969_s7 + $0x44] ss:$8 sps:$4 sm:$0xff]  }
 0x467   : > { %v8294_v29 = vpop.f32.mrf.mxu0 }
 0x468   : > { %6195 = vmatpush1.bf16.msra.mxu0 %v9211_v27  ;;  %v9247_v27 = vld [vmem:[%s11969_s7 + $0x2b0] ss:$8 sps:$4 sm:$0xff]  }
 0x469   : > { %v8295_v31 = vpop.f32.mrf.mxu0  ;;  %6196 = vmatprep.subr.bf16.mxu0 %v9219_v28  ;;  %v9255_v28 = vld [vmem:[%s11969_s7 + $0x2a4] ss:$8 sps:$4 sm:$0xff]  }
 0x46a   : > { %v8296_v53 = vadd.f32 %v8295_v31, %v8294_v29  ;;  %v9250_v29 = vld [vmem:[%s11969_s7 + $0x40] ss:$8 sps:$4 sm:$0xff]  }
 0x46b   : > { %v8297_v36 = vpop.f32.mrf.mxu0  ;;  %v9253_v31 = vld [vmem:[%s11969_s7 + $0x2a0] ss:$8 sps:$4 sm:$0xff]  }
 0x46c   : > { %v5473_v5 = vadd.f32 %v8296_v53, %v11487_v15  ;;  %6197 = vmatpush1.bf16.msra.mxu0 %v9217_v30  ;;  %v1171_v15 = vld [vmem:[%s11971_s9] sm:$0xff]  ;;  %v9258_v30 = vld [vmem:[%s11969_s7 + $0x34] ss:$8 sps:$4 sm:$0xff]  }
 0x46d   : > { %v8298_v62 = vpop.f32.mrf.mxu0  ;;  %6475 = vmatprep.subr.bf16.mxu0 %v9225_v33  ;;  %v1173_v37 = vmul.f32 %v1171_v15, %v1159_v32  ;;  %v9261_v33 = vld [vmem:[%s11969_s7 + $0x294] ss:$8 sps:$4 sm:$0xff]   ;;  %v9256_v32 = vld [vmem:[%s11969_s7 + $0x30] ss:$8 sps:$4 sm:$0xff]   ;;  %v9264_v53 = vld [vmem:[%s11969_s7 + $0x24] ss:$8 sps:$4 sm:$0xff]  }
 0x46e   : > { %v5481_v34 = vadd.f32 %v5473_v5, %v11468_v17  ;;  %v8299_v45 = vadd.f32 %v8298_v62, %v8297_v36  ;;  %v3479_v17 = vld [vmem:[%s11972_s10 + $0x8] sm:$0xf]  ;;  %v9259_v36 = vld [vmem:[%s11969_s7 + $0x290] ss:$8 sps:$4 sm:$0xff]   ;;  %v9267_v5 = vld [vmem:[%s11969_s7 + $0x284] ss:$8 sps:$4 sm:$0xff]  }
 0x46f   : > { %v1176_v58 = vsel %vm1175_vm9, %v1173_v37, 0.0  ;;  %v9270_v62 = vld [vmem:[%s11969_s7 + $0x14] ss:$8 sps:$4 sm:$0xff]  }
 0x470   : > { %v5476_v47 = vadd.f32 %v8299_v45, %v5475_v40  ;;  %v5504_v35 = vadd.f32 %v5498_v8, %v5481_v34  ;;  %v3478_v40 = vld [vmem:[%s11972_s10] sm:$0xff]  ;;  %v1179_v13 = vadd.f32 %v1178_v55, %v1176_v58  ;;  %v9273_v34 = vld [vmem:[%s11969_s7 + $0x374] ss:$8 sps:$4 sm:$0xff]   ;;  %v9268_v45 = vld [vmem:[%s11969_s7 + $0x10] ss:$8 sps:$4 sm:$0xff]  }
 0x471   : > { %v3480_v48 = vmul.f32 %v3478_v40, %v3469_v42  ;;  %v9265_v42 = vld [vmem:[%s11969_s7 + $0x280] ss:$8 sps:$4 sm:$0xff]   ;;  %v9282_v15 = vld [vmem:[%s11969_s7 + $0xf4] ss:$8 sps:$4 sm:$0xff]   ;;  %v9303_v55 = vld [vmem:[%s11969_s7 + $0x324] ss:$8 sps:$4 sm:$0xff]  }
 0x472   : > { %v5484_v56 = vadd.f32 %v5476_v47, %v11470_v50  ;;  %v5510_v18 = vmax.f32 %v5504_v35, 0.0  ;;  %v3481_v50 = vmul.f32 %v3479_v17, %v3477_v11  ;;  %v9279_v47 = vld [vmem:[%s11969_s7 + $0x364] ss:$8 sps:$4 sm:$0xff]   ;;  %v9274_v35 = vld [vmem:[%s11969_s7] ss:$8 sps:$4 sm:$0xff]  }
 0x473   : > { %v9288_v17 = vld [vmem:[%s11969_s7 + $0xe4] ss:$8 sps:$4 sm:$0xff]   ;;  %v9283_v11 = vld [vmem:[%s11969_s7 + $0x350] ss:$8 sps:$4 sm:$0xff]   ;;  %v9294_v37 = vld [vmem:[%s11969_s7 + $0xd4] ss:$8 sps:$4 sm:$0xff]  }
 0x474   : > { %v5507_v22 = vadd.f32 %v5498_v8, %v5484_v56  ;;  %v5515_v21 = vsel %vm1155_vm1, %v5510_v18, 0.0  ;;  %v3484_v57 = vsel %vm3483_vm10, %v3481_v50, 0.0  ;;  %v9262_v8 = vld [vmem:[%s11969_s7 + $0x20] ss:$8 sps:$4 sm:$0xff]   ;;  %v9297_v40 = vld [vmem:[%s11969_s7 + $0x334] ss:$8 sps:$4 sm:$0xff]  }
 0x475   : > { %v5516_v38 = vadd.f32 %v5515_v21, %v5514_v60  ;;  %v9229_v60 = vld [vmem:[%s11969_s7 + $0x2e0] ss:$8 sps:$4 sm:$0xff]   ;;  %v9300_v50 = vld [vmem:[%s11969_s7 + $0xc4] ss:$8 sps:$4 sm:$0xff]   ;;  %v9304_v58 = vld [vmem:[%s11969_s7 + $0xb0] ss:$8 sps:$4 sm:$0xff]  }
 0x476   : > { %v5513_v12 = vmax.f32 %v5507_v22, 0.0  ;;  %v9277_v56 = vld [vmem:[%s11969_s7 + $0x360] ss:$8 sps:$4 sm:$0xff]   ;;  %v9291_v22 = vld [vmem:[%s11969_s7 + $0x344] ss:$8 sps:$4 sm:$0xff]  }
 0x477   : > { %5517 = vadd.xlane.f32.xlu0 %v5516_v38  ;;  %v9286_v21 = vld [vmem:[%s11969_s7 + $0xe0] ss:$8 sps:$4 sm:$0xff]  }
 0x478   : > { %v11547_v43 = vpack.c.bf16 %v5513_v12, %v5510_v18  ;;  %v5524_v44 = vsel %vm5523_vm8, %v5513_v12, 0.0  ;;  %v9285_v18 = vld [vmem:[%s11969_s7 + $0x354] ss:$8 sps:$4 sm:$0xff]   ;;  %v9289_v38 = vld [vmem:[%s11969_s7 + $0x340] ss:$8 sps:$4 sm:$0xff]  }
 0x479   : > { %v5525_v51 = vadd.f32 %v5524_v44, %v11496_v1  ;;  %v3482_v1 = vsel %vm1175_vm9, %v3480_v48, 0.0  ;;  %v9292_v12 = vld [vmem:[%s11969_s7 + $0xd0] ss:$8 sps:$4 sm:$0xff]   ;;  %v9298_v44 = vld [vmem:[%s11969_s7 + $0xc0] ss:$8 sps:$4 sm:$0xff]  }
 0x47a   : > { %8057 = vmatmul.mubr.msk.bf16.vlgmr.msra.gmra.mxu0 %vm1155_vm1, %v11547_v43  ;;  %v5648_v46 = vshll.u32 %v11547_v43, 16  ;;  %v5646_v63 = vshrl.u32 %v11547_v43, 16  ;;  %v3485_v3 = vadd.f32 %v3484_v57, %v3482_v1  ;;  %v9306_v48 = vld [vmem:[%s11969_s7 + $0xb4] ss:$8 sps:$4 sm:$0xff]   ;;  %v6267_v1 = vrot.slane %v11491_v4, 1 }
 0x47b   : > { %6476 = vmatpush1.bf16.msra.mxu0 %v9223_v41  ;;  %6507 = vmatprep.mubr.bf16.mxu0 %v6268_v49  ;;  %v9295_v41 = vld [vmem:[%s11969_s7 + $0x330] ss:$8 sps:$4 sm:$0xff]   ;;  %v9301_v49 = vld [vmem:[%s11969_s7 + $0x320] ss:$8 sps:$4 sm:$0xff]   ;;  %v9318_v57 = vld [vmem:[%s11969_s7 + $0x94] ss:$8 sps:$4 sm:$0xff]  }
 0x47c   : > { %5526 = vadd.xlane.f32.xlu1 %v5525_v51  ;;  %1180 = vadd.xlane.f32.xlu0 %v1179_v13  ;;  %v5650_v59 = vrot.slane %v5648_v46, 1  ;;  %v9309_v51 = vld [vmem:[%s11969_s7 + $0x314] ss:$8 sps:$4 sm:$0xff]   ;;  %v9307_v13 = vld [vmem:[%s11969_s7 + $0x310] ss:$8 sps:$4 sm:$0xff]  }
 0x47d   : > { %6477 = vmatprep.subr.bf16.mxu0 %v9231_v54  ;;  %v9312_v54 = vld [vmem:[%s11969_s7 + $0xa4] ss:$8 sps:$4 sm:$0xff]  }
 0x47e   : > { %v5651_v6 = vor.u32 %v5650_v59, %v5646_v63  ;;  %v9315_v46 = vld [vmem:[%s11969_s7 + $0x304] ss:$8 sps:$4 sm:$0xff]   ;;  %v9313_v63 = vld [vmem:[%s11969_s7 + $0x300] ss:$8 sps:$4 sm:$0xff]   ;;  %v9316_v59 = vld [vmem:[%s11969_s7 + $0x90] ss:$8 sps:$4 sm:$0xff]  }
 0x47f   : > { %6478 = vmatpush1.bf16.msra.mxu0 %v9229_v60  ;;  %v9310_v60 = vld [vmem:[%s11969_s7 + $0xa0] ss:$8 sps:$4 sm:$0xff]  }
 0x480   : > { %3486 = vadd.xlane.f32.xlu1 %v3485_v3  ;;  %8016 = vmatmul.mubr.msk.bf16.vlgmr.msra.gmra.mxu1 %vm1155_vm1, %v5651_v6  ;;  %v9319_v3 = vld [vmem:[%s11969_s7 + $0x80] ss:$8 sps:$4 sm:$0xff]   ;;  %v9324_v6 = vld [vmem:[%s11969_s7 + $0x3b4] ss:$8 sps:$4 sm:$0xff]  }
 0x481   : > { %6142 = vmatpush1.bf16.msra.mxu1 %v9232_v0  ;;  %6173 = vmatprep.mubr.bf16.mxu1 %v11493_v61  ;;  %v9249_v61 = vld [vmem:[%s11969_s7 + $0x2b4] ss:$8 sps:$4 sm:$0xff]   ;;  %v9321_v0 = vld [vmem:[%s11969_s7 + $0x84] ss:$8 sps:$4 sm:$0xff]  }
 0x482   : > { %6479 = vmatprep.subr.bf16.mxu0 %v9237_v10  ;;  %6143 = vmatprep.subr.bf16.mxu1 %v9240_v14  ;;  %v9322_v10 = vld [vmem:[%s11969_s7 + $0x3b0] ss:$8 sps:$4 sm:$0xff]   ;;  %v9327_v14 = vld [vmem:[%s11969_s7 + $0x3a4] ss:$8 sps:$4 sm:$0xff]  }
 0x483   : > { %6480 = vmatpush1.bf16.msra.mxu0 %v9235_v16  ;;  %v9325_v16 = vld [vmem:[%s11969_s7 + $0x3a0] ss:$8 sps:$4 sm:$0xff]  }
 0x484   : > { %6481 = vmatprep.subr.bf16.mxu0 %v9243_v19  ;;  %v9330_v19 = vld [vmem:[%s11969_s7 + $0x394] ss:$8 sps:$4 sm:$0xff]  }
 0x485   : > { %6144 = vmatpush1.bf16.msra.mxu1 %v9238_v20  ;;  %v9328_v20 = vld [vmem:[%s11969_s7 + $0x390] ss:$8 sps:$4 sm:$0xff]  }
 0x486   : > { %6145 = vmatprep.subr.bf16.mxu1 %v9246_v24  ;;  %v6269_v24 = vrot.slane %v11547_v43, 1 }
 0x487   : > { %6482 = vmatpush1.bf16.msra.mxu0 %v9241_v52 }
 0x488   : > { %6483 = vmatprep.subr.bf16.mxu0 %v9249_v61  ;;  %v5528_v61 = vld [vmem:[%s11973_s11] sm:$0xff] }
 0x489   : > { %6146 = vmatpush1.bf16.msra.mxu1 %v9244_v25  ;;  %v5529_v25 = vld [vmem:[%s11973_s11 + $0x8] sm:$0x3] }
 0x48a   : > { %6147 = vmatprep.subr.bf16.mxu1 %v9252_v26 }
 0x48b   : > { %6484 = vmatpush1.bf16.msra.mxu0 %v9247_v27 }
 0x48c   : > { %6485 = vmatprep.subr.bf16.mxu0 %v9255_v28 }
 0x48d   : > { %6148 = vmatpush1.bf16.msra.mxu1 %v9250_v29 }
 0x48e   : > { %6149 = vmatprep.subr.bf16.mxu1 %v9258_v30 }
 0x48f   : > { %6486 = vmatpush1.bf16.msra.mxu0 %v9253_v31 }
 0x490   : > { %6487 = vmatprep.subr.bf16.mxu0 %v9261_v33 }
 0x491   : > { %6150 = vmatpush1.bf16.msra.mxu1 %v9256_v32 }
 0x492   : > { %6151 = vmatprep.subr.bf16.mxu1 %v9264_v53 }
 0x493   : > { %6488 = vmatpush1.bf16.msra.mxu0 %v9259_v36 }
 0x494   : > { %6489 = vmatprep.subr.bf16.mxu0 %v9267_v5 }
 0x495   : > { %6152 = vmatpush1.bf16.msra.mxu1 %v9262_v8 }
 0x496   : > { %6153 = vmatprep.subr.bf16.mxu1 %v9270_v62 }
 0x497   : > { %6490 = vmatpush1.bf16.msra.mxu0 %v9265_v42 }
 0x498   : > { %6491 = vmatprep.subr.bf16.mxu0 %v9273_v34 }
 0x499   : > { %6154 = vmatpush1.bf16.msra.mxu1 %v9268_v45 }
 0x49a   : > { %6155 = vmatprep.subr.bf16.mxu1 %v9276_v23 }
 0x49b   : > { %6492 = vmatpush2.bf16.msra.mxu0 %v9271_v9 }
 0x49c   : > { %6493 = vmatprep.subr.bf16.mxu0 %v9279_v47 }
 0x49d   : > { %6156 = vmatpush1.bf16.msra.mxu1 %v9274_v35 }
 0x49e   : > { %6157 = vmatprep.subr.bf16.mxu1 %v9282_v15 }
 0x49f   : > { %6494 = vmatpush2.bf16.msra.mxu0 %v9277_v56 }
 0x4a0   : > { %6495 = vmatprep.subr.bf16.mxu0 %v9285_v18 }
 0x4a1   : > { %6158 = vmatpush2.bf16.msra.mxu1 %v9280_v7 }
 0x4a2   : > { %6159 = vmatprep.subr.bf16.mxu1 %v9288_v17 }
 0x4a3   : > { %6496 = vmatpush2.bf16.msra.mxu0 %v9283_v11 }
 0x4a4   : > { %6497 = vmatprep.subr.bf16.mxu0 %v9291_v22 }
 0x4a5   : > { %6160 = vmatpush2.bf16.msra.mxu1 %v9286_v21 }
 0x4a6   : > { %6161 = vmatprep.subr.bf16.mxu1 %v9294_v37 }
 0x4a7   : > { %6498 = vmatpush2.bf16.msra.mxu0 %v9289_v38 }
 0x4a8   : > { %6499 = vmatprep.subr.bf16.mxu0 %v9297_v40 }
 0x4a9   : > { %6162 = vmatpush2.bf16.msra.mxu1 %v9292_v12 }
 0x4aa   : > { %6163 = vmatprep.subr.bf16.mxu1 %v9300_v50 }
 0x4ab   : > { %6500 = vmatpush2.bf16.msra.mxu0 %v9295_v41 }
 0x4ac   : > { %6501 = vmatprep.subr.bf16.mxu0 %v9303_v55 }
 0x4ad   : > { %6164 = vmatpush2.bf16.msra.mxu1 %v9298_v44 }
 0x4ae   : > { %6165 = vmatprep.subr.bf16.mxu1 %v9306_v48 }
 0x4af   : > { %6502 = vmatpush2.bf16.msra.mxu0 %v9301_v49 }
 0x4b0   : > { %6503 = vmatprep.subr.bf16.mxu0 %v9309_v51 }
 0x4b1   : > { %6166 = vmatpush2.bf16.msra.mxu1 %v9304_v58 }
 0x4b2   : > { %6167 = vmatprep.subr.bf16.mxu1 %v9312_v54 }
 0x4b3   : > { %6504 = vmatpush2.bf16.msra.mxu0 %v9307_v13 }
 0x4b4   : > { %6505 = vmatprep.subr.bf16.mxu0 %v9315_v46 }
 0x4b5   : > { %6168 = vmatpush2.bf16.msra.mxu1 %v9310_v60 }
 0x4b6   : > { %6169 = vmatprep.subr.bf16.mxu1 %v9318_v57 }
 0x4b7   : > { %6506 = vmatpush2.bf16.msra.mxu0 %v9313_v63 }
 0x4b8   : > { %8418 = vmatprep.subr.bf16.mxu0 %v9401_v39 }
 0x4b9   : > { %6170 = vmatpush2.bf16.msra.mxu1 %v9316_v59 }
 0x4ba   : > { %6508 = vmatmul.mubr.bf16.vlgmr.msra.gmra.mxu0 %v6267_v1  ;;  %6171 = vmatprep.subr.bf16.mxu1 %v9321_v0 }
 0x4bb   : > { %8422 = vmatprep.mubr.msk.bf16.mxu0 %vm9402_vm5, %v9401_v39 }
 0x4bd   : > { %6172 = vmatpush2.bf16.msra.mxu1 %v9319_v3 }
 0x4be   : > { %6524 = vmatprep.subr.bf16.mxu1 %v9324_v6 }
 0x4c0   : > { %6174 = vmatmul.mubr.bf16.vlgmr.msra.gmra.mxu1 %v11491_v4  ;;  %v9333_v4 = vld [vmem:[%s11969_s7 + $0x384] ss:$8 sps:$4 sm:$0xff]  }
 0x4c1   : > { %6525 = vmatpush1.bf16.msra.mxu1 %v9322_v10  ;;  %6548 = vmatprep.mubr.bf16.mxu1 %v9400_v2  ;;  %v9331_v2 = vld [vmem:[%s11969_s7 + $0x380] ss:$8 sps:$4 sm:$0xff]  }
 0x4c2   : > { %6526 = vmatprep.subr.bf16.mxu1 %v9327_v14 }
 0x4c5   : > { %6527 = vmatpush1.bf16.msra.mxu1 %v9325_v16 }
 0x4c6   : > { %6528 = vmatprep.subr.bf16.mxu1 %v9330_v19 }
 0x4c9   : > { %6529 = vmatpush1.bf16.msra.mxu1 %v9328_v20  ;;  %v6559_v20 = vld [vmem:[%s11974_s12] sm:$0x1] }
 0x4ca   : > { %6530 = vmatprep.subr.bf16.mxu1 %v9333_v4  ;;  %v6666_v4 = vld [vmem:[%s11975_s13 + $0xf8] sm:$0xff] }
 0x4cd   : > { %6531 = vmatpush1.bf16.msra.mxu1 %v9331_v2 }
 0x4d0   : > { %8138 = vmatmul.mubr.msk.bf16.vlgmr.msra.gmra.mxu1 %vm1155_vm1, %v6269_v24  ;;  %v6650_v24 = vld [vmem:[%s11975_s13 + $0x78] sm:$0xff] }
 0x4d1   : > { %6628 = vmatprep.mubr.f32.mxu1 %v9401_v39 }
 0x500   : > { %v5518_v52 = vpop.xlane.xlu0 %5517 }
 0x501   : > { %v5530_v26 = vmul.f32 %v5528_v61, %v5518_v52  ;;  %v6665_v52 = vld [vmem:[%s11975_s13 + $0xf0] sm:$0xff] }
 0x503   : > { %v5532_v31 = vsel %vm1175_vm9, %v5530_v26, 0.0  ;;  %v6664_v26 = vld [vmem:[%s11975_s13 + $0xe8] sm:$0xff] }
 0x505   : > { %v5527_v27 = vpop.xlane.xlu1 %5526  ;;  %v1181_v28 = vpop.xlane.xlu0 %1180 }
 0x506   : > { %v5531_v29 = vmul.f32 %v5529_v25, %v5527_v27  ;;  %v1182_v30 = vrot.slane %v1181_v28, 4  ;;  %v6649_v25 = vld [vmem:[%s11975_s13 + $0x70] sm:$0xff] }
 0x508   : > { %v1183_v43 = vadd.f32 %v1182_v30, %v1181_v28  ;;  %v5534_v33 = vsel %vm5533_vm11, %v5531_v29, 0.0  ;;  %v6648_v28 = vld [vmem:[%s11975_s13 + $0x68] sm:$0xff]  ;;  %v6663_v29 = vld [vmem:[%s11975_s13 + $0xe0] sm:$0xff] }
 0x509   : > { %v3487_v32 = vpop.xlane.xlu1 %3486  ;;  %v5535_v53 = vadd.f32 %v5534_v33, %v5532_v31  ;;  %v6662_v31 = vld [vmem:[%s11975_s13 + $0xd8] sm:$0xff] }
 0x50a   : > { %v1184_v36 = vrot.slane %v1183_v43, 2  ;;  %v3488_v5 = vrot.slane %v3487_v32, 4 }
 0x50b   : > { %5536 = vadd.xlane.f32.xlu0 %v5535_v53  ;;  %v6661_v53 = vld [vmem:[%s11975_s13 + $0xd0] sm:$0xff] }
 0x50c   : > { %v3489_v8 = vadd.f32 %v3488_v5, %v3487_v32  ;;  %v1185_v62 = vadd.f32 %v1184_v36, %v1183_v43  ;;  %v6647_v43 = vld [vmem:[%s11975_s13 + $0x60] sm:$0xff]  ;;  %v6646_v32 = vld [vmem:[%s11975_s13 + $0x58] sm:$0xff]  ;;  %v6645_v36 = vld [vmem:[%s11975_s13 + $0x50] sm:$0xff] }
 0x50d   : > { %v6660_v5 = vld [vmem:[%s11975_s13 + $0xc8] sm:$0xff] }
 0x50e   : > { %v3490_v42 = vrot.slane %v3489_v8, 2  ;;  %v1186_v34 = vrot.slane %v1185_v62, 1 }
 0x510   : > { %v1187_v45 = vadd.f32 %v1186_v34, %v1185_v62  ;;  %v3491_v23 = vadd.f32 %v3490_v42, %v3489_v8  ;;  %v6644_v8 = vld [vmem:[%s11975_s13 + $0x48] sm:$0xff]  ;;  %v6659_v62 = vld [vmem:[%s11975_s13 + $0xc0] sm:$0xff]  ;;  %v6658_v34 = vld [vmem:[%s11975_s13 + $0xb8] sm:$0xff] }
 0x511   : > { %v6643_v42 = vld [vmem:[%s11975_s13 + $0x40] sm:$0xff] }
 0x512   : > { %8426 = vpush %v1187_v45  ;;  %v3492_v9 = vrot.slane %v3491_v23, 1  ;;  %v6642_v45 = vld [vmem:[%s11975_s13 + $0x38] sm:$0xff] }
 0x514   : > { %v3493_v47 = vadd.f32 %v3492_v9, %v3491_v23  ;;  %v6657_v23 = vld [vmem:[%s11975_s13 + $0xb0] sm:$0xff] }
 0x515   : > { %v6641_v9 = vld [vmem:[%s11975_s13 + $0x30] sm:$0xff] }
 0x516   : > { %8428 = vpush %v3493_v47  ;;  %v6656_v47 = vld [vmem:[%s11975_s13 + $0xa8] sm:$0xff] }
 0x51f   : > { %v5891_v35 = vpop.f32.mrf.mxu0 }
 0x521   : > { %v5893_v15 = vpop.f32.mrf.mxu0 }
 0x523   : > { %v5895_v56 = vpop.f32.mrf.mxu0 }
 0x524   : > { %v6639_v56 = vld [vmem:[%s11975_s13 + $0x20] sm:$0xff] }
 0x525   : > { %v5896_v18 = vpop.f32.mrf.mxu0 }
 0x526   : > { %v6654_v18 = vld [vmem:[%s11975_s13 + $0x98] sm:$0xff] }
 0x53a   : > { %v6216_v7 = vpop.f32.mrf.mxu0 }
 0x53c   : > { %v6218_v17 = vpop.f32.mrf.mxu0 }
 0x53e   : > { %v6220_v11 = vpop.f32.mrf.mxu0 }
 0x53f   : > { %v6637_v11 = vld [vmem:[%s11975_s13 + $0x10] sm:$0xff] }
 0x540   : > { %v5932_v22 = vpop.f32.mrf.mxu1  ;;  %v6221_v21 = vpop.f32.mrf.mxu0 }
 0x541   : > { %v5933_v37 = vadd.f32 %v5932_v22, %v5891_v35  ;;  %v6640_v35 = vld [vmem:[%s11975_s13 + $0x28] sm:$0xff] }
 0x542   : > { %v5934_v38 = vpop.f32.mrf.mxu1  ;;  %v6652_v22 = vld [vmem:[%s11975_s13 + $0x88] sm:$0xff] }
 0x543   : > { %v5935_v40 = vadd.f32 %v5934_v38, %v5893_v15  ;;  %v6655_v15 = vld [vmem:[%s11975_s13 + $0xa0] sm:$0xff]  ;;  %v6636_v21 = vld [vmem:[%s11975_s13 + $0x8] sm:$0xff]  ;;  %s8427_s27 = spop %8426 }
 0x544   : > { %v5936_v12 = vpop.f32.mrf.mxu1  ;;  %v6635_v38 = vld [vmem:[%s11975_s13] sm:$0xff] }
 0x546   : > { %v5937_v50 = vpop.f32.mrf.mxu1 }
 0x547   : > { %v9334_v50 = vld [vmem:[%s11976_s14 + $0x8] sm:$0xff]   ;;  %s8429_s22 = spop %8428 }
 0x57a   : > { %v6509_v41 = vpop.f32.mrf.mxu0 }
 0x57c   : > { %v6511_v55 = vpop.f32.mrf.mxu0 }
 0x57e   : > { %v6513_v44 = vpop.f32.mrf.mxu0 }
 0x580   : > { %v6175_v48 = vpop.f32.mrf.mxu1  ;;  %v6514_v49 = vpop.f32.mrf.mxu0 }
 0x581   : > { %v6176_v46 = vadd.f32 %v6175_v48, %v5933_v37  ;;  %v6651_v37 = vld [vmem:[%s11975_s13 + $0x80] sm:$0xff] }
 0x582   : > { %v6177_v51 = vpop.f32.mrf.mxu1  ;;  %v6738_v49 = vld [vmem:[%s11970_s8] sm:$0x1] }
 0x583   : > { %v6178_v13 = vadd.f32 %v6177_v51, %v5935_v40  ;;  %v6217_v1 = vadd.f32 %v6216_v7, %v6176_v46  ;;  %v6638_v7 = vld [vmem:[%s11975_s13 + $0x18] sm:$0xff]  ;;  %v9337_v46 = vld [vmem:[%s11978_s16] sm:$0xff]  }
 0x584   : > { %v6179_v58 = vpop.f32.mrf.mxu1 }
 0x585   : > { %v6219_v59 = vadd.f32 %v6218_v17, %v6178_v13  ;;  %v6653_v17 = vld [vmem:[%s11975_s13 + $0x90] sm:$0xff]  ;;  %v9336_v13 = vld [vmem:[%s11978_s16 + $0x8] sm:$0xff]  }
 0x586   : > { %v6180_v54 = vpop.f32.mrf.mxu1  ;;  %8419 = vmatpush3.bf16.msra.mxu0 %v9336_v13 }
 0x587   : > { %8420 = vmatprep.subr.bf16.mxu0 %v9401_v39 }
 0x58a   : > { %8421 = vmatpush3.bf16.msra.mxu0 %v9337_v46 }
 0x590   : > { %v6550_v60 = vpop.f32.mrf.mxu1 }
 0x591   : > { %v6551_v57 = vadd.f32 %v6550_v60, %v6509_v41  ;;  %v9335_v41 = vld [vmem:[%s11976_s14] sm:$0xff]  }
 0x592   : > { %v6552_v63 = vpop.f32.mrf.mxu1  ;;  %v6745_v60 = vld [vmem:[%s11977_s15] sm:$0x1] }
 0x593   : > { %v6553_v0 = vadd.f32 %v6552_v63, %v6511_v55  ;;  %v6557_v16 = vadd.f32 %v6551_v57, %v6217_v1 }
 0x594   : > { %v6554_v3 = vpop.f32.mrf.mxu1  ;;  %v5537_v6 = vpop.xlane.xlu0 %5536 }
 0x595   : > { %v6558_v10 = vadd.f32 %v6553_v0, %v6219_v59  ;;  %v5538_v14 = vrot.slane %v5537_v6, 4 }
 0x596   : > { %v6555_v19 = vpop.f32.mrf.mxu1 }
 0x597   : > { %v5539_v2 = vadd.f32 %v5538_v14, %v5537_v6  ;;  %6594 = vmatprep.subr.mxu1 %v6558_v10 }
 0x598   : > { %6595 = vmatpush1.msra.mxu1 %v6557_v16 }
 0x599   : > { %v5540_v61 = vrot.slane %v5539_v2, 2  ;;  %8139 = vmatmul.mubr.msk.f32.vlgmr.msra.gmra.mxu1 %vm6560_vm12, %v6559_v20  ;;  %8309 = vmatprep.subr.mxu1 %v6666_v4 }
 0x59a   : > { %8310 = vmatpush3.msra.mxu1 %v6650_v24  ;;  %v6821_v24 = vld [vmem:[%s11979_s17] sm:$0x1] }
 0x59b   : > { %v5541_v27 = vadd.f32 %v5540_v61, %v5539_v2  ;;  %8311 = vmatprep.subr.mxu1 %v6665_v52  ;;  %v3495_v61 = vstv %s8429_s22  ;;  %s9403_s22 = smov [#allocation2]  }
 0x59c   : > { %8312 = vmatpush3.msra.mxu1 %v6649_v25  ;;  %s9342_s26 = sshll.u32 %s9403_s22, 4  ;;  %s9343_s26 = int_to_ptr.vmem [resolvable:$false] %s9342_s26 }
 0x59d   : > { %v5542_v30 = vrot.slane %v5541_v27, 1  ;;  %8313 = vmatprep.subr.mxu1 %v6664_v26  ;;  %s9344_s25 = scalar_lea.vmem %s9343_s26, 32  ;;  %p9345_p0 = scmp.lt.s32.totalorder %s11918_s0, %s9343_s26 }
 0x59e   : > { %8314 = vmatpush3.msra.mxu1 %v6648_v28  ;;  %p9346_p1 = scmp.lt.s32.totalorder %s9344_s25, %s9338_s2 }
 0x59f   : > { %v5543_v33 = vadd.f32 %v5542_v30, %v5541_v27  ;;  %8315 = vmatprep.subr.mxu1 %v6663_v29  ;;  %v1189_v27 = vstv %s8427_s27 }
 0x5a0   : > { %8316 = vmatpush3.msra.mxu1 %v6647_v43  ;;  %v3496_v29 = vadd.f32 %v3495_v61, %v1189_v27  ;;  %p9347_p2 = por %p9346_p1, %p9345_p0 }
 0x5a1   : > { %8430 = vpush %v5543_v33  ;;  %8317 = vmatprep.subr.mxu1 %v6662_v31 }
 0x5a2   : > { %8318 = vmatpush3.msra.mxu1 %v6646_v32  ;;  %p9348_p3 = pnand %p9347_p2, %p9341_p13 }
 0x5a3   : > { %8319 = vmatprep.subr.mxu1 %v6661_v53 }
 0x5a4   : > { %8320 = vmatpush3.msra.mxu1 %v6645_v36 }
 0x5a5   : > { %8321 = vmatprep.subr.mxu1 %v6660_v5 }
 0x5a6   : > { %8322 = vmatpush3.msra.mxu1 %v6644_v8 }
 0x5a7   : > { %8323 = vmatprep.subr.mxu1 %v6659_v62 }
 0x5a8   : > { %8324 = vmatpush3.msra.mxu1 %v6643_v42 }
 0x5a9   : > { %8325 = vmatprep.subr.mxu1 %v6658_v34 }
 0x5aa   : > { %8326 = vmatpush3.msra.mxu1 %v6642_v45 }
 0x5ab   : > { %8327 = vmatprep.subr.mxu1 %v6657_v23 }
 0x5ac   : > { %8328 = vmatpush3.msra.mxu1 %v6641_v9 }
 0x5ad   : > { %8329 = vmatprep.subr.mxu1 %v6656_v47 }
 0x5ae   : > { %8330 = vmatpush3.msra.mxu1 %v6640_v35 }
 0x5af   : > { %8331 = vmatprep.subr.mxu1 %v6655_v15 }
 0x5b0   : > { %8332 = vmatpush3.msra.mxu1 %v6639_v56 }
 0x5b1   : > { %8333 = vmatprep.subr.mxu1 %v6654_v18 }
 0x5b2   : > { %8334 = vmatpush3.msra.mxu1 %v6638_v7 }
 0x5b3   : > { %8335 = vmatprep.subr.mxu1 %v6653_v17 }
 0x5b4   : > { %8336 = vmatpush3.msra.mxu1 %v6637_v11 }
 0x5b5   : > { %8337 = vmatprep.subr.mxu1 %v6652_v22 }
 0x5b6   : > { %8338 = vmatpush3.msra.mxu1 %v6636_v21 }
 0x5b7   : > { %8339 = vmatprep.subr.mxu1 %v6651_v37 }
 0x5b8   : > { %8340 = vmatpush3.msra.mxu1 %v6635_v38 }
 0x5b9   : > { %8410 = vmatprep.subr.bf16.mxu1 %v9401_v39 }
 0x5d2   : > { %s11911_s18 = spop %8430 }
 0x5d3   : > { %v5545_v28 = vstv %s11911_s18 }
 0x659   : > { %v6630_v40 = vpop.f32.mrf.mxu1 }
 0x65b   : > { %v6632_v12 = vpop.f32.mrf.mxu1 }
 0x65c   : > { %6731 = vmatprep.mubr.f32.mxu1 %v6632_v12 }
 0x65d   : > { %6732 = vmatmul.mubr.f32.vlgmr.msra.gmra.mxu1 %v6630_v40 }
 0x65e   : > { %8414 = vmatprep.mubr.msk.bf16.mxu1 %vm9402_vm5, %v9401_v39  ;;  %8411 = vmatpush3.bf16.msra.mxu1 %v9334_v50 }
 0x65f   : > { %8412 = vmatprep.subr.bf16.mxu1 %v9401_v39 }
 0x662   : > { %8413 = vmatpush3.bf16.msra.mxu1 %v9335_v41 }
 0x71d   : > { %v8341_v55 = vpop.f32.mrf.mxu1 }
 0x71f   : > { %v8342_v44 = vpop.f32.mrf.mxu1 }
 0x720   : > { %v8343_v48 = vadd.f32 %v8342_v44, %v8341_v55 }
 0x722   : > { %v6737_v51 = vmul.f32 0.015625, %v8343_v48 }
 0x724   : > { %v6739_v58 = vadd.f32 %v6738_v49, %v6737_v51 }
 0x726   : > { %v6740_v54 = vpack.c.bf16 %v6739_v58, %v6739_v58 }
 0x728   : > { %8415 = vmatmul.mubr.msk.bf16.vlgmr.msra.gmra.mxu1 %vm6758_vm13, %v6740_v54 }
 0x7e8   : > { %v6796_v57 = vpop.f32.mrf.mxu1 }
 0x7e9   : > { %v6797_v63 = vadd.f32 %v6796_v57, %v6745_v60 }
 0x7ea   : > { %v8416_v59 = vpop.f32.mrf.mxu1 }
 0x7eb   : > { %v6802_v0 = vmax.f32 %v6797_v63, 0.0 }
 0x7ec   : > { %v6799_v1 = vpop.f32.mrf.mxu1 }
 0x7ed   : > { %v6816_v3 = vpack.c.bf16 %v6802_v0, %v6802_v0  ;;  %v6804_v6 = vsel %vm6803_vm14, %v6802_v0, 0.0 }
 0x7ee   : > { %v8417_v39 = vpop.f32.mrf.mxu1  ;;  %6805 = vadd.xlane.f32.xlu1 %v6804_v6 }
 0x7ef   : > { %8423 = vmatmul.mubr.msk.bf16.vlgmr.msra.gmra.mxu0 %vm6758_vm13, %v6816_v3 }
 0x877   : > { %v6806_v10 = vpop.xlane.xlu1 %6805 }
 0x878   : > { %v6807_v14 = vrot.slane %v6806_v10, 4 }
 0x87a   : > { %v6808_v16 = vadd.f32 %v6807_v14, %v6806_v10 }
 0x87c   : > { %v6809_v19 = vrot.slane %v6808_v16, 2 }
 0x87e   : > { %v6810_v20 = vadd.f32 %v6809_v19, %v6808_v16 }
 0x880   : > { %v6811_v4 = vrot.slane %v6810_v20, 1 }
 0x882   : > { %v6812_v2 = vadd.f32 %v6811_v4, %v6810_v20 }
 0x884   : > { %8432 = vpush %v6812_v2 }
 0x8af   : > { %v6871_v52 = vpop.f32.mrf.mxu0 }
 0x8b0   : > { %v6872_v25 = vadd.f32 %v6871_v52, %v6821_v24 }
 0x8b1   : > { %v8424_v26 = vpop.f32.mrf.mxu0 }
 0x8b2   : > { %6878 = vst.msk [vmem:[%s595_s24] sm:$0x1] %vm6877_vm15, %v6872_v25 }
 0x8b3   : > { %v6874_v30 = vpop.f32.mrf.mxu0 }
 0x8b4   : > { %9351 = shalt.err (!%p9348_p3)
}
 0x8b5   : > { %s9352_s27 = scalar_lea.hbm %s11916_s4, 16  ;;  %s9356_s18 = scalar_lea.hbm %s12017_s28, 32 }
 0x8b6   : > { %p9353_p4 = scmp.ne.s32.totalorder %s11916_s4, %s9352_s27  ;;  %p9357_p9 = scmp.lt.s32.totalorder %s11916_s4, %s12017_s28 }
 0x8b7   : > { %p9358_p10 = scmp.lt.s32.totalorder %s9356_s18, %s9352_s27 }
 0x8b8   : > { %p9354_p7 = pnand %p9353_p4, %p9542_p5 }
 0x8b9   : > { %p9359_p11 = por %p9358_p10, %p9357_p9 }
 0x8ba   : > { %p9355_p8 = pneg %p9354_p7 }
 0x8bc   : > { %p9360_p12 = pnand %p9359_p11, %p9355_p8 }
 0x8be   : > { %9363 = shalt.err (!%p9360_p12)
}
 0x8bf   : > { %s12018_s2 = sld [smem:[#allocation12_spill]]  ;;  %v5546_v43 = vadd.f32 %v5545_v28, %v3496_v29  ;;  %s8433_s22 = spop %8432  ;;  %v8425_v31 = vpop.f32.mrf.mxu0  ;;  %vm6879_vm0 = vcmask 0  }
 0x8c0   : > { %8434 = dma.vmem_to_hbm [thread:$0]  (%p9542_p5), %s11918_s0, 16, %s11916_s4, %s6882_s1   ;;  %v6814_v33 = vstv %s8433_s22 }
 0x8c1   : > { %s12019_s20 = sld [smem:[#allocation19_spill]]  ;;  %v6815_v32 = vadd.f32 %v6814_v33, %v5546_v43 }
 0x8c7   : > { %s608_s24 = scalar_lea.vmem %s12019_s20, %s12018_s2 }
 0x8c8   : > { %6880 = vst.msk [vmem:[%s608_s24] sm:$0x1] %vm6879_vm0, %v6815_v32 }
 0x8c9 PF: > { %s12020_s27 = sld [smem:[#allocation7_spill]] }
 0x8ca   : > { %s12021_s18 = sld [smem:[#allocation5_spill]] }
 0x8cf   : > { %p8440_p13 = scmp.ge.s32.totalorder %s12020_s27, 2 }
 0x8d0   : > { %s6912_s19 = sand.u32 1, %s12021_s18  }
 0x8d1   : > { %p8437_p0 = pnand %p8440_p13, %p9546_p6  ;;  %s6913_s4 = scalar_lea.sflag [#allocation3], %s6912_s19 }
 0x8d3   : > { %p8438_p5 = pneg %p8437_p0 }
 0x8d5   : > { %9381 = dma.done.wait (%p8438_p5), %s6913_s4, 16  }
 0x8d6   : > { %9383 = vsyncadd (%p8438_p5), %s6913_s4, 4294967280  ;;  %s12023_s21 = sld [smem:[#allocation8_spill]]  ;;  %s12026_s0 = smov %s9390_s30 }
 0x8d7   : > { %s12024_s1 = sld [smem:[#allocation6_spill]] }
 0x8d8   : > { %s12025_s20 = sld [smem:[#allocation9_spill]] }
 0x8dc   : > { %p30_p1 = scmp.ge.s32.totalorder %s12023_s21, 4  }
 0x8dd   : > { %s12027_s30 = smov %s12024_s1 }
 0x8de   :  { %32 = sbr.rel (!%p30_p1) target bundleno = 11 (0xb), region = 147 }
 0x8e3   :  { %6923 = vsyncpa [#allocation3], 1 }
 0x8e4   :  { %6925 = vsyncpa [#allocation3 + $0x1], 1 }

</bundles_post_ra>
